<compile_context>
chip_gen: v7x
topology: tpu7x:2x2x1
jax: 0.10.0
libtpu: 0.0.40
codegen_flags: <defaults>
</compile_context>

<pallas_src>
import functools
import numpy as np
import jax
import jax.numpy as jnp
from jax import lax
from jax.experimental import pallas as pl
from jax.experimental.pallas import tpu as pltpu

COMPUTE_DTYPE = jnp.bfloat16   # MXU operand dtype (accumulation stays f32 inside the kernels)
LANES = 128                    # all channel dims padded to one full lane group
TAPS = 4                       # the 2x2 maxpool window positions

_CompilerParams = getattr(pltpu, "CompilerParams", None) or getattr(pltpu, "TPUCompilerParams", None)


def _mosaic_params(*axes):
    if _CompilerParams is None:
        return None
    return _CompilerParams(dimension_semantics=tuple(axes))


def _round_up(x, m):
    return (x + m - 1) // m * m


# ---------------- Pallas kernels ----------------

def _conv_relu_pool_kernel(x_ref, w_ref, b_ref, o_ref):
    """Fused conv + bias + ReLU + 2x2 maxpool.

    x_ref : (TM, Kp) bf16   one 6x6xCin union patch per pooled output pixel (lane-padded K)
    w_ref : (Kp, 4*128) bf16 four tap weight blocks (conv weight embedded at the 4 window offsets)
    b_ref : (1, 128) f32
    maxpool == lane-block max of the four f32 accumulators (bias shared, ReLU/max commute).
    """
    z = jnp.dot(x_ref[...], w_ref[...], preferred_element_type=jnp.float32)      # (TM, 512)
    acc = jnp.maximum(jnp.maximum(z[:, 0 * LANES:1 * LANES], z[:, 1 * LANES:2 * LANES]),
                      jnp.maximum(z[:, 2 * LANES:3 * LANES], z[:, 3 * LANES:4 * LANES]))
    o_ref[...] = jnp.maximum(acc + b_ref[...], 0.0).astype(o_ref.dtype)


def _conv2_pool_fc_kernel(x_ref, w2_ref, b2_ref, wf1_ref, bf1_ref,
                          wf2_ref, bf2_ref, wf3_ref, bf3_ref, o_ref, *, batch, n_pos):
    """conv2 + bias + ReLU + pool, then fc1+ReLU -> fc2+ReLU -> fc3, all in VMEM.

    x_ref rows are ordered (position-major, sample-minor): row = p*batch + n, so each fc1
    per-position weight block consumes a contiguous static row slice.
    """
    z = jnp.dot(x_ref[...], w2_ref[...], preferred_element_type=jnp.float32)      # (P*B, 512)
    acc = jnp.maximum(jnp.maximum(z[:, 0 * LANES:1 * LANES], z[:, 1 * LANES:2 * LANES]),
                      jnp.maximum(z[:, 2 * LANES:3 * LANES], z[:, 3 * LANES:4 * LANES]))
    pooled = jnp.maximum(acc + b2_ref[...], 0.0).astype(COMPUTE_DTYPE)            # (P*B, 128)

    # fc1: torch.flatten's (c,i,j) ordering is folded into the 25 per-position weight blocks.
    h = jnp.zeros((batch, LANES), jnp.float32)
    for p in range(n_pos):
        h = h + jnp.dot(pooled[p * batch:(p + 1) * batch, :], wf1_ref[p],
                        preferred_element_type=jnp.float32)
    h = jnp.maximum(h + bf1_ref[...], 0.0).astype(COMPUTE_DTYPE)

    h = jnp.maximum(jnp.dot(h, wf2_ref[...], preferred_element_type=jnp.float32)
                    + bf2_ref[...], 0.0).astype(COMPUTE_DTYPE)
    out = jnp.dot(h, wf3_ref[...], preferred_element_type=jnp.float32) + bf3_ref[...]
    o_ref[...] = out.astype(o_ref.dtype)


# ---------------- wrappers ----------------

def conv1_relu_pool(x_nhwc, w_all, b_row, *, tile_rows=2048, min_steps=2):
    """conv(5x5,VALID) + bias + ReLU + 2x2/2 maxpool via one 6x6/stride-2 patch slab."""
    n, h, w, cin = x_nhwc.shape
    win = 6                                  # union window of the 2x2 pooled taps
    hp, wp = (h - win) // 2 + 1, (w - win) // 2 + 1
    k = cin * win * win
    kp = w_all.shape[0]                      # K padded to a multiple of 128

    patches = lax.conv_general_dilated_patches(
        x_nhwc, (win, win), (2, 2), "VALID",
        dimension_numbers=("NHWC", "HWIO", "NHWC"))            # (n, hp, wp, k) feature=(c,r,s)
    patches = jnp.pad(patches, ((0, 0), (0, 0), (0, 0), (0, kp - k)))

    m = n * hp * wp
    rows = patches.reshape(m, kp)

    steps = max(min_steps, pl.cdiv(m, tile_rows))              # >=2 steps: v7x megacore sharding
    tm = max(8, _round_up(pl.cdiv(m, steps), 8))
    m_pad = _round_up(m, tm)
    if m_pad != m:
        rows = jnp.pad(rows, ((0, m_pad - m), (0, 0)))

    out = pl.pallas_call(
        _conv_relu_pool_kernel,
        out_shape=jax.ShapeDtypeStruct((m_pad, LANES), COMPUTE_DTYPE),
        grid=(m_pad // tm,),
        in_specs=[pl.BlockSpec((tm, kp), lambda i: (i, 0)),
                  pl.BlockSpec((kp, TAPS * LANES), lambda i: (0, 0)),
                  pl.BlockSpec((1, LANES), lambda i: (0, 0))],
        out_specs=pl.BlockSpec((tm, LANES), lambda i: (i, 0)),
        compiler_params=_mosaic_params("parallel"),
    )(rows, w_all, b_row)
    return out[:m], (n, hp, wp)


def conv2_pool_fc(y1_nhwc, fp):
    """conv2 + bias + ReLU + pool + flatten + fc1/fc2/fc3 in a single pallas_call."""
    n = y1_nhwc.shape[0]
    win = 6
    hp = (y1_nhwc.shape[1] - win) // 2 + 1                     # 5
    wp = (y1_nhwc.shape[2] - win) // 2 + 1                     # 5
    k = y1_nhwc.shape[3] * win * win                           # 216
    kp = fp["w2m"].shape[0]                                    # 256
    n_pos = hp * wp                                            # 25

    patches = lax.conv_general_dilated_patches(
        y1_nhwc, (win, win), (2, 2), "VALID",
        dimension_numbers=("NHWC", "HWIO", "NHWC"))            # (n, 5, 5, 216)
    patches = jnp.pad(patches, ((0, 0), (0, 0), (0, 0), (0, kp - k)))
    # (position-major, sample-minor) row order for contiguous fc1 accumulation slices.
    slab = jnp.transpose(patches, (1, 2, 0, 3)).reshape(n_pos * n, kp)

    kernel = functools.partial(_conv2_pool_fc_kernel, batch=n, n_pos=n_pos)
    return pl.pallas_call(
        kernel,
        out_shape=jax.ShapeDtypeStruct((n, LANES), jnp.float32),
        grid=(1,),
        in_specs=[pl.BlockSpec((n_pos * n, kp), lambda i: (0, 0)),
                  pl.BlockSpec(fp["w2m"].shape, lambda i: (0, 0)),
                  pl.BlockSpec((1, LANES), lambda i: (0, 0)),
                  pl.BlockSpec(fp["wf1m"].shape, lambda i: (0, 0, 0)),
                  pl.BlockSpec((1, LANES), lambda i: (0, 0)),
                  pl.BlockSpec((LANES, LANES), lambda i: (0, 0)),
                  pl.BlockSpec((1, LANES), lambda i: (0, 0)),
                  pl.BlockSpec((LANES, LANES), lambda i: (0, 0)),
                  pl.BlockSpec((1, LANES), lambda i: (0, 0))],
        out_specs=pl.BlockSpec((n, LANES), lambda i: (0, 0)),
        compiler_params=_mosaic_params("arbitrary"),
    )(slab, fp["w2m"], fp["b2r"], fp["wf1m"], fp["bf1r"],
      fp["wf2m"], fp["bf2r"], fp["wf3m"], fp["bf3r"])


def net_forward(x_nchw, fp):
    n = x_nchw.shape[0]
    x = jnp.transpose(x_nchw, (0, 2, 3, 1)).astype(COMPUTE_DTYPE)      # NCHW->NHWC once

    y, (_, hp1, wp1) = conv1_relu_pool(x, fp["w1m"], fp["b1r"])        # (n*14*14, 128) bf16
    y1 = y.reshape(n, hp1, wp1, LANES)[..., :6]                        # (n,14,14,6) bf16

    logits = conv2_pool_fc(y1, fp)                                     # (n, 128) f32
    return logits[:, :10]


# ---------------- parameter prep (done once, outside the jitted forward) ----------------

def init_params(key):
    ks = jax.random.split(key, 10)

    def u(k, shape, fan_in):  # PyTorch-style U(-1/sqrt(fan_in), 1/sqrt(fan_in))
        bound = 1.0 / (fan_in ** 0.5)
        return jax.random.uniform(k, shape, jnp.float32, -bound, bound)

    return {
        "w1": u(ks[0], (6, 3, 5, 5), 3 * 5 * 5),
        "b1": u(ks[1], (6,), 3 * 5 * 5),
        "w2": u(ks[2], (16, 6, 5, 5), 6 * 5 * 5),
        "b2": u(ks[3], (16,), 6 * 5 * 5),
        "wf1": u(ks[4], (120, 400), 400),
        "bf1": u(ks[5], (120,), 400),
        "wf2": u(ks[6], (84, 120), 120),
        "bf2": u(ks[7], (84,), 120),
        "wf3": u(ks[8], (10, 84), 84),
        "bf3": u(ks[9], (10,), 84),
    }


def prepare_params(params, dtype=COMPUTE_DTYPE):
    """Reshape / embed / zero-pad / cast all weights once (free per forward)."""

    def conv_tap_weights(w):
        # w: torch layout (Cout, Cin, 5, 5).  Build (Kp, 4*128): for tap (di,dj) of the 2x2 pool
        # window, embed the 5x5 weights at offset (di,dj) of the 6x6 union window.
        cout, cin, ks, _ = w.shape
        win = ks + 1
        wt = jnp.transpose(w, (1, 2, 3, 0))                    # (cin, kh, kw, cout)
        blocks = []
        for di in (0, 1):
            for dj in (0, 1):
                full = jnp.zeros((cin, win, win, cout), w.dtype)
                full = full.at[:, di:di + ks, dj:dj + ks, :].set(wt)
                blk = full.reshape(cin * win * win, cout)      # rows = c*36 + r*6 + s  (patch order)
                blocks.append(jnp.pad(blk, ((0, 0), (0, LANES - cout))))
        w_all = jnp.concatenate(blocks, axis=1)                # (cin*36, 4*128)
        kp = _round_up(cin * win * win, LANES)                 # 108->128, 216->256
        return jnp.pad(w_all, ((0, kp - cin * win * win), (0, 0))).astype(dtype)

    def bias_row(b):
        return jnp.pad(b.reshape(1, -1), ((0, 0), (0, LANES - b.shape[0]))).astype(jnp.float32)

    # fc1: torch.flatten order is (c, i, j); split into 25 per-position (16 -> 120) blocks so the
    # kernel never has to transpose/reshape the conv2 feature map.
    wf1_blocks = params["wf1"].T.reshape(16, 25, 120)          # [c, p, out]  (row t = c*25 + p)
    wf1_blocks = jnp.transpose(wf1_blocks, (1, 0, 2))          # (25, 16, 120)
    wf1m = jnp.pad(wf1_blocks, ((0, 0), (0, LANES - 16), (0, LANES - 120))).astype(dtype)

    wf2m = jnp.pad(params["wf2"].T, ((0, LANES - 120), (0, LANES - 84))).astype(dtype)
    wf3m = jnp.pad(params["wf3"].T, ((0, LANES - 84), (0, LANES - 10))).astype(dtype)

    return dict(
        w1m=conv_tap_weights(params["w1"]), b1r=bias_row(params["b1"]),
        w2m=conv_tap_weights(params["w2"]), b2r=bias_row(params["b2"]),
        wf1m=wf1m, bf1r=bias_row(params["bf1"]),
        wf2m=wf2m, bf2r=bias_row(params["bf2"]),
        wf3m=wf3m, bf3r=bias_row(params["bf3"]),
    )


# ---------------- pure-XLA f32 reference (catches patch-ordering / flatten bugs) ----------------

def reference_forward(x, p):
    dn = ("NCHW", "OIHW", "NCHW")
    y = lax.conv_general_dilated(x, p["w1"], (1, 1), "VALID", dimension_numbers=dn)
    y = jnp.maximum(y + p["b1"][None, :, None, None], 0.0)
    y = lax.reduce_window(y, -jnp.inf, lax.max, (1, 1, 2, 2), (1, 1, 2, 2), "VALID")
    y = lax.conv_general_dilated(y, p["w2"], (1, 1), "VALID", dimension_numbers=dn)
    y = jnp.maximum(y + p["b2"][None, :, None, None], 0.0)
    y = lax.reduce_window(y, -jnp.inf, lax.max, (1, 1, 2, 2), (1, 1, 2, 2), "VALID")
    y = y.reshape(y.shape[0], -1)                              # torch.flatten -> (c, i, j)
    y = jnp.maximum(y @ p["wf1"].T + p["bf1"], 0.0)
    y = jnp.maximum(y @ p["wf2"].T + p["bf2"], 0.0)
    return y @ p["wf3"].T + p["bf3"]


# ---------------- driver ----------------

if __name__ == "__main__":
    key = jax.random.PRNGKey(0)
    pkey, xkey = jax.random.split(key)
    params = init_params(pkey)
    fparams = prepare_params(params)

    # batch=2; 32x32 spatial is required by the module (fc1 expects 16*5*5)
    x = jax.random.normal(xkey, (2, 3, 32, 32), jnp.float32)

    fwd = jax.jit(net_forward)
    out = fwd(x, fparams)
    jax.block_until_ready(out)

    assert out.shape == (2, 10) and out.dtype == jnp.float32
    assert bool(jnp.all(jnp.isfinite(out)))

    ref = reference_forward(x, params)
    max_err = float(jnp.max(jnp.abs(out - ref)))
    assert max_err < 5e-2, f"mismatch vs XLA reference: max|diff|={max_err}"

    print("KERNEL_OK")
</pallas_src>

<mosaic_0001>
module attributes {stable_mosaic.version = 11 : i64} {
  func.func @_conv_relu_pool_kernel(%arg0: i32, %arg1: memref<200x128xbf16, #tpu.memory_space<vmem>>, %arg2: memref<128x512xbf16, #tpu.memory_space<vmem>>, %arg3: memref<1x128xf32, #tpu.memory_space<vmem>>, %arg4: memref<200x128xbf16, #tpu.memory_space<vmem>>) attributes {dimension_semantics = [#tpu.dimension_semantics<parallel>], iteration_bounds = array<i64: 2>, scalar_prefetch = 0 : i64, scratch_operands = 0 : i64, tpu.core_type = #tpu.core_type<tc>, window_params = [{transform_indices = @transform_0, window_bounds = array<i64: 200, 128>}, {pipeline_mode = #tpu.pipeline_mode<synchronous>, transform_indices = @transform_1, window_bounds = array<i64: 128, 512>}, {pipeline_mode = #tpu.pipeline_mode<synchronous>, transform_indices = @transform_2, window_bounds = array<i64: 1, 128>}, {transform_indices = @transform_3, window_bounds = array<i64: 200, 128>}]} {
    %c0 = arith.constant 0 : index
    %c0_0 = arith.constant 0 : index
    %0 = vector.load %arg1[%c0, %c0_0] : memref<200x128xbf16, #tpu.memory_space<vmem>>, vector<200x128xbf16>
    %c0_1 = arith.constant 0 : index
    %c0_2 = arith.constant 0 : index
    %1 = vector.load %arg2[%c0_1, %c0_2] : memref<128x512xbf16, #tpu.memory_space<vmem>>, vector<128x512xbf16>
    %cst = arith.constant dense<0.000000e+00> : vector<200x512xf32>
    %2 = tpu.matmul %0, %1, %cst {dimension_numbers = #tpu.dot_dimension_numbers<[1], [0], [0], [1], [0, 0, 1, 1], [], []>} : vector<200x128xbf16>, vector<128x512xbf16>, vector<200x512xf32> -> vector<200x512xf32>
    %3 = vector.extract_strided_slice %2 {offsets = [0, 0], sizes = [200, 128], strides = [1, 1]} : vector<200x512xf32> to vector<200x128xf32>
    %4 = vector.extract_strided_slice %2 {offsets = [0, 128], sizes = [200, 128], strides = [1, 1]} : vector<200x512xf32> to vector<200x128xf32>
    %5 = arith.maximumf %3, %4 : vector<200x128xf32>
    %6 = vector.extract_strided_slice %2 {offsets = [0, 256], sizes = [200, 128], strides = [1, 1]} : vector<200x512xf32> to vector<200x128xf32>
    %7 = vector.extract_strided_slice %2 {offsets = [0, 384], sizes = [200, 128], strides = [1, 1]} : vector<200x512xf32> to vector<200x128xf32>
    %8 = arith.maximumf %6, %7 : vector<200x128xf32>
    %9 = arith.maximumf %5, %8 : vector<200x128xf32>
    %c0_3 = arith.constant 0 : index
    %c0_4 = arith.constant 0 : index
    %10 = vector.load %arg3[%c0_3, %c0_4] : memref<1x128xf32, #tpu.memory_space<vmem>>, vector<1x128xf32>
    %11 = vector.broadcast %10 : vector<1x128xf32> to vector<200x128xf32>
    %12 = arith.addf %9, %11 : vector<200x128xf32>
    %cst_5 = arith.constant 0.000000e+00 : f32
    %13 = vector.broadcast %cst_5 : f32 to vector<200x128xf32>
    %14 = arith.maximumf %12, %13 : vector<200x128xf32>
    %15 = arith.truncf %14 : vector<200x128xf32> to vector<200x128xbf16>
    %c0_6 = arith.constant 0 : index
    %c0_7 = arith.constant 0 : index
    %16 = vector.load %arg4[%c0_6, %c0_7] : memref<200x128xbf16, #tpu.memory_space<vmem>>, vector<200x128xbf16>
    tpu.vector_store %arg4[%c0_6, %c0_7], %15 {strides = array<i32>} : memref<200x128xbf16, #tpu.memory_space<vmem>>, vector<200x128xbf16>,
    return
  }
  func.func @transform_0(%arg0: i32) -> (i32, i32) {
    %c0_i32 = arith.constant 0 : i32
    %c0_i32_0 = arith.constant 0 : i32
    return %arg0, %c0_i32 : i32, i32
  }
  func.func @transform_1(%arg0: i32) -> (i32, i32) {
    %c0_i32 = arith.constant 0 : i32
    %c0_i32_0 = arith.constant 0 : i32
    %c0_i32_1 = arith.constant 0 : i32
    return %c0_i32, %c0_i32_0 : i32, i32
  }
  func.func @transform_2(%arg0: i32) -> (i32, i32) {
    %c0_i32 = arith.constant 0 : i32
    %c0_i32_0 = arith.constant 0 : i32
    %c0_i32_1 = arith.constant 0 : i32
    return %c0_i32, %c0_i32_0 : i32, i32
  }
  func.func @transform_3(%arg0: i32) -> (i32, i32) {
    %c0_i32 = arith.constant 0 : i32
    %c0_i32_0 = arith.constant 0 : i32
    return %arg0, %c0_i32 : i32, i32
  }
}

module attributes {stable_mosaic.version = 11 : i64} {
  func.func @_conv2_pool_fc_kernel(%arg0: i32, %arg1: memref<50x256xbf16, #tpu.memory_space<vmem>>, %arg2: memref<256x512xbf16, #tpu.memory_space<vmem>>, %arg3: memref<1x128xf32, #tpu.memory_space<vmem>>, %arg4: memref<25x128x128xbf16, #tpu.memory_space<vmem>>, %arg5: memref<1x128xf32, #tpu.memory_space<vmem>>, %arg6: memref<128x128xbf16, #tpu.memory_space<vmem>>, %arg7: memref<1x128xf32, #tpu.memory_space<vmem>>, %arg8: memref<128x128xbf16, #tpu.memory_space<vmem>>, %arg9: memref<1x128xf32, #tpu.memory_space<vmem>>, %arg10: memref<2x128xf32, #tpu.memory_space<vmem>>) attributes {dimension_semantics = [#tpu.dimension_semantics<arbitrary>], iteration_bounds = array<i64: 1>, scalar_prefetch = 0 : i64, scratch_operands = 0 : i64, tpu.core_type = #tpu.core_type<tc>, window_params = [{pipeline_mode = #tpu.pipeline_mode<synchronous>, transform_indices = @transform_0, window_bounds = array<i64: 50, 256>}, {pipeline_mode = #tpu.pipeline_mode<synchronous>, transform_indices = @transform_1, window_bounds = array<i64: 256, 512>}, {pipeline_mode = #tpu.pipeline_mode<synchronous>, transform_indices = @transform_2, window_bounds = array<i64: 1, 128>}, {pipeline_mode = #tpu.pipeline_mode<synchronous>, transform_indices = @transform_3, window_bounds = array<i64: 25, 128, 128>}, {pipeline_mode = #tpu.pipeline_mode<synchronous>, transform_indices = @transform_4, window_bounds = array<i64: 1, 128>}, {pipeline_mode = #tpu.pipeline_mode<synchronous>, transform_indices = @transform_5, window_bounds = array<i64: 128, 128>}, {pipeline_mode = #tpu.pipeline_mode<synchronous>, transform_indices = @transform_6, window_bounds = array<i64: 1, 128>}, {pipeline_mode = #tpu.pipeline_mode<synchronous>, transform_indices = @transform_7, window_bounds = array<i64: 128, 128>}, {pipeline_mode = #tpu.pipeline_mode<synchronous>, transform_indices = @transform_8, window_bounds = array<i64: 1, 128>}, {pipeline_mode = #tpu.pipeline_mode<synchronous>, transform_indices = @transform_9, window_bounds = array<i64: 2, 128>}]} {
    %c0 = arith.constant 0 : index
    %c0_0 = arith.constant 0 : index
    %0 = vector.load %arg1[%c0, %c0_0] : memref<50x256xbf16, #tpu.memory_space<vmem>>, vector<50x256xbf16>
    %c0_1 = arith.constant 0 : index
    %c0_2 = arith.constant 0 : index
    %1 = vector.load %arg2[%c0_1, %c0_2] : memref<256x512xbf16, #tpu.memory_space<vmem>>, vector<256x512xbf16>
    %cst = arith.constant dense<0.000000e+00> : vector<50x512xf32>
    %2 = tpu.matmul %0, %1, %cst {dimension_numbers = #tpu.dot_dimension_numbers<[1], [0], [0], [1], [0, 0, 1, 1], [], []>} : vector<50x256xbf16>, vector<256x512xbf16>, vector<50x512xf32> -> vector<50x512xf32>
    %3 = vector.extract_strided_slice %2 {offsets = [0, 0], sizes = [50, 128], strides = [1, 1]} : vector<50x512xf32> to vector<50x128xf32>
    %4 = vector.extract_strided_slice %2 {offsets = [0, 128], sizes = [50, 128], strides = [1, 1]} : vector<50x512xf32> to vector<50x128xf32>
    %5 = arith.maximumf %3, %4 : vector<50x128xf32>
    %6 = vector.extract_strided_slice %2 {offsets = [0, 256], sizes = [50, 128], strides = [1, 1]} : vector<50x512xf32> to vector<50x128xf32>
    %7 = vector.extract_strided_slice %2 {offsets = [0, 384], sizes = [50, 128], strides = [1, 1]} : vector<50x512xf32> to vector<50x128xf32>
    %8 = arith.maximumf %6, %7 : vector<50x128xf32>
    %9 = arith.maximumf %5, %8 : vector<50x128xf32>
    %c0_3 = arith.constant 0 : index
    %c0_4 = arith.constant 0 : index
    %10 = vector.load %arg3[%c0_3, %c0_4] : memref<1x128xf32, #tpu.memory_space<vmem>>, vector<1x128xf32>
    %11 = vector.broadcast %10 : vector<1x128xf32> to vector<50x128xf32>
    %12 = arith.addf %9, %11 : vector<50x128xf32>
    %cst_5 = arith.constant 0.000000e+00 : f32
    %13 = vector.broadcast %cst_5 : f32 to vector<50x128xf32>
    %14 = arith.maximumf %12, %13 : vector<50x128xf32>
    %15 = arith.truncf %14 : vector<50x128xf32> to vector<50x128xbf16>
    %cst_6 = arith.constant 0.000000e+00 : f32
    %16 = vector.broadcast %cst_6 : f32 to vector<2x128xf32>
    %17 = vector.extract_strided_slice %15 {offsets = [0, 0], sizes = [2, 128], strides = [1, 1]} : vector<50x128xbf16> to vector<2x128xbf16>
    %c0_7 = arith.constant 0 : index
    %c0_8 = arith.constant 0 : index
    %c0_9 = arith.constant 0 : index
    %18 = vector.load %arg4[%c0_7, %c0_8, %c0_9] : memref<25x128x128xbf16, #tpu.memory_space<vmem>>, vector<1x128x128xbf16>
    %19 = vector.shape_cast %18 : vector<1x128x128xbf16> to vector<128x128xbf16>
    %cst_10 = arith.constant dense<0.000000e+00> : vector<2x128xf32>
    %20 = tpu.matmul %17, %19, %cst_10 {dimension_numbers = #tpu.dot_dimension_numbers<[1], [0], [0], [1], [0, 0, 1, 1], [], []>} : vector<2x128xbf16>, vector<128x128xbf16>, vector<2x128xf32> -> vector<2x128xf32>
    %21 = arith.addf %16, %20 : vector<2x128xf32>
    %22 = vector.extract_strided_slice %15 {offsets = [2, 0], sizes = [2, 128], strides = [1, 1]} : vector<50x128xbf16> to vector<2x128xbf16>
    %c1 = arith.constant 1 : index
    %c0_11 = arith.constant 0 : index
    %c0_12 = arith.constant 0 : index
    %23 = vector.load %arg4[%c1, %c0_11, %c0_12] : memref<25x128x128xbf16, #tpu.memory_space<vmem>>, vector<1x128x128xbf16>
    %24 = vector.shape_cast %23 : vector<1x128x128xbf16> to vector<128x128xbf16>
    %cst_13 = arith.constant dense<0.000000e+00> : vector<2x128xf32>
    %25 = tpu.matmul %22, %24, %cst_13 {dimension_numbers = #tpu.dot_dimension_numbers<[1], [0], [0], [1], [0, 0, 1, 1], [], []>} : vector<2x128xbf16>, vector<128x128xbf16>, vector<2x128xf32> -> vector<2x128xf32>
    %26 = arith.addf %21, %25 : vector<2x128xf32>
    %27 = vector.extract_strided_slice %15 {offsets = [4, 0], sizes = [2, 128], strides = [1, 1]} : vector<50x128xbf16> to vector<2x128xbf16>
    %c2 = arith.constant 2 : index
    %c0_14 = arith.constant 0 : index
    %c0_15 = arith.constant 0 : index
    %28 = vector.load %arg4[%c2, %c0_14, %c0_15] : memref<25x128x128xbf16, #tpu.memory_space<vmem>>, vector<1x128x128xbf16>
    %29 = vector.shape_cast %28 : vector<1x128x128xbf16> to vector<128x128xbf16>
    %cst_16 = arith.constant dense<0.000000e+00> : vector<2x128xf32>
    %30 = tpu.matmul %27, %29, %cst_16 {dimension_numbers = #tpu.dot_dimension_numbers<[1], [0], [0], [1], [0, 0, 1, 1], [], []>} : vector<2x128xbf16>, vector<128x128xbf16>, vector<2x128xf32> -> vector<2x128xf32>
    %31 = arith.addf %26, %30 : vector<2x128xf32>
    %32 = vector.extract_strided_slice %15 {offsets = [6, 0], sizes = [2, 128], strides = [1, 1]} : vector<50x128xbf16> to vector<2x128xbf16>
    %c3 = arith.constant 3 : index
    %c0_17 = arith.constant 0 : index
    %c0_18 = arith.constant 0 : index
    %33 = vector.load %arg4[%c3, %c0_17, %c0_18] : memref<25x128x128xbf16, #tpu.memory_space<vmem>>, vector<1x128x128xbf16>
    %34 = vector.shape_cast %33 : vector<1x128x128xbf16> to vector<128x128xbf16>
    %cst_19 = arith.constant dense<0.000000e+00> : vector<2x128xf32>
    %35 = tpu.matmul %32, %34, %cst_19 {dimension_numbers = #tpu.dot_dimension_numbers<[1], [0], [0], [1], [0, 0, 1, 1], [], []>} : vector<2x128xbf16>, vector<128x128xbf16>, vector<2x128xf32> -> vector<2x128xf32>
    %36 = arith.addf %31, %35 : vector<2x128xf32>
    %37 = vector.extract_strided_slice %15 {offsets = [8, 0], sizes = [2, 128], strides = [1, 1]} : vector<50x128xbf16> to vector<2x128xbf16>
    %c4 = arith.constant 4 : index
    %c0_20 = arith.constant 0 : index
    %c0_21 = arith.constant 0 : index
    %38 = vector.load %arg4[%c4, %c0_20, %c0_21] : memref<25x128x128xbf16, #tpu.memory_space<vmem>>, vector<1x128x128xbf16>
    %39 = vector.shape_cast %38 : vector<1x128x128xbf16> to vector<128x128xbf16>
    %cst_22 = arith.constant dense<0.000000e+00> : vector<2x128xf32>
    %40 = tpu.matmul %37, %39, %cst_22 {dimension_numbers = #tpu.dot_dimension_numbers<[1], [0], [0], [1], [0, 0, 1, 1], [], []>} : vector<2x128xbf16>, vector<128x128xbf16>, vector<2x128xf32> -> vector<2x128xf32>
    %41 = arith.addf %36, %40 : vector<2x128xf32>
    %42 = vector.extract_strided_slice %15 {offsets = [10, 0], sizes = [2, 128], strides = [1, 1]} : vector<50x128xbf16> to vector<2x128xbf16>
    %c5 = arith.constant 5 : index
    %c0_23 = arith.constant 0 : index
    %c0_24 = arith.constant 0 : index
    %43 = vector.load %arg4[%c5, %c0_23, %c0_24] : memref<25x128x128xbf16, #tpu.memory_space<vmem>>, vector<1x128x128xbf16>
    %44 = vector.shape_cast %43 : vector<1x128x128xbf16> to vector<128x128xbf16>
    %cst_25 = arith.constant dense<0.000000e+00> : vector<2x128xf32>
    %45 = tpu.matmul %42, %44, %cst_25 {dimension_numbers = #tpu.dot_dimension_numbers<[1], [0], [0], [1], [0, 0, 1, 1], [], []>} : vector<2x128xbf16>, vector<128x128xbf16>, vector<2x128xf32> -> vector<2x128xf32>
    %46 = arith.addf %41, %45 : vector<2x128xf32>
    %47 = vector.extract_strided_slice %15 {offsets = [12, 0], sizes = [2, 128], strides = [1, 1]} : vector<50x128xbf16> to vector<2x128xbf16>
    %c6 = arith.constant 6 : index
    %c0_26 = arith.constant 0 : index
    %c0_27 = arith.constant 0 : index
    %48 = vector.load %arg4[%c6, %c0_26, %c0_27] : memref<25x128x128xbf16, #tpu.memory_space<vmem>>, vector<1x128x128xbf16>
    %49 = vector.shape_cast %48 : vector<1x128x128xbf16> to vector<128x128xbf16>
    %cst_28 = arith.constant dense<0.000000e+00> : vector<2x128xf32>
    %50 = tpu.matmul %47, %49, %cst_28 {dimension_numbers = #tpu.dot_dimension_numbers<[1], [0], [0], [1], [0, 0, 1, 1], [], []>} : vector<2x128xbf16>, vector<128x128xbf16>, vector<2x128xf32> -> vector<2x128xf32>
    %51 = arith.addf %46, %50 : vector<2x128xf32>
    %52 = vector.extract_strided_slice %15 {offsets = [14, 0], sizes = [2, 128], strides = [1, 1]} : vector<50x128xbf16> to vector<2x128xbf16>
    %c7 = arith.constant 7 : index
    %c0_29 = arith.constant 0 : index
    %c0_30 = arith.constant 0 : index
    %53 = vector.load %arg4[%c7, %c0_29, %c0_30] : memref<25x128x128xbf16, #tpu.memory_space<vmem>>, vector<1x128x128xbf16>
    %54 = vector.shape_cast %53 : vector<1x128x128xbf16> to vector<128x128xbf16>
    %cst_31 = arith.constant dense<0.000000e+00> : vector<2x128xf32>
    %55 = tpu.matmul %52, %54, %cst_31 {dimension_numbers = #tpu.dot_dimension_numbers<[1], [0], [0], [1], [0, 0, 1, 1], [], []>} : vector<2x128xbf16>, vector<128x128xbf16>, vector<2x128xf32> -> vector<2x128xf32>
    %56 = arith.addf %51, %55 : vector<2x128xf32>
    %57 = vector.extract_strided_slice %15 {offsets = [16, 0], sizes = [2, 128], strides = [1, 1]} : vector<50x128xbf16> to vector<2x128xbf16>
    %c8 = arith.constant 8 : index
    %c0_32 = arith.constant 0 : index
    %c0_33 = arith.constant 0 : index
    %58 = vector.load %arg4[%c8, %c0_32, %c0_33] : memref<25x128x128xbf16, #tpu.memory_space<vmem>>, vector<1x128x128xbf16>
    %59 = vector.shape_cast %58 : vector<1x128x128xbf16> to vector<128x128xbf16>
    %cst_34 = arith.constant dense<0.000000e+00> : vector<2x128xf32>
    %60 = tpu.matmul %57, %59, %cst_34 {dimension_numbers = #tpu.dot_dimension_numbers<[1], [0], [0], [1], [0, 0, 1, 1], [], []>} : vector<2x128xbf16>, vector<128x128xbf16>, vector<2x128xf32> -> vector<2x128xf32>
    %61 = arith.addf %56, %60 : vector<2x128xf32>
    %62 = vector.extract_strided_slice %15 {offsets = [18, 0], sizes = [2, 128], strides = [1, 1]} : vector<50x128xbf16> to vector<2x128xbf16>
    %c9 = arith.constant 9 : index
    %c0_35 = arith.constant 0 : index
    %c0_36 = arith.constant 0 : index
    %63 = vector.load %arg4[%c9, %c0_35, %c0_36] : memref<25x128x128xbf16, #tpu.memory_space<vmem>>, vector<1x128x128xbf16>
    %64 = vector.shape_cast %63 : vector<1x128x128xbf16> to vector<128x128xbf16>
    %cst_37 = arith.constant dense<0.000000e+00> : vector<2x128xf32>
    %65 = tpu.matmul %62, %64, %cst_37 {dimension_numbers = #tpu.dot_dimension_numbers<[1], [0], [0], [1], [0, 0, 1, 1], [], []>} : vector<2x128xbf16>, vector<128x128xbf16>, vector<2x128xf32> -> vector<2x128xf32>
    %66 = arith.addf %61, %65 : vector<2x128xf32>
    %67 = vector.extract_strided_slice %15 {offsets = [20, 0], sizes = [2, 128], strides = [1, 1]} : vector<50x128xbf16> to vector<2x128xbf16>
    %c10 = arith.constant 10 : index
    %c0_38 = arith.constant 0 : index
    %c0_39 = arith.constant 0 : index
    %68 = vector.load %arg4[%c10, %c0_38, %c0_39] : memref<25x128x128xbf16, #tpu.memory_space<vmem>>, vector<1x128x128xbf16>
    %69 = vector.shape_cast %68 : vector<1x128x128xbf16> to vector<128x128xbf16>
    %cst_40 = arith.constant dense<0.000000e+00> : vector<2x128xf32>
    %70 = tpu.matmul %67, %69, %cst_40 {dimension_numbers = #tpu.dot_dimension_numbers<[1], [0], [0], [1], [0, 0, 1, 1], [], []>} : vector<2x128xbf16>, vector<128x128xbf16>, vector<2x128xf32> -> vector<2x128xf32>
    %71 = arith.addf %66, %70 : vector<2x128xf32>
    %72 = vector.extract_strided_slice %15 {offsets = [22, 0], sizes = [2, 128], strides = [1, 1]} : vector<50x128xbf16> to vector<2x128xbf16>
    %c11 = arith.constant 11 : index
    %c0_41 = arith.constant 0 : index
    %c0_42 = arith.constant 0 : index
    %73 = vector.load %arg4[%c11, %c0_41, %c0_42] : memref<25x128x128xbf16, #tpu.memory_space<vmem>>, vector<1x128x128xbf16>
    %74 = vector.shape_cast %73 : vector<1x128x128xbf16> to vector<128x128xbf16>
    %cst_43 = arith.constant dense<0.000000e+00> : vector<2x128xf32>
    %75 = tpu.matmul %72, %74, %cst_43 {dimension_numbers = #tpu.dot_dimension_numbers<[1], [0], [0], [1], [0, 0, 1, 1], [], []>} : vector<2x128xbf16>, vector<128x128xbf16>, vector<2x128xf32> -> vector<2x128xf32>
    %76 = arith.addf %71, %75 : vector<2x128xf32>
    %77 = vector.extract_strided_slice %15 {offsets = [24, 0], sizes = [2, 128], strides = [1, 1]} : vector<50x128xbf16> to vector<2x128xbf16>
    %c12 = arith.constant 12 : index
    %c0_44 = arith.constant 0 : index
    %c0_45 = arith.constant 0 : index
    %78 = vector.load %arg4[%c12, %c0_44, %c0_45] : memref<25x128x128xbf16, #tpu.memory_space<vmem>>, vector<1x128x128xbf16>
    %79 = vector.shape_cast %78 : vector<1x128x128xbf16> to vector<128x128xbf16>
    %cst_46 = arith.constant dense<0.000000e+00> : vector<2x128xf32>
    %80 = tpu.matmul %77, %79, %cst_46 {dimension_numbers = #tpu.dot_dimension_numbers<[1], [0], [0], [1], [0, 0, 1, 1], [], []>} : vector<2x128xbf16>, vector<128x128xbf16>, vector<2x128xf32> -> vector<2x128xf32>
    %81 = arith.addf %76, %80 : vector<2x128xf32>
    %82 = vector.extract_strided_slice %15 {offsets = [26, 0], sizes = [2, 128], strides = [1, 1]} : vector<50x128xbf16> to vector<2x128xbf16>
    %c13 = arith.constant 13 : index
    %c0_47 = arith.constant 0 : index
    %c0_48 = arith.constant 0 : index
    %83 = vector.load %arg4[%c13, %c0_47, %c0_48] : memref<25x128x128xbf16, #tpu.memory_space<vmem>>, vector<1x128x128xbf16>
    %84 = vector.shape_cast %83 : vector<1x128x128xbf16> to vector<128x128xbf16>
    %cst_49 = arith.constant dense<0.000000e+00> : vector<2x128xf32>
    %85 = tpu.matmul %82, %84, %cst_49 {dimension_numbers = #tpu.dot_dimension_numbers<[1], [0], [0], [1], [0, 0, 1, 1], [], []>} : vector<2x128xbf16>, vector<128x128xbf16>, vector<2x128xf32> -> vector<2x128xf32>
    %86 = arith.addf %81, %85 : vector<2x128xf32>
    %87 = vector.extract_strided_slice %15 {offsets = [28, 0], sizes = [2, 128], strides = [1, 1]} : vector<50x128xbf16> to vector<2x128xbf16>
    %c14 = arith.constant 14 : index
    %c0_50 = arith.constant 0 : index
    %c0_51 = arith.constant 0 : index
    %88 = vector.load %arg4[%c14, %c0_50, %c0_51] : memref<25x128x128xbf16, #tpu.memory_space<vmem>>, vector<1x128x128xbf16>
    %89 = vector.shape_cast %88 : vector<1x128x128xbf16> to vector<128x128xbf16>
    %cst_52 = arith.constant dense<0.000000e+00> : vector<2x128xf32>
    %90 = tpu.matmul %87, %89, %cst_52 {dimension_numbers = #tpu.dot_dimension_numbers<[1], [0], [0], [1], [0, 0, 1, 1], [], []>} : vector<2x128xbf16>, vector<128x128xbf16>, vector<2x128xf32> -> vector<2x128xf32>
    %91 = arith.addf %86, %90 : vector<2x128xf32>
    %92 = vector.extract_strided_slice %15 {offsets = [30, 0], sizes = [2, 128], strides = [1, 1]} : vector<50x128xbf16> to vector<2x128xbf16>
    %c15 = arith.constant 15 : index
    %c0_53 = arith.constant 0 : index
    %c0_54 = arith.constant 0 : index
    %93 = vector.load %arg4[%c15, %c0_53, %c0_54] : memref<25x128x128xbf16, #tpu.memory_space<vmem>>, vector<1x128x128xbf16>
    %94 = vector.shape_cast %93 : vector<1x128x128xbf16> to vector<128x128xbf16>
    %cst_55 = arith.constant dense<0.000000e+00> : vector<2x128xf32>
    %95 = tpu.matmul %92, %94, %cst_55 {dimension_numbers = #tpu.dot_dimension_numbers<[1], [0], [0], [1], [0, 0, 1, 1], [], []>} : vector<2x128xbf16>, vector<128x128xbf16>, vector<2x128xf32> -> vector<2x128xf32>
    %96 = arith.addf %91, %95 : vector<2x128xf32>
    %97 = vector.extract_strided_slice %15 {offsets = [32, 0], sizes = [2, 128], strides = [1, 1]} : vector<50x128xbf16> to vector<2x128xbf16>
    %c16 = arith.constant 16 : index
    %c0_56 = arith.constant 0 : index
    %c0_57 = arith.constant 0 : index
    %98 = vector.load %arg4[%c16, %c0_56, %c0_57] : memref<25x128x128xbf16, #tpu.memory_space<vmem>>, vector<1x128x128xbf16>
    %99 = vector.shape_cast %98 : vector<1x128x128xbf16> to vector<128x128xbf16>
    %cst_58 = arith.constant dense<0.000000e+00> : vector<2x128xf32>
    %100 = tpu.matmul %97, %99, %cst_58 {dimension_numbers = #tpu.dot_dimension_numbers<[1], [0], [0], [1], [0, 0, 1, 1], [], []>} : vector<2x128xbf16>, vector<128x128xbf16>, vector<2x128xf32> -> vector<2x128xf32>
    %101 = arith.addf %96, %100 : vector<2x128xf32>
    %102 = vector.extract_strided_slice %15 {offsets = [34, 0], sizes = [2, 128], strides = [1, 1]} : vector<50x128xbf16> to vector<2x128xbf16>
    %c17 = arith.constant 17 : index
    %c0_59 = arith.constant 0 : index
    %c0_60 = arith.constant 0 : index
    %103 = vector.load %arg4[%c17, %c0_59, %c0_60] : memref<25x128x128xbf16, #tpu.memory_space<vmem>>, vector<1x128x128xbf16>
    %104 = vector.shape_cast %103 : vector<1x128x128xbf16> to vector<128x128xbf16>
    %cst_61 = arith.constant dense<0.000000e+00> : vector<2x128xf32>
    %105 = tpu.matmul %102, %104, %cst_61 {dimension_numbers = #tpu.dot_dimension_numbers<[1], [0], [0], [1], [0, 0, 1, 1], [], []>} : vector<2x128xbf16>, vector<128x128xbf16>, vector<2x128xf32> -> vector<2x128xf32>
    %106 = arith.addf %101, %105 : vector<2x128xf32>
    %107 = vector.extract_strided_slice %15 {offsets = [36, 0], sizes = [2, 128], strides = [1, 1]} : vector<50x128xbf16> to vector<2x128xbf16>
    %c18 = arith.constant 18 : index
    %c0_62 = arith.constant 0 : index
    %c0_63 = arith.constant 0 : index
    %108 = vector.load %arg4[%c18, %c0_62, %c0_63] : memref<25x128x128xbf16, #tpu.memory_space<vmem>>, vector<1x128x128xbf16>
    %109 = vector.shape_cast %108 : vector<1x128x128xbf16> to vector<128x128xbf16>
    %cst_64 = arith.constant dense<0.000000e+00> : vector<2x128xf32>
    %110 = tpu.matmul %107, %109, %cst_64 {dimension_numbers = #tpu.dot_dimension_numbers<[1], [0], [0], [1], [0, 0, 1, 1], [], []>} : vector<2x128xbf16>, vector<128x128xbf16>, vector<2x128xf32> -> vector<2x128xf32>
    %111 = arith.addf %106, %110 : vector<2x128xf32>
    %112 = vector.extract_strided_slice %15 {offsets = [38, 0], sizes = [2, 128], strides = [1, 1]} : vector<50x128xbf16> to vector<2x128xbf16>
    %c19 = arith.constant 19 : index
    %c0_65 = arith.constant 0 : index
    %c0_66 = arith.constant 0 : index
    %113 = vector.load %arg4[%c19, %c0_65, %c0_66] : memref<25x128x128xbf16, #tpu.memory_space<vmem>>, vector<1x128x128xbf16>
    %114 = vector.shape_cast %113 : vector<1x128x128xbf16> to vector<128x128xbf16>
    %cst_67 = arith.constant dense<0.000000e+00> : vector<2x128xf32>
    %115 = tpu.matmul %112, %114, %cst_67 {dimension_numbers = #tpu.dot_dimension_numbers<[1], [0], [0], [1], [0, 0, 1, 1], [], []>} : vector<2x128xbf16>, vector<128x128xbf16>, vector<2x128xf32> -> vector<2x128xf32>
    %116 = arith.addf %111, %115 : vector<2x128xf32>
    %117 = vector.extract_strided_slice %15 {offsets = [40, 0], sizes = [2, 128], strides = [1, 1]} : vector<50x128xbf16> to vector<2x128xbf16>
    %c20 = arith.constant 20 : index
    %c0_68 = arith.constant 0 : index
    %c0_69 = arith.constant 0 : index
    %118 = vector.load %arg4[%c20, %c0_68, %c0_69] : memref<25x128x128xbf16, #tpu.memory_space<vmem>>, vector<1x128x128xbf16>
    %119 = vector.shape_cast %118 : vector<1x128x128xbf16> to vector<128x128xbf16>
    %cst_70 = arith.constant dense<0.000000e+00> : vector<2x128xf32>
    %120 = tpu.matmul %117, %119, %cst_70 {dimension_numbers = #tpu.dot_dimension_numbers<[1], [0], [0], [1], [0, 0, 1, 1], [], []>} : vector<2x128xbf16>, vector<128x128xbf16>, vector<2x128xf32> -> vector<2x128xf32>
    %121 = arith.addf %116, %120 : vector<2x128xf32>
    %122 = vector.extract_strided_slice %15 {offsets = [42, 0], sizes = [2, 128], strides = [1, 1]} : vector<50x128xbf16> to vector<2x128xbf16>
    %c21 = arith.constant 21 : index
    %c0_71 = arith.constant 0 : index
    %c0_72 = arith.constant 0 : index
    %123 = vector.load %arg4[%c21, %c0_71, %c0_72] : memref<25x128x128xbf16, #tpu.memory_space<vmem>>, vector<1x128x128xbf16>
    %124 = vector.shape_cast %123 : vector<1x128x128xbf16> to vector<128x128xbf16>
    %cst_73 = arith.constant dense<0.000000e+00> : vector<2x128xf32>
    %125 = tpu.matmul %122, %124, %cst_73 {dimension_numbers = #tpu.dot_dimension_numbers<[1], [0], [0], [1], [0, 0, 1, 1], [], []>} : vector<2x128xbf16>, vector<128x128xbf16>, vector<2x128xf32> -> vector<2x128xf32>
    %126 = arith.addf %121, %125 : vector<2x128xf32>
    %127 = vector.extract_strided_slice %15 {offsets = [44, 0], sizes = [2, 128], strides = [1, 1]} : vector<50x128xbf16> to vector<2x128xbf16>
    %c22 = arith.constant 22 : index
    %c0_74 = arith.constant 0 : index
    %c0_75 = arith.constant 0 : index
    %128 = vector.load %arg4[%c22, %c0_74, %c0_75] : memref<25x128x128xbf16, #tpu.memory_space<vmem>>, vector<1x128x128xbf16>
    %129 = vector.shape_cast %128 : vector<1x128x128xbf16> to vector<128x128xbf16>
    %cst_76 = arith.constant dense<0.000000e+00> : vector<2x128xf32>
    %130 = tpu.matmul %127, %129, %cst_76 {dimension_numbers = #tpu.dot_dimension_numbers<[1], [0], [0], [1], [0, 0, 1, 1], [], []>} : vector<2x128xbf16>, vector<128x128xbf16>, vector<2x128xf32> -> vector<2x128xf32>
    %131 = arith.addf %126, %130 : vector<2x128xf32>
    %132 = vector.extract_strided_slice %15 {offsets = [46, 0], sizes = [2, 128], strides = [1, 1]} : vector<50x128xbf16> to vector<2x128xbf16>
    %c23 = arith.constant 23 : index
    %c0_77 = arith.constant 0 : index
    %c0_78 = arith.constant 0 : index
    %133 = vector.load %arg4[%c23, %c0_77, %c0_78] : memref<25x128x128xbf16, #tpu.memory_space<vmem>>, vector<1x128x128xbf16>
    %134 = vector.shape_cast %133 : vector<1x128x128xbf16> to vector<128x128xbf16>
    %cst_79 = arith.constant dense<0.000000e+00> : vector<2x128xf32>
    %135 = tpu.matmul %132, %134, %cst_79 {dimension_numbers = #tpu.dot_dimension_numbers<[1], [0], [0], [1], [0, 0, 1, 1], [], []>} : vector<2x128xbf16>, vector<128x128xbf16>, vector<2x128xf32> -> vector<2x128xf32>
    %136 = arith.addf %131, %135 : vector<2x128xf32>
    %137 = vector.extract_strided_slice %15 {offsets = [48, 0], sizes = [2, 128], strides = [1, 1]} : vector<50x128xbf16> to vector<2x128xbf16>
    %c24 = arith.constant 24 : index
    %c0_80 = arith.constant 0 : index
    %c0_81 = arith.constant 0 : index
    %138 = vector.load %arg4[%c24, %c0_80, %c0_81] : memref<25x128x128xbf16, #tpu.memory_space<vmem>>, vector<1x128x128xbf16>
    %139 = vector.shape_cast %138 : vector<1x128x128xbf16> to vector<128x128xbf16>
    %cst_82 = arith.constant dense<0.000000e+00> : vector<2x128xf32>
    %140 = tpu.matmul %137, %139, %cst_82 {dimension_numbers = #tpu.dot_dimension_numbers<[1], [0], [0], [1], [0, 0, 1, 1], [], []>} : vector<2x128xbf16>, vector<128x128xbf16>, vector<2x128xf32> -> vector<2x128xf32>
    %141 = arith.addf %136, %140 : vector<2x128xf32>
    %c0_83 = arith.constant 0 : index
    %c0_84 = arith.constant 0 : index
    %142 = vector.load %arg5[%c0_83, %c0_84] : memref<1x128xf32, #tpu.memory_space<vmem>>, vector<1x128xf32>
    %143 = vector.broadcast %142 : vector<1x128xf32> to vector<2x128xf32>
    %144 = arith.addf %141, %143 : vector<2x128xf32>
    %cst_85 = arith.constant 0.000000e+00 : f32
    %145 = vector.broadcast %cst_85 : f32 to vector<2x128xf32>
    %146 = arith.maximumf %144, %145 : vector<2x128xf32>
    %147 = arith.truncf %146 : vector<2x128xf32> to vector<2x128xbf16>
    %c0_86 = arith.constant 0 : index
    %c0_87 = arith.constant 0 : index
    %148 = vector.load %arg6[%c0_86, %c0_87] : memref<128x128xbf16, #tpu.memory_space<vmem>>, vector<128x128xbf16>
    %cst_88 = arith.constant dense<0.000000e+00> : vector<2x128xf32>
    %149 = tpu.matmul %147, %148, %cst_88 {dimension_numbers = #tpu.dot_dimension_numbers<[1], [0], [0], [1], [0, 0, 1, 1], [], []>} : vector<2x128xbf16>, vector<128x128xbf16>, vector<2x128xf32> -> vector<2x128xf32>
    %c0_89 = arith.constant 0 : index
    %c0_90 = arith.constant 0 : index
    %150 = vector.load %arg7[%c0_89, %c0_90] : memref<1x128xf32, #tpu.memory_space<vmem>>, vector<1x128xf32>
    %151 = vector.broadcast %150 : vector<1x128xf32> to vector<2x128xf32>
    %152 = arith.addf %149, %151 : vector<2x128xf32>
    %cst_91 = arith.constant 0.000000e+00 : f32
    %153 = vector.broadcast %cst_91 : f32 to vector<2x128xf32>
    %154 = arith.maximumf %152, %153 : vector<2x128xf32>
    %155 = arith.truncf %154 : vector<2x128xf32> to vector<2x128xbf16>
    %c0_92 = arith.constant 0 : index
    %c0_93 = arith.constant 0 : index
    %156 = vector.load %arg8[%c0_92, %c0_93] : memref<128x128xbf16, #tpu.memory_space<vmem>>, vector<128x128xbf16>
    %cst_94 = arith.constant dense<0.000000e+00> : vector<2x128xf32>
    %157 = tpu.matmul %155, %156, %cst_94 {dimension_numbers = #tpu.dot_dimension_numbers<[1], [0], [0], [1], [0, 0, 1, 1], [], []>} : vector<2x128xbf16>, vector<128x128xbf16>, vector<2x128xf32> -> vector<2x128xf32>
    %c0_95 = arith.constant 0 : index
    %c0_96 = arith.constant 0 : index
    %158 = vector.load %arg9[%c0_95, %c0_96] : memref<1x128xf32, #tpu.memory_space<vmem>>, vector<1x128xf32>
    %159 = vector.broadcast %158 : vector<1x128xf32> to vector<2x128xf32>
    %160 = arith.addf %157, %159 : vector<2x128xf32>
    %c0_97 = arith.constant 0 : index
    %c0_98 = arith.constant 0 : index
    %161 = vector.load %arg10[%c0_97, %c0_98] : memref<2x128xf32, #tpu.memory_space<vmem>>, vector<2x128xf32>
    tpu.vector_store %arg10[%c0_97, %c0_98], %160 {strides = array<i32>} : memref<2x128xf32, #tpu.memory_space<vmem>>, vector<2x128xf32>,
    return
  }
  func.func @transform_0(%arg0: i32) -> (i32, i32) {
    %c0_i32 = arith.constant 0 : i32
    %c0_i32_0 = arith.constant 0 : i32
    %c0_i32_1 = arith.constant 0 : i32
    return %c0_i32, %c0_i32_0 : i32, i32
  }
  func.func @transform_1(%arg0: i32) -> (i32, i32) {
    %c0_i32 = arith.constant 0 : i32
    %c0_i32_0 = arith.constant 0 : i32
    %c0_i32_1 = arith.constant 0 : i32
    return %c0_i32, %c0_i32_0 : i32, i32
  }
  func.func @transform_2(%arg0: i32) -> (i32, i32) {
    %c0_i32 = arith.constant 0 : i32
    %c0_i32_0 = arith.constant 0 : i32
    %c0_i32_1 = arith.constant 0 : i32
    return %c0_i32, %c0_i32_0 : i32, i32
  }
  func.func @transform_3(%arg0: i32) -> (i32, i32, i32) {
    %c0_i32 = arith.constant 0 : i32
    %c0_i32_0 = arith.constant 0 : i32
    %c0_i32_1 = arith.constant 0 : i32
    %c0_i32_2 = arith.constant 0 : i32
    return %c0_i32, %c0_i32_0, %c0_i32_1 : i32, i32, i32
  }
  func.func @transform_4(%arg0: i32) -> (i32, i32) {
    %c0_i32 = arith.constant 0 : i32
    %c0_i32_0 = arith.constant 0 : i32
    %c0_i32_1 = arith.constant 0 : i32
    return %c0_i32, %c0_i32_0 : i32, i32
  }
  func.func @transform_5(%arg0: i32) -> (i32, i32) {
    %c0_i32 = arith.constant 0 : i32
    %c0_i32_0 = arith.constant 0 : i32
    %c0_i32_1 = arith.constant 0 : i32
    return %c0_i32, %c0_i32_0 : i32, i32
  }
  func.func @transform_6(%arg0: i32) -> (i32, i32) {
    %c0_i32 = arith.constant 0 : i32
    %c0_i32_0 = arith.constant 0 : i32
    %c0_i32_1 = arith.constant 0 : i32
    return %c0_i32, %c0_i32_0 : i32, i32
  }
  func.func @transform_7(%arg0: i32) -> (i32, i32) {
    %c0_i32 = arith.constant 0 : i32
    %c0_i32_0 = arith.constant 0 : i32
    %c0_i32_1 = arith.constant 0 : i32
    return %c0_i32, %c0_i32_0 : i32, i32
  }
  func.func @transform_8(%arg0: i32) -> (i32, i32) {
    %c0_i32 = arith.constant 0 : i32
    %c0_i32_0 = arith.constant 0 : i32
    %c0_i32_1 = arith.constant 0 : i32
    return %c0_i32, %c0_i32_0 : i32, i32
  }
  func.func @transform_9(%arg0: i32) -> (i32, i32) {
    %c0_i32 = arith.constant 0 : i32
    %c0_i32_0 = arith.constant 0 : i32
    %c0_i32_1 = arith.constant 0 : i32
    return %c0_i32, %c0_i32_0 : i32, i32
  }
}

</mosaic_0001>

<bundles_post_ra>
// kernel: net_forward.2
= control target key start
LH: loop header
LB: loop body
LE: loop exit
PB: predicated region body
PF: predicated region fallthrough
CT: control target
= control target key end

     0   :  { %s1379_s12 = smov 0   ;;  %s1585_s0 = inlined_call_operand.vmem [shape: bf16[400,128], index: 0, kind: input, shape index: {}]   ;;  %s1586_s1 = inlined_call_operand.vmem [shape: bf16[128,512], index: 1, kind: input, shape index: {}]   ;;  %s1587_s2 = inlined_call_operand.vmem [shape: f32[1,128], index: 2, kind: input, shape index: {}]   ;;  %s1588_s3 = inlined_call_operand.vmem [shape: bf16[400,128], index: 3, kind: output, shape index: {}]  }
   0x1 LB: > { %s1104_s13 = sadd.s32 4294967295, %s1356_s12   ;;  %p1108_p0 = scmp.ge.s32.totalorder %s1356_s12, 1  ;;  %s1356_s12 = sphi %s1379_s12, %s13_s12  }
   0x2   : > { %p138_p1 = scmp.lt.s32.totalorder %s1356_s12, 3 }
   0x4   : > { %p139_p2 = pnand %p1108_p0, %p138_p1 }
   0x5   : > { %v1289_v0 = vld [vmem:[%s1586_s1 + $0x4] ss:$16 sps:$4 sm:$0xff] (!%p139_p2)   ;;  %v1291_v1 = vld [vmem:[%s1586_s1 + $0xc] ss:$16 sps:$4 sm:$0xff] (!%p139_p2)   ;;  %v1358_v2 = vmov (!%p139_p2), 0   ;;  %s162_s30 = smul.u32 (!%p139_p2), 25, %s1104_s13 }
   0x6   : > { %142 = sbr.rel (%p139_p2) target bundleno = 359 (0x167), region = 32  ;;  %500 = vmatprep.mubr.bf16.mxu0 (!%p139_p2), %v1358_v2  ;;  %661 = vmatprep.mubr.bf16.mxu1 (!%p139_p2), %v1358_v2  ;;  %v1293_v3 = vld [vmem:[%s1586_s1] ss:$16 sps:$4 sm:$0xff] (!%p139_p2)   ;;  %v1294_v4 = vld [vmem:[%s1586_s1 + $0x8] ss:$16 sps:$4 sm:$0xff] (!%p139_p2)  }
   0x7   : > { %468 = vmatprep.subr.bf16.mxu0 (!%p139_p2), %v1289_v0  ;;  %629 = vmatprep.subr.bf16.mxu1 (!%p139_p2), %v1291_v1  ;;  %v1295_v5 = vld [vmem:[%s1586_s1 + $0x24] ss:$16 sps:$4 sm:$0xff] (!%p139_p2)   ;;  %v1297_v6 = vld [vmem:[%s1586_s1 + $0x2c] ss:$16 sps:$4 sm:$0xff] (!%p139_p2)   ;;  %v1299_v7 = vld [vmem:[%s1586_s1 + $0x20] ss:$16 sps:$4 sm:$0xff] (!%p139_p2)  }
   0x8   : > { %469 = vmatpush1.bf16.msra.mxu0 (!%p139_p2), %v1293_v3  ;;  %630 = vmatpush1.bf16.msra.mxu1 (!%p139_p2), %v1294_v4  ;;  %v1300_v8 = vld [vmem:[%s1586_s1 + $0x28] ss:$16 sps:$4 sm:$0xff] (!%p139_p2)   ;;  %v1301_v9 = vld [vmem:[%s1586_s1 + $0x44] ss:$16 sps:$4 sm:$0xff] (!%p139_p2)   ;;  %v1303_v10 = vld [vmem:[%s1586_s1 + $0x4c] ss:$16 sps:$4 sm:$0xff] (!%p139_p2)  }
   0x9   : > { %470 = vmatprep.subr.bf16.mxu0 (!%p139_p2), %v1295_v5  ;;  %631 = vmatprep.subr.bf16.mxu1 (!%p139_p2), %v1297_v6  ;;  %v1305_v11 = vld [vmem:[%s1586_s1 + $0x40] ss:$16 sps:$4 sm:$0xff] (!%p139_p2)   ;;  %v1306_v12 = vld [vmem:[%s1586_s1 + $0x48] ss:$16 sps:$4 sm:$0xff] (!%p139_p2)   ;;  %v1307_v13 = vld [vmem:[%s1586_s1 + $0x64] ss:$16 sps:$4 sm:$0xff] (!%p139_p2)  }
   0xa   : > { %v1309_v14 = vld [vmem:[%s1586_s1 + $0x6c] ss:$16 sps:$4 sm:$0xff] (!%p139_p2)   ;;  %p163_p3 = scmp.lt.s32.totalorder (!%p139_p2), %s162_s30, 49  ;;  %v1311_v15 = vld [vmem:[%s1586_s1 + $0x60] ss:$16 sps:$4 sm:$0xff] (!%p139_p2)  }
   0xb   : > { %v1312_v16 = vld [vmem:[%s1586_s1 + $0x68] ss:$16 sps:$4 sm:$0xff] (!%p139_p2)   ;;  %v1313_v17 = vld [vmem:[%s1586_s1 + $0x84] ss:$16 sps:$4 sm:$0xff] (!%p139_p2)   ;;  %v1315_v18 = vld [vmem:[%s1586_s1 + $0x8c] ss:$16 sps:$4 sm:$0xff] (!%p139_p2)  }
   0xc   : > { %471 = vmatpush1.bf16.msra.mxu0 (!%p139_p2), %v1299_v7  ;;  %632 = vmatpush1.bf16.msra.mxu1 (!%p139_p2), %v1300_v8  ;;  %v1317_v19 = vld [vmem:[%s1586_s1 + $0x80] ss:$16 sps:$4 sm:$0xff] (!%p139_p2)   ;;  %v1318_v20 = vld [vmem:[%s1586_s1 + $0x88] ss:$16 sps:$4 sm:$0xff] (!%p139_p2)   ;;  %v1319_v21 = vld [vmem:[%s1586_s1 + $0xa4] ss:$16 sps:$4 sm:$0xff] (!%p139_p2)  }
   0xd   : > { %472 = vmatprep.subr.bf16.mxu0 %v1301_v9  ;;  %633 = vmatprep.subr.bf16.mxu1 %v1303_v10  ;;  %s1590_s30 = smov (!%p163_p3, %s162_s30), 49  ;;  %v1321_v22 = vld [vmem:[%s1586_s1 + $0xac] ss:$16 sps:$4 sm:$0xff]   ;;  %v1323_v23 = vld [vmem:[%s1586_s1 + $0xa0] ss:$16 sps:$4 sm:$0xff]  }
   0xe   : > { %s1109_s7 = sshll.u32 %s1590_s30, 2  ;;  %v1324_v24 = vld [vmem:[%s1586_s1 + $0xa8] ss:$16 sps:$4 sm:$0xff]   ;;  %v1325_v25 = vld [vmem:[%s1586_s1 + $0xc4] ss:$16 sps:$4 sm:$0xff]  }
   0xf   : > { %s1472_s17 = scalar_lea.vmem %s1585_s0, %s1109_s7  ;;  %v1327_v26 = vld [vmem:[%s1586_s1 + $0xcc] ss:$16 sps:$4 sm:$0xff]   ;;  %v1329_v27 = vld [vmem:[%s1586_s1 + $0xc0] ss:$16 sps:$4 sm:$0xff]   ;;  %v1330_v28 = vld [vmem:[%s1586_s1 + $0xc8] ss:$16 sps:$4 sm:$0xff]   ;;  %s1544_s11 = scalar_lea.vmem %s1588_s3, %s1109_s7 }
  0x10   : > { %473 = vmatpush1.bf16.msra.mxu0 %v1305_v11  ;;  %634 = vmatpush1.bf16.msra.mxu1 %v1306_v12  ;;  %v1331_v29 = vld [vmem:[%s1586_s1 + $0xe4] ss:$16 sps:$4 sm:$0xff]   ;;  %v1333_v30 = vld [vmem:[%s1586_s1 + $0xec] ss:$16 sps:$4 sm:$0xff]   ;;  %v1335_v31 = vld [vmem:[%s1586_s1 + $0xe0] ss:$16 sps:$4 sm:$0xff]  }
  0x11   : > { %474 = vmatprep.subr.bf16.mxu0 %v1307_v13  ;;  %635 = vmatprep.subr.bf16.mxu1 %v1309_v14  ;;  %v1336_v32 = vld [vmem:[%s1586_s1 + $0xe8] ss:$16 sps:$4 sm:$0xff]   ;;  %v1337_v33 = vld [vmem:[%s1472_s17] sm:$0xff]   ;;  %v1339_v35 = vld [vmem:[%s1472_s17 + $0x10] sm:$0xff]  }
  0x12   : > { %v1338_v34 = vld [vmem:[%s1472_s17 + $0x8] sm:$0xff]   ;;  %v1340_v36 = vld [vmem:[%s1472_s17 + $0x18] sm:$0xff]   ;;  %v1341_v37 = vld [vmem:[%s1472_s17 + $0x20] sm:$0xff]  }
  0x13   : > { %v1342_v38 = vld [vmem:[%s1472_s17 + $0x28] sm:$0xff]   ;;  %v1343_v39 = vld [vmem:[%s1472_s17 + $0x30] sm:$0xff]   ;;  %v1344_v40 = vld [vmem:[%s1472_s17 + $0x38] sm:$0xff]  }
  0x14   : > { %475 = vmatpush1.bf16.msra.mxu0 %v1311_v15  ;;  %636 = vmatpush1.bf16.msra.mxu1 %v1312_v16  ;;  %v1345_v41 = vld [vmem:[%s1472_s17 + $0x40] sm:$0xff]   ;;  %v1346_v42 = vld [vmem:[%s1472_s17 + $0x48] sm:$0xff]   ;;  %v1347_v43 = vld [vmem:[%s1472_s17 + $0x50] sm:$0xff]  }
  0x15   : > { %476 = vmatprep.subr.bf16.mxu0 %v1313_v17  ;;  %637 = vmatprep.subr.bf16.mxu1 %v1315_v18  ;;  %v1348_v44 = vld [vmem:[%s1472_s17 + $0x58] sm:$0xff]   ;;  %v1349_v45 = vld [vmem:[%s1472_s17 + $0x60] ss:$0 sps:$4 sm:$0xff]  }
  0x16   : > { %v1535_v54 = vld [vmem:[%s1587_s2] ss:$0 sm:$0xff] }
  0x18   : > { %477 = vmatpush1.bf16.msra.mxu0 %v1317_v19  ;;  %638 = vmatpush1.bf16.msra.mxu1 %v1318_v20 }
  0x19   : > { %478 = vmatprep.subr.bf16.mxu0 %v1319_v21  ;;  %639 = vmatprep.subr.bf16.mxu1 %v1321_v22 }
  0x1c   : > { %479 = vmatpush1.bf16.msra.mxu0 %v1323_v23  ;;  %640 = vmatpush1.bf16.msra.mxu1 %v1324_v24 }
  0x1d   : > { %480 = vmatprep.subr.bf16.mxu0 %v1325_v25  ;;  %641 = vmatprep.subr.bf16.mxu1 %v1327_v26 }
  0x20   : > { %481 = vmatpush1.bf16.msra.mxu0 %v1329_v27  ;;  %642 = vmatpush1.bf16.msra.mxu1 %v1330_v28 }
  0x21   : > { %482 = vmatprep.subr.bf16.mxu0 %v1331_v29  ;;  %643 = vmatprep.subr.bf16.mxu1 %v1333_v30 }
  0x24   : > { %483 = vmatpush1.bf16.msra.mxu0 %v1335_v31  ;;  %644 = vmatpush1.bf16.msra.mxu1 %v1336_v32 }
  0x27   : > { %501 = vmatmul.mubr.bf16.vlgmr.msra.gmra.mrb[0].mxu0 %v1337_v33  ;;  %662 = vmatmul.mubr.bf16.vlgmr.msra.gmra.mrb[0].mxu1 %v1337_v33 }
  0x28   : > { %510 = vmatprep.mubr.bf16.mxu0 %v1358_v2  ;;  %671 = vmatprep.mubr.bf16.mxu1 %v1358_v2 }
  0x2f   : > { %511 = vmatmul.mubr.bf16.gmra.mrb[4].mxu0 %v1338_v34  ;;  %672 = vmatmul.mubr.bf16.gmra.mrb[4].mxu1 %v1338_v34 }
  0x30   : > { %520 = vmatprep.mubr.bf16.mxu0 %v1358_v2  ;;  %681 = vmatprep.mubr.bf16.mxu1 %v1358_v2 }
  0x37   : > { %521 = vmatmul.mubr.bf16.gmra.mrb[8].mxu0 %v1339_v35  ;;  %682 = vmatmul.mubr.bf16.gmra.mrb[8].mxu1 %v1339_v35 }
  0x38   : > { %530 = vmatprep.mubr.bf16.mxu0 %v1358_v2  ;;  %691 = vmatprep.mubr.bf16.mxu1 %v1358_v2 }
  0x3f   : > { %531 = vmatmul.mubr.bf16.gmra.mrb[12].mxu0 %v1340_v36  ;;  %692 = vmatmul.mubr.bf16.gmra.mrb[12].mxu1 %v1340_v36 }
  0x40   : > { %540 = vmatprep.mubr.bf16.mxu0 %v1358_v2  ;;  %701 = vmatprep.mubr.bf16.mxu1 %v1358_v2 }
  0x47   : > { %541 = vmatmul.mubr.bf16.gmra.mrb[16].mxu0 %v1341_v37  ;;  %702 = vmatmul.mubr.bf16.gmra.mrb[16].mxu1 %v1341_v37 }
  0x48   : > { %550 = vmatprep.mubr.bf16.mxu0 %v1358_v2  ;;  %711 = vmatprep.mubr.bf16.mxu1 %v1358_v2 }
  0x4f   : > { %551 = vmatmul.mubr.bf16.gmra.mrb[20].mxu0 %v1342_v38  ;;  %712 = vmatmul.mubr.bf16.gmra.mrb[20].mxu1 %v1342_v38 }
  0x50   : > { %560 = vmatprep.mubr.bf16.mxu0 %v1358_v2  ;;  %721 = vmatprep.mubr.bf16.mxu1 %v1358_v2 }
  0x57   : > { %561 = vmatmul.mubr.bf16.gmra.mrb[24].mxu0 %v1343_v39  ;;  %722 = vmatmul.mubr.bf16.gmra.mrb[24].mxu1 %v1343_v39 }
  0x58   : > { %570 = vmatprep.mubr.bf16.mxu0 %v1358_v2  ;;  %731 = vmatprep.mubr.bf16.mxu1 %v1358_v2 }
  0x5f   : > { %571 = vmatmul.mubr.bf16.gmra.mrb[28].mxu0 %v1344_v40  ;;  %732 = vmatmul.mubr.bf16.gmra.mrb[28].mxu1 %v1344_v40 }
  0x60   : > { %580 = vmatprep.mubr.bf16.mxu0 %v1358_v2  ;;  %741 = vmatprep.mubr.bf16.mxu1 %v1358_v2 }
  0x67   : > { %581 = vmatmul.mubr.bf16.gmra.mrb[32].mxu0 %v1345_v41  ;;  %742 = vmatmul.mubr.bf16.gmra.mrb[32].mxu1 %v1345_v41 }
  0x68   : > { %590 = vmatprep.mubr.bf16.mxu0 %v1358_v2  ;;  %751 = vmatprep.mubr.bf16.mxu1 %v1358_v2 }
  0x6f   : > { %591 = vmatmul.mubr.bf16.gmra.mrb[36].mxu0 %v1346_v42  ;;  %752 = vmatmul.mubr.bf16.gmra.mrb[36].mxu1 %v1346_v42 }
  0x70   : > { %600 = vmatprep.mubr.bf16.mxu0 %v1358_v2  ;;  %761 = vmatprep.mubr.bf16.mxu1 %v1358_v2 }
  0x77   : > { %601 = vmatmul.mubr.bf16.gmra.mrb[40].mxu0 %v1347_v43  ;;  %762 = vmatmul.mubr.bf16.gmra.mrb[40].mxu1 %v1347_v43 }
  0x78   : > { %610 = vmatprep.mubr.bf16.mxu0 %v1358_v2  ;;  %771 = vmatprep.mubr.bf16.mxu1 %v1358_v2 }
  0x7f   : > { %611 = vmatmul.mubr.bf16.gmra.mrb[44].mxu0 %v1348_v44  ;;  %772 = vmatmul.mubr.bf16.gmra.mrb[44].mxu1 %v1348_v44 }
  0x80   : > { %620 = vmatprep.mubr.bf16.mxu0 %v1358_v2  ;;  %781 = vmatprep.mubr.bf16.mxu1 %v1358_v2 }
  0x87   : > { %621 = vmatmul.mubr.bf16.gmra.mrb[48].mxu0 %v1349_v45  ;;  %782 = vmatmul.mubr.bf16.gmra.mrb[48].mxu1 %v1349_v45 }
  0xfa   : > { %v502_v46 = vpop.f32.mrb[0].mxu0  ;;  %v663_v47 = vpop.f32.mrb[0].mxu1 }
  0xfb   : > { %v504_v48 = vpop.f32.mrb[1].mxu0  ;;  %v665_v49 = vpop.f32.mrb[1].mxu1 }
  0xfc   : > { %v790_v50 = vmax.f32 %v502_v46, %v504_v48  ;;  %v815_v51 = vmax.f32 %v663_v47, %v665_v49  ;;  %v506_v52 = vpop.f32.mrb[2].mxu0  ;;  %v667_v53 = vpop.f32.mrb[2].mxu1 }
  0xfd   : > { %v508_v55 = vpop.f32.mrb[3].mxu0  ;;  %v669_v56 = vpop.f32.mrb[3].mxu1 }
  0xfe   : > { %v840_v57 = vmax.f32 %v790_v50, %v815_v51  ;;  %v791_v58 = vmax.f32 %v506_v52, %v508_v55  ;;  %v816_v59 = vmax.f32 %v667_v53, %v669_v56 }
 0x100   : > { %v872_v60 = vadd.f32 %v1535_v54, %v840_v57  ;;  %v841_v61 = vmax.f32 %v791_v58, %v816_v59 }
 0x102   : > { %v873_v62 = vadd.f32 %v1535_v54, %v841_v61  ;;  %v512_v63 = vpop.f32.mrb[4].mxu0  ;;  %v673_v0 = vpop.f32.mrb[4].mxu1  ;;  %v897_v3 = vmax.f32 %v872_v60, 0.0 }
 0x103   : > { %v514_v1 = vpop.f32.mrb[5].mxu0  ;;  %v675_v2 = vpop.f32.mrb[5].mxu1 }
 0x104   : > { %v898_v4 = vmax.f32 %v873_v62, 0.0  ;;  %v792_v5 = vmax.f32 %v512_v63, %v514_v1  ;;  %v817_v6 = vmax.f32 %v673_v0, %v675_v2  ;;  %v516_v7 = vpop.f32.mrb[6].mxu0  ;;  %v677_v8 = vpop.f32.mrb[6].mxu1 }
 0x105   : > { %v518_v9 = vpop.f32.mrb[7].mxu0  ;;  %v679_v10 = vpop.f32.mrb[7].mxu1 }
 0x106   : > { %v1212_v11 = vpack.c.bf16 %v898_v4, %v897_v3  ;;  %v842_v12 = vmax.f32 %v792_v5, %v817_v6  ;;  %v793_v13 = vmax.f32 %v516_v7, %v518_v9  ;;  %v818_v14 = vmax.f32 %v677_v8, %v679_v10 }
 0x108   : > { %1213 = vst [vmem:[%s1544_s11] sm:$0xff] %v1212_v11   ;;  %v874_v15 = vadd.f32 %v1535_v54, %v842_v12  ;;  %v843_v16 = vmax.f32 %v793_v13, %v818_v14 }
 0x10a   : > { %v875_v17 = vadd.f32 %v1535_v54, %v843_v16  ;;  %v522_v18 = vpop.f32.mrb[8].mxu0  ;;  %v683_v19 = vpop.f32.mrb[8].mxu1  ;;  %v899_v22 = vmax.f32 %v874_v15, 0.0 }
 0x10b   : > { %v524_v20 = vpop.f32.mrb[9].mxu0  ;;  %v685_v21 = vpop.f32.mrb[9].mxu1 }
 0x10c   : > { %v900_v23 = vmax.f32 %v875_v17, 0.0  ;;  %v794_v24 = vmax.f32 %v522_v18, %v524_v20  ;;  %v819_v25 = vmax.f32 %v683_v19, %v685_v21  ;;  %v526_v26 = vpop.f32.mrb[10].mxu0  ;;  %v687_v27 = vpop.f32.mrb[10].mxu1 }
 0x10d   : > { %v528_v28 = vpop.f32.mrb[11].mxu0  ;;  %v689_v29 = vpop.f32.mrb[11].mxu1 }
 0x10e   : > { %v1217_v30 = vpack.c.bf16 %v900_v23, %v899_v22  ;;  %v844_v31 = vmax.f32 %v794_v24, %v819_v25  ;;  %v795_v32 = vmax.f32 %v526_v26, %v528_v28  ;;  %v820_v33 = vmax.f32 %v687_v27, %v689_v29 }
 0x110   : > { %1269 = vst [vmem:[%s1544_s11 + $0x8] sm:$0xff] %v1217_v30   ;;  %v876_v34 = vadd.f32 %v1535_v54, %v844_v31  ;;  %v845_v35 = vmax.f32 %v795_v32, %v820_v33 }
 0x112   : > { %v877_v36 = vadd.f32 %v1535_v54, %v845_v35  ;;  %v532_v37 = vpop.f32.mrb[12].mxu0  ;;  %v693_v38 = vpop.f32.mrb[12].mxu1  ;;  %v901_v41 = vmax.f32 %v876_v34, 0.0 }
 0x113   : > { %v534_v39 = vpop.f32.mrb[13].mxu0  ;;  %v695_v40 = vpop.f32.mrb[13].mxu1 }
 0x114   : > { %v902_v42 = vmax.f32 %v877_v36, 0.0  ;;  %v796_v43 = vmax.f32 %v532_v37, %v534_v39  ;;  %v821_v44 = vmax.f32 %v693_v38, %v695_v40  ;;  %v536_v45 = vpop.f32.mrb[14].mxu0  ;;  %v697_v46 = vpop.f32.mrb[14].mxu1 }
 0x115   : > { %v538_v47 = vpop.f32.mrb[15].mxu0  ;;  %v699_v48 = vpop.f32.mrb[15].mxu1 }
 0x116   : > { %v1222_v49 = vpack.c.bf16 %v902_v42, %v901_v41  ;;  %v846_v50 = vmax.f32 %v796_v43, %v821_v44  ;;  %v797_v51 = vmax.f32 %v536_v45, %v538_v47  ;;  %v822_v52 = vmax.f32 %v697_v46, %v699_v48 }
 0x118   : > { %1270 = vst [vmem:[%s1544_s11 + $0x10] sm:$0xff] %v1222_v49   ;;  %v878_v53 = vadd.f32 %v1535_v54, %v846_v50  ;;  %v847_v55 = vmax.f32 %v797_v51, %v822_v52 }
 0x11a   : > { %v879_v56 = vadd.f32 %v1535_v54, %v847_v55  ;;  %v542_v57 = vpop.f32.mrb[16].mxu0  ;;  %v703_v58 = vpop.f32.mrb[16].mxu1  ;;  %v903_v61 = vmax.f32 %v878_v53, 0.0 }
 0x11b   : > { %v544_v59 = vpop.f32.mrb[17].mxu0  ;;  %v705_v60 = vpop.f32.mrb[17].mxu1 }
 0x11c   : > { %v904_v62 = vmax.f32 %v879_v56, 0.0  ;;  %v798_v63 = vmax.f32 %v542_v57, %v544_v59  ;;  %v823_v0 = vmax.f32 %v703_v58, %v705_v60  ;;  %v546_v1 = vpop.f32.mrb[18].mxu0  ;;  %v707_v2 = vpop.f32.mrb[18].mxu1 }
 0x11d   : > { %v548_v3 = vpop.f32.mrb[19].mxu0  ;;  %v709_v4 = vpop.f32.mrb[19].mxu1 }
 0x11e   : > { %v1227_v5 = vpack.c.bf16 %v904_v62, %v903_v61  ;;  %v848_v6 = vmax.f32 %v798_v63, %v823_v0  ;;  %v799_v7 = vmax.f32 %v546_v1, %v548_v3  ;;  %v824_v8 = vmax.f32 %v707_v2, %v709_v4 }
 0x120   : > { %1271 = vst [vmem:[%s1544_s11 + $0x18] sm:$0xff] %v1227_v5   ;;  %v880_v9 = vadd.f32 %v1535_v54, %v848_v6  ;;  %v849_v10 = vmax.f32 %v799_v7, %v824_v8 }
 0x122   : > { %v881_v11 = vadd.f32 %v1535_v54, %v849_v10  ;;  %v552_v12 = vpop.f32.mrb[20].mxu0  ;;  %v713_v13 = vpop.f32.mrb[20].mxu1  ;;  %v905_v16 = vmax.f32 %v880_v9, 0.0 }
 0x123   : > { %v554_v14 = vpop.f32.mrb[21].mxu0  ;;  %v715_v15 = vpop.f32.mrb[21].mxu1 }
 0x124   : > { %v906_v17 = vmax.f32 %v881_v11, 0.0  ;;  %v800_v18 = vmax.f32 %v552_v12, %v554_v14  ;;  %v825_v19 = vmax.f32 %v713_v13, %v715_v15  ;;  %v556_v20 = vpop.f32.mrb[22].mxu0  ;;  %v717_v21 = vpop.f32.mrb[22].mxu1 }
 0x125   : > { %v558_v22 = vpop.f32.mrb[23].mxu0  ;;  %v719_v23 = vpop.f32.mrb[23].mxu1 }
 0x126   : > { %v1232_v24 = vpack.c.bf16 %v906_v17, %v905_v16  ;;  %v850_v25 = vmax.f32 %v800_v18, %v825_v19  ;;  %v801_v26 = vmax.f32 %v556_v20, %v558_v22  ;;  %v826_v27 = vmax.f32 %v717_v21, %v719_v23 }
 0x128   : > { %1272 = vst [vmem:[%s1544_s11 + $0x20] sm:$0xff] %v1232_v24   ;;  %v882_v28 = vadd.f32 %v1535_v54, %v850_v25  ;;  %v851_v29 = vmax.f32 %v801_v26, %v826_v27 }
 0x12a   : > { %v883_v30 = vadd.f32 %v1535_v54, %v851_v29  ;;  %v562_v31 = vpop.f32.mrb[24].mxu0  ;;  %v723_v32 = vpop.f32.mrb[24].mxu1  ;;  %v907_v35 = vmax.f32 %v882_v28, 0.0 }
 0x12b   : > { %v564_v33 = vpop.f32.mrb[25].mxu0  ;;  %v725_v34 = vpop.f32.mrb[25].mxu1 }
 0x12c   : > { %v908_v36 = vmax.f32 %v883_v30, 0.0  ;;  %v802_v37 = vmax.f32 %v562_v31, %v564_v33  ;;  %v827_v38 = vmax.f32 %v723_v32, %v725_v34  ;;  %v566_v39 = vpop.f32.mrb[26].mxu0  ;;  %v727_v40 = vpop.f32.mrb[26].mxu1 }
 0x12d   : > { %v568_v41 = vpop.f32.mrb[27].mxu0  ;;  %v729_v42 = vpop.f32.mrb[27].mxu1 }
 0x12e   : > { %v1237_v43 = vpack.c.bf16 %v908_v36, %v907_v35  ;;  %v852_v44 = vmax.f32 %v802_v37, %v827_v38  ;;  %v803_v45 = vmax.f32 %v566_v39, %v568_v41  ;;  %v828_v46 = vmax.f32 %v727_v40, %v729_v42 }
 0x130   : > { %1273 = vst [vmem:[%s1544_s11 + $0x28] sm:$0xff] %v1237_v43   ;;  %v884_v47 = vadd.f32 %v1535_v54, %v852_v44  ;;  %v853_v48 = vmax.f32 %v803_v45, %v828_v46 }
 0x132   : > { %v885_v49 = vadd.f32 %v1535_v54, %v853_v48  ;;  %v572_v50 = vpop.f32.mrb[28].mxu0  ;;  %v733_v51 = vpop.f32.mrb[28].mxu1  ;;  %v909_v55 = vmax.f32 %v884_v47, 0.0 }
 0x133   : > { %v574_v52 = vpop.f32.mrb[29].mxu0  ;;  %v735_v53 = vpop.f32.mrb[29].mxu1 }
 0x134   : > { %v910_v56 = vmax.f32 %v885_v49, 0.0  ;;  %v804_v57 = vmax.f32 %v572_v50, %v574_v52  ;;  %v829_v58 = vmax.f32 %v733_v51, %v735_v53  ;;  %v576_v59 = vpop.f32.mrb[30].mxu0  ;;  %v737_v60 = vpop.f32.mrb[30].mxu1 }
 0x135   : > { %v578_v61 = vpop.f32.mrb[31].mxu0  ;;  %v739_v62 = vpop.f32.mrb[31].mxu1 }
 0x136   : > { %v1242_v63 = vpack.c.bf16 %v910_v56, %v909_v55  ;;  %v854_v0 = vmax.f32 %v804_v57, %v829_v58  ;;  %v805_v1 = vmax.f32 %v576_v59, %v578_v61  ;;  %v830_v2 = vmax.f32 %v737_v60, %v739_v62 }
 0x138   : > { %1274 = vst [vmem:[%s1544_s11 + $0x30] sm:$0xff] %v1242_v63   ;;  %v886_v3 = vadd.f32 %v1535_v54, %v854_v0  ;;  %v855_v4 = vmax.f32 %v805_v1, %v830_v2 }
 0x13a   : > { %v887_v5 = vadd.f32 %v1535_v54, %v855_v4  ;;  %v582_v6 = vpop.f32.mrb[32].mxu0  ;;  %v743_v7 = vpop.f32.mrb[32].mxu1  ;;  %v911_v10 = vmax.f32 %v886_v3, 0.0 }
 0x13b   : > { %v584_v8 = vpop.f32.mrb[33].mxu0  ;;  %v745_v9 = vpop.f32.mrb[33].mxu1 }
 0x13c   : > { %v912_v11 = vmax.f32 %v887_v5, 0.0  ;;  %v806_v12 = vmax.f32 %v582_v6, %v584_v8  ;;  %v831_v13 = vmax.f32 %v743_v7, %v745_v9  ;;  %v586_v14 = vpop.f32.mrb[34].mxu0  ;;  %v747_v15 = vpop.f32.mrb[34].mxu1 }
 0x13d   : > { %v588_v16 = vpop.f32.mrb[35].mxu0  ;;  %v749_v17 = vpop.f32.mrb[35].mxu1 }
 0x13e   : > { %v1247_v18 = vpack.c.bf16 %v912_v11, %v911_v10  ;;  %v856_v19 = vmax.f32 %v806_v12, %v831_v13  ;;  %v807_v20 = vmax.f32 %v586_v14, %v588_v16  ;;  %v832_v21 = vmax.f32 %v747_v15, %v749_v17 }
 0x140   : > { %1275 = vst [vmem:[%s1544_s11 + $0x38] sm:$0xff] %v1247_v18   ;;  %v888_v22 = vadd.f32 %v1535_v54, %v856_v19  ;;  %v857_v23 = vmax.f32 %v807_v20, %v832_v21 }
 0x142   : > { %v889_v24 = vadd.f32 %v1535_v54, %v857_v23  ;;  %v592_v25 = vpop.f32.mrb[36].mxu0  ;;  %v753_v26 = vpop.f32.mrb[36].mxu1  ;;  %v913_v29 = vmax.f32 %v888_v22, 0.0 }
 0x143   : > { %v594_v27 = vpop.f32.mrb[37].mxu0  ;;  %v755_v28 = vpop.f32.mrb[37].mxu1 }
 0x144   : > { %v914_v30 = vmax.f32 %v889_v24, 0.0  ;;  %v808_v31 = vmax.f32 %v592_v25, %v594_v27  ;;  %v833_v32 = vmax.f32 %v753_v26, %v755_v28  ;;  %v596_v33 = vpop.f32.mrb[38].mxu0  ;;  %v757_v34 = vpop.f32.mrb[38].mxu1 }
 0x145   : > { %v598_v35 = vpop.f32.mrb[39].mxu0  ;;  %v759_v36 = vpop.f32.mrb[39].mxu1 }
 0x146   : > { %v1252_v37 = vpack.c.bf16 %v914_v30, %v913_v29  ;;  %v858_v38 = vmax.f32 %v808_v31, %v833_v32  ;;  %v809_v39 = vmax.f32 %v596_v33, %v598_v35  ;;  %v834_v40 = vmax.f32 %v757_v34, %v759_v36 }
 0x148   : > { %1276 = vst [vmem:[%s1544_s11 + $0x40] sm:$0xff] %v1252_v37   ;;  %v890_v41 = vadd.f32 %v1535_v54, %v858_v38  ;;  %v859_v42 = vmax.f32 %v809_v39, %v834_v40 }
 0x14a   : > { %v891_v43 = vadd.f32 %v1535_v54, %v859_v42  ;;  %v602_v44 = vpop.f32.mrb[40].mxu0  ;;  %v763_v45 = vpop.f32.mrb[40].mxu1  ;;  %v915_v48 = vmax.f32 %v890_v41, 0.0 }
 0x14b   : > { %v604_v46 = vpop.f32.mrb[41].mxu0  ;;  %v765_v47 = vpop.f32.mrb[41].mxu1 }
 0x14c   : > { %v916_v49 = vmax.f32 %v891_v43, 0.0  ;;  %v810_v50 = vmax.f32 %v602_v44, %v604_v46  ;;  %v835_v51 = vmax.f32 %v763_v45, %v765_v47  ;;  %v606_v52 = vpop.f32.mrb[42].mxu0  ;;  %v767_v53 = vpop.f32.mrb[42].mxu1 }
 0x14d   : > { %v608_v55 = vpop.f32.mrb[43].mxu0  ;;  %v769_v56 = vpop.f32.mrb[43].mxu1 }
 0x14e   : > { %v1257_v57 = vpack.c.bf16 %v916_v49, %v915_v48  ;;  %v860_v58 = vmax.f32 %v810_v50, %v835_v51  ;;  %v811_v59 = vmax.f32 %v606_v52, %v608_v55  ;;  %v836_v60 = vmax.f32 %v767_v53, %v769_v56 }
 0x150   : > { %1277 = vst [vmem:[%s1544_s11 + $0x48] sm:$0xff] %v1257_v57   ;;  %v892_v61 = vadd.f32 %v1535_v54, %v860_v58  ;;  %v861_v62 = vmax.f32 %v811_v59, %v836_v60 }
 0x152   : > { %v893_v63 = vadd.f32 %v1535_v54, %v861_v62  ;;  %v612_v0 = vpop.f32.mrb[44].mxu0  ;;  %v773_v1 = vpop.f32.mrb[44].mxu1  ;;  %v917_v4 = vmax.f32 %v892_v61, 0.0 }
 0x153   : > { %v614_v2 = vpop.f32.mrb[45].mxu0  ;;  %v775_v3 = vpop.f32.mrb[45].mxu1 }
 0x154   : > { %v918_v5 = vmax.f32 %v893_v63, 0.0  ;;  %v812_v6 = vmax.f32 %v612_v0, %v614_v2  ;;  %v837_v7 = vmax.f32 %v773_v1, %v775_v3  ;;  %v616_v8 = vpop.f32.mrb[46].mxu0  ;;  %v777_v9 = vpop.f32.mrb[46].mxu1 }
 0x155   : > { %v618_v10 = vpop.f32.mrb[47].mxu0  ;;  %v779_v11 = vpop.f32.mrb[47].mxu1 }
 0x156   : > { %v1262_v12 = vpack.c.bf16 %v918_v5, %v917_v4  ;;  %v862_v13 = vmax.f32 %v812_v6, %v837_v7  ;;  %v813_v14 = vmax.f32 %v616_v8, %v618_v10  ;;  %v838_v15 = vmax.f32 %v777_v9, %v779_v11 }
 0x158   : > { %1278 = vst [vmem:[%s1544_s11 + $0x50] sm:$0xff] %v1262_v12   ;;  %v894_v16 = vadd.f32 %v1535_v54, %v862_v13  ;;  %v863_v17 = vmax.f32 %v813_v14, %v838_v15 }
 0x15a   : > { %v895_v18 = vadd.f32 %v1535_v54, %v863_v17  ;;  %v622_v19 = vpop.f32.mrb[48].mxu0  ;;  %v783_v20 = vpop.f32.mrb[48].mxu1  ;;  %v919_v23 = vmax.f32 %v894_v16, 0.0 }
 0x15b   : > { %v624_v21 = vpop.f32.mrb[49].mxu0  ;;  %v785_v22 = vpop.f32.mrb[49].mxu1 }
 0x15c   : > { %v920_v24 = vmax.f32 %v895_v18, 0.0  ;;  %v814_v25 = vmax.f32 %v622_v19, %v624_v21  ;;  %v839_v26 = vmax.f32 %v783_v20, %v785_v22  ;;  %v626_v27 = vpop.f32.mrb[50].mxu0  ;;  %v787_v28 = vpop.f32.mrb[50].mxu1 }
 0x15d   : > { %v627_v29 = vpop.f32.mrb[51].mxu0  ;;  %v788_v30 = vpop.f32.mrb[51].mxu1 }
 0x15e   : > { %v1267_v31 = vpack.c.bf16 %v920_v24, %v919_v23  ;;  %v864_v32 = vmax.f32 %v814_v25, %v839_v26 }
 0x160   : > { %1279 = vst [vmem:[%s1544_s11 + $0x58] sm:$0xff] %v1267_v31   ;;  %v896_v33 = vadd.f32 %v1535_v54, %v864_v32 }
 0x162   : > { %v921_v34 = vmax.f32 %v896_v33, 0.0 }
 0x164   : > { %v1208_v35 = vpack.c.bf16 %v921_v34, %v921_v34 }
 0x166   : > { %1047 = vst [vmem:[%s1544_s11 + $0x60] sm:$0xf] %v1208_v35 }
 0x167 PF: > { %s13_s12 = sadd.s32 1, %s1356_s12  }
 0x168   : > { %p10_p4 = scmp.ge.s32.totalorder %s13_s12, 4  }
 0x16a   :  { %12 = sbr.rel (!%p10_p4) target bundleno = 1 (0x1), region = 62 }

// kernel: net_forward.3
= control target key start
LH: loop header
LB: loop body
LE: loop exit
PB: predicated region body
PF: predicated region fallthrough
CT: control target
= control target key end

     0   :  { %vm5402_vm0 = vmmov 0   ;;  %s6656_s0 = inlined_call_operand.vmem [shape: bf16[50,256], index: 0, kind: input, shape index: {}]   ;;  %s6657_s1 = inlined_call_operand.vmem [shape: bf16[256,512], index: 1, kind: input, shape index: {}]   ;;  %s6658_s2 = inlined_call_operand.vmem [shape: f32[1,128], index: 2, kind: input, shape index: {}]   ;;  %s6659_s3 = inlined_call_operand.vmem [shape: bf16[25,128,128], index: 3, kind: input, shape index: {}]   ;;  %s6660_s4 = inlined_call_operand.vmem [shape: f32[1,128], index: 4, kind: input, shape index: {}]   ;;  %s6661_s5 = inlined_call_operand.vmem [shape: bf16[128,128], index: 5, kind: input, shape index: {}]   ;;  %s6662_s6 = inlined_call_operand.vmem [shape: f32[1,128], index: 6, kind: input, shape index: {}]   ;;  %s6663_s7 = inlined_call_operand.vmem [shape: bf16[128,128], index: 7, kind: input, shape index: {}]   ;;  %s6664_s8 = inlined_call_operand.vmem [shape: f32[1,128], index: 8, kind: input, shape index: {}]   ;;  %s6665_s9 = inlined_call_operand.hbm [shape: f32[2,128], index: 9, kind: output, shape index: {}]  }
   0x1   :  { %v5053_v0 = vld [vmem:[%s6657_s1 + $0x4] ss:$16 sps:$4 sm:$0xff]   ;;  %v5055_v1 = vld [vmem:[%s6657_s1 + $0xc] ss:$16 sps:$4 sm:$0xff]   ;;  %v5057_v2 = vld [vmem:[%s6657_s1] ss:$16 sps:$4 sm:$0xff]  }
   0x2   :  { %462 = vmatprep.subr.bf16.mxu0 %v5053_v0  ;;  %v5058_v3 = vld [vmem:[%s6657_s1 + $0x8] ss:$16 sps:$4 sm:$0xff]   ;;  %533 = vmatprep.subr.bf16.mxu1 %v5055_v1  ;;  %v5059_v4 = vld [vmem:[%s6657_s1 + $0x24] ss:$16 sps:$4 sm:$0xff]   ;;  %v5061_v5 = vld [vmem:[%s6657_s1 + $0x2c] ss:$16 sps:$4 sm:$0xff]  }
   0x3   :  { %463 = vmatpush1.bf16.msra.mxu0 %v5057_v2  ;;  %534 = vmatpush1.bf16.msra.mxu1 %v5058_v3  ;;  %v5063_v6 = vld [vmem:[%s6657_s1 + $0x20] ss:$16 sps:$4 sm:$0xff]   ;;  %v5064_v7 = vld [vmem:[%s6657_s1 + $0x28] ss:$16 sps:$4 sm:$0xff]   ;;  %v5065_v8 = vld [vmem:[%s6657_s1 + $0x44] ss:$16 sps:$4 sm:$0xff]  }
   0x4   :  { %464 = vmatprep.subr.bf16.mxu0 %v5059_v4  ;;  %535 = vmatprep.subr.bf16.mxu1 %v5061_v5  ;;  %v5067_v9 = vld [vmem:[%s6657_s1 + $0x4c] ss:$16 sps:$4 sm:$0xff]   ;;  %v5069_v10 = vld [vmem:[%s6657_s1 + $0x40] ss:$16 sps:$4 sm:$0xff]   ;;  %v5070_v11 = vld [vmem:[%s6657_s1 + $0x48] ss:$16 sps:$4 sm:$0xff]  }
   0x5   :  { %v5071_v12 = vld [vmem:[%s6657_s1 + $0x64] ss:$16 sps:$4 sm:$0xff]   ;;  %v5073_v13 = vld [vmem:[%s6657_s1 + $0x6c] ss:$16 sps:$4 sm:$0xff]   ;;  %v5075_v14 = vld [vmem:[%s6657_s1 + $0x60] ss:$16 sps:$4 sm:$0xff]  }
   0x6   :  { %v5076_v15 = vld [vmem:[%s6657_s1 + $0x68] ss:$16 sps:$4 sm:$0xff]   ;;  %v5077_v16 = vld [vmem:[%s6657_s1 + $0x84] ss:$16 sps:$4 sm:$0xff]   ;;  %v5079_v17 = vld [vmem:[%s6657_s1 + $0x8c] ss:$16 sps:$4 sm:$0xff]  }
   0x7   :  { %465 = vmatpush1.bf16.msra.mxu0 %v5063_v6  ;;  %536 = vmatpush1.bf16.msra.mxu1 %v5064_v7  ;;  %v5081_v18 = vld [vmem:[%s6657_s1 + $0x80] ss:$16 sps:$4 sm:$0xff]   ;;  %v5082_v19 = vld [vmem:[%s6657_s1 + $0x88] ss:$16 sps:$4 sm:$0xff]   ;;  %v5083_v20 = vld [vmem:[%s6657_s1 + $0xa4] ss:$16 sps:$4 sm:$0xff]  }
   0x8   :  { %466 = vmatprep.subr.bf16.mxu0 %v5065_v8  ;;  %537 = vmatprep.subr.bf16.mxu1 %v5067_v9  ;;  %v5085_v21 = vld [vmem:[%s6657_s1 + $0xac] ss:$16 sps:$4 sm:$0xff]   ;;  %v5087_v22 = vld [vmem:[%s6657_s1 + $0xa0] ss:$16 sps:$4 sm:$0xff]   ;;  %v5088_v23 = vld [vmem:[%s6657_s1 + $0xa8] ss:$16 sps:$4 sm:$0xff]  }
   0x9   :  { %v5089_v24 = vld [vmem:[%s6657_s1 + $0xc4] ss:$16 sps:$4 sm:$0xff]   ;;  %v5091_v25 = vld [vmem:[%s6657_s1 + $0xcc] ss:$16 sps:$4 sm:$0xff]   ;;  %v5093_v26 = vld [vmem:[%s6657_s1 + $0xc0] ss:$16 sps:$4 sm:$0xff]  }
   0xa   :  { %v5094_v27 = vld [vmem:[%s6657_s1 + $0xc8] ss:$16 sps:$4 sm:$0xff]   ;;  %v5095_v28 = vld [vmem:[%s6657_s1 + $0xe4] ss:$16 sps:$4 sm:$0xff]   ;;  %v5097_v29 = vld [vmem:[%s6657_s1 + $0xec] ss:$16 sps:$4 sm:$0xff]  }
   0xb   :  { %467 = vmatpush1.bf16.msra.mxu0 %v5069_v10  ;;  %538 = vmatpush1.bf16.msra.mxu1 %v5070_v11  ;;  %v5099_v30 = vld [vmem:[%s6657_s1 + $0xe0] ss:$16 sps:$4 sm:$0xff]   ;;  %v5100_v31 = vld [vmem:[%s6657_s1 + $0xe8] ss:$16 sps:$4 sm:$0xff]   ;;  %v5101_v32 = vld [vmem:[%s6657_s1 + $0x104] ss:$16 sps:$4 sm:$0xff]  }
   0xc   :  { %468 = vmatprep.subr.bf16.mxu0 %v5071_v12  ;;  %539 = vmatprep.subr.bf16.mxu1 %v5073_v13  ;;  %v5103_v33 = vld [vmem:[%s6657_s1 + $0x10c] ss:$16 sps:$4 sm:$0xff]   ;;  %v5105_v34 = vld [vmem:[%s6657_s1 + $0x100] ss:$16 sps:$4 sm:$0xff]   ;;  %v5106_v35 = vld [vmem:[%s6657_s1 + $0x108] ss:$16 sps:$4 sm:$0xff]  }
   0xd   :  { %v5107_v36 = vld [vmem:[%s6657_s1 + $0x124] ss:$16 sps:$4 sm:$0xff]   ;;  %v5109_v37 = vld [vmem:[%s6657_s1 + $0x12c] ss:$16 sps:$4 sm:$0xff]   ;;  %v5111_v38 = vld [vmem:[%s6657_s1 + $0x120] ss:$16 sps:$4 sm:$0xff]  }
   0xe   :  { %v5112_v39 = vld [vmem:[%s6657_s1 + $0x128] ss:$16 sps:$4 sm:$0xff]   ;;  %v5113_v40 = vld [vmem:[%s6657_s1 + $0x144] ss:$16 sps:$4 sm:$0xff]   ;;  %v5115_v41 = vld [vmem:[%s6657_s1 + $0x14c] ss:$16 sps:$4 sm:$0xff]  }
   0xf   :  { %469 = vmatpush1.bf16.msra.mxu0 %v5075_v14  ;;  %540 = vmatpush1.bf16.msra.mxu1 %v5076_v15  ;;  %v5117_v42 = vld [vmem:[%s6657_s1 + $0x140] ss:$16 sps:$4 sm:$0xff]   ;;  %v5118_v43 = vld [vmem:[%s6657_s1 + $0x148] ss:$16 sps:$4 sm:$0xff]   ;;  %v5119_v44 = vld [vmem:[%s6657_s1 + $0x164] ss:$16 sps:$4 sm:$0xff]  }
  0x10   :  { %470 = vmatprep.subr.bf16.mxu0 %v5077_v16  ;;  %541 = vmatprep.subr.bf16.mxu1 %v5079_v17  ;;  %v5121_v45 = vld [vmem:[%s6657_s1 + $0x16c] ss:$16 sps:$4 sm:$0xff]   ;;  %v5123_v46 = vld [vmem:[%s6657_s1 + $0x160] ss:$16 sps:$4 sm:$0xff]   ;;  %v5124_v47 = vld [vmem:[%s6657_s1 + $0x168] ss:$16 sps:$4 sm:$0xff]  }
  0x11   :  { %v5151_v48 = vld [vmem:[%s6656_s0 + $0x4] ss:$8 sps:$4 sm:$0xff]   ;;  %v5129_v51 = vld [vmem:[%s6657_s1 + $0x180] ss:$16 sps:$4 sm:$0xff]   ;;  %v5130_v52 = vld [vmem:[%s6657_s1 + $0x188] ss:$16 sps:$4 sm:$0xff]  }
  0x12   :  { %v5125_v49 = vld [vmem:[%s6657_s1 + $0x184] ss:$16 sps:$4 sm:$0xff]   ;;  %v5127_v50 = vld [vmem:[%s6657_s1 + $0x18c] ss:$16 sps:$4 sm:$0xff]   ;;  %494 = vmatprep.mubr.bf16.mxu0 %v5151_v48  ;;  %565 = vmatprep.mubr.bf16.mxu1 %v5151_v48  ;;  %v5135_v55 = vld [vmem:[%s6657_s1 + $0x1a0] ss:$16 sps:$4 sm:$0xff]  }
  0x13   :  { %471 = vmatpush1.bf16.msra.mxu0 %v5081_v18  ;;  %542 = vmatpush1.bf16.msra.mxu1 %v5082_v19  ;;  %v5131_v53 = vld [vmem:[%s6657_s1 + $0x1a4] ss:$16 sps:$4 sm:$0xff]   ;;  %v5133_v54 = vld [vmem:[%s6657_s1 + $0x1ac] ss:$16 sps:$4 sm:$0xff]   ;;  %v5136_v56 = vld [vmem:[%s6657_s1 + $0x1a8] ss:$16 sps:$4 sm:$0xff]  }
  0x14   :  { %472 = vmatprep.subr.bf16.mxu0 %v5083_v20  ;;  %543 = vmatprep.subr.bf16.mxu1 %v5085_v21  ;;  %v5137_v57 = vld [vmem:[%s6657_s1 + $0x1c4] ss:$16 sps:$4 sm:$0xff]   ;;  %v5139_v58 = vld [vmem:[%s6657_s1 + $0x1cc] ss:$16 sps:$4 sm:$0xff]   ;;  %v5141_v59 = vld [vmem:[%s6657_s1 + $0x1c0] ss:$16 sps:$4 sm:$0xff]  }
  0x15   :  { %v5142_v60 = vld [vmem:[%s6657_s1 + $0x1c8] ss:$16 sps:$4 sm:$0xff]   ;;  %v5143_v61 = vld [vmem:[%s6657_s1 + $0x1e4] ss:$16 sps:$4 sm:$0xff]   ;;  %v5145_v62 = vld [vmem:[%s6657_s1 + $0x1ec] ss:$16 sps:$4 sm:$0xff]  }
  0x16   :  { %v5147_v63 = vld [vmem:[%s6657_s1 + $0x1e0] ss:$16 sps:$4 sm:$0xff]   ;;  %v5148_v0 = vld [vmem:[%s6657_s1 + $0x1e8] ss:$16 sps:$4 sm:$0xff]   ;;  %v5152_v2 = vld [vmem:[%s6656_s0 + $0x14] ss:$8 sps:$4 sm:$0xff]  }
  0x17   :  { %473 = vmatpush1.bf16.msra.mxu0 %v5087_v22  ;;  %544 = vmatpush1.bf16.msra.mxu1 %v5088_v23  ;;  %v5149_v1 = vld [vmem:[%s6656_s0] ss:$8 sps:$4 sm:$0xff]   ;;  %v5401_v5 = vmov 0.0   ;;  %v5154_v8 = vld [vmem:[%s6656_s0 + $0x10] ss:$8 sps:$4 sm:$0xff]  }
  0x18   :  { %474 = vmatprep.subr.bf16.mxu0 %v5089_v24  ;;  %545 = vmatprep.subr.bf16.mxu1 %v5091_v25  ;;  %v5155_v3 = vld [vmem:[%s6659_s3] sm:$0xff]   ;;  %v5157_v6 = vld [vmem:[%s6659_s3 + $0x8] sm:$0xff]   ;;  %v5159_v10 = vld [vmem:[%s6659_s3 + $0x10] sm:$0xff]  }
  0x19   :  { %v5156_v4 = vld [vmem:[%s6659_s3 + $0x40] sm:$0xff]   ;;  %v5158_v7 = vld [vmem:[%s6659_s3 + $0x48] sm:$0xff]   ;;  %v5160_v11 = vld [vmem:[%s6659_s3 + $0x50] sm:$0xff]  }
  0x1a   :  { %v5162_v9 = vld [vmem:[%s6656_s0 + $0x24] ss:$8 sps:$4 sm:$0xff]   ;;  %v5161_v12 = vld [vmem:[%s6659_s3 + $0x18] sm:$0xff]   ;;  %v5165_v14 = vld [vmem:[%s6656_s0 + $0x20] ss:$8 sps:$4 sm:$0xff]  }
  0x1b   :  { %475 = vmatpush1.bf16.msra.mxu0 %v5093_v26  ;;  %546 = vmatpush1.bf16.msra.mxu1 %v5094_v27  ;;  %v5164_v13 = vld [vmem:[%s6659_s3 + $0x58] sm:$0xff]   ;;  %v5166_v15 = vld [vmem:[%s6659_s3 + $0x20] sm:$0xff]   ;;  %v5168_v17 = vld [vmem:[%s6659_s3 + $0x28] sm:$0xff]  }
  0x1c   :  { %476 = vmatprep.subr.bf16.mxu0 %v5095_v28  ;;  %547 = vmatprep.subr.bf16.mxu1 %v5097_v29  ;;  %v5167_v16 = vld [vmem:[%s6659_s3 + $0x60] sm:$0xff]   ;;  %v40_v18 = vld [vmem:[%s6656_s0 + $0x30] sm:$0x11]  ;;  %v5170_v20 = vld [vmem:[%s6659_s3 + $0x68] sm:$0xff]  }
  0x1d   :  { %v3598_v19 = vcombine.high %v40_v18, %v40_v18  ;;  %v3597_v21 = vcombine.low %v40_v18, %v40_v18  ;;  %v5172_v22 = vld [vmem:[%s6659_s3 + $0x30] sm:$0xff]   ;;  %v5174_v24 = vld [vmem:[%s6659_s3 + $0x38] sm:$0xff]  }
  0x1e   :  { %v5173_v23 = vld [vmem:[%s6659_s3 + $0x70] sm:$0xff]   ;;  %v5175_v25 = vld [vmem:[%s6659_s3 + $0x78] sm:$0xff]  }
  0x1f   :  { %477 = vmatpush1.bf16.msra.mxu0 %v5099_v30  ;;  %548 = vmatpush1.bf16.msra.mxu1 %v5100_v31 }
  0x20   :  { %478 = vmatprep.subr.bf16.mxu0 %v5101_v32  ;;  %549 = vmatprep.subr.bf16.mxu1 %v5103_v33 }
  0x23   :  { %479 = vmatpush1.bf16.msra.mxu0 %v5105_v34  ;;  %550 = vmatpush1.bf16.msra.mxu1 %v5106_v35 }
  0x24   :  { %480 = vmatprep.subr.bf16.mxu0 %v5107_v36  ;;  %551 = vmatprep.subr.bf16.mxu1 %v5109_v37 }
  0x27   :  { %481 = vmatpush1.bf16.msra.mxu0 %v5111_v38  ;;  %552 = vmatpush1.bf16.msra.mxu1 %v5112_v39 }
  0x28   :  { %482 = vmatprep.subr.bf16.mxu0 %v5113_v40  ;;  %553 = vmatprep.subr.bf16.mxu1 %v5115_v41 }
  0x2b   :  { %483 = vmatpush1.bf16.msra.mxu0 %v5117_v42  ;;  %554 = vmatpush1.bf16.msra.mxu1 %v5118_v43 }
  0x2c   :  { %484 = vmatprep.subr.bf16.mxu0 %v5119_v44  ;;  %555 = vmatprep.subr.bf16.mxu1 %v5121_v45 }
  0x2f   :  { %485 = vmatpush1.bf16.msra.mxu0 %v5123_v46  ;;  %556 = vmatpush1.bf16.msra.mxu1 %v5124_v47 }
  0x30   :  { %486 = vmatprep.subr.bf16.mxu0 %v5125_v49  ;;  %557 = vmatprep.subr.bf16.mxu1 %v5127_v50 }
  0x33   :  { %487 = vmatpush1.bf16.msra.mxu0 %v5129_v51  ;;  %558 = vmatpush1.bf16.msra.mxu1 %v5130_v52 }
  0x34   :  { %488 = vmatprep.subr.bf16.mxu0 %v5131_v53  ;;  %559 = vmatprep.subr.bf16.mxu1 %v5133_v54 }
  0x37   :  { %489 = vmatpush1.bf16.msra.mxu0 %v5135_v55  ;;  %560 = vmatpush1.bf16.msra.mxu1 %v5136_v56 }
  0x38   :  { %490 = vmatprep.subr.bf16.mxu0 %v5137_v57  ;;  %561 = vmatprep.subr.bf16.mxu1 %v5139_v58 }
  0x3b   :  { %491 = vmatpush1.bf16.msra.mxu0 %v5141_v59  ;;  %562 = vmatpush1.bf16.msra.mxu1 %v5142_v60 }
  0x3c   :  { %492 = vmatprep.subr.bf16.mxu0 %v5143_v61  ;;  %563 = vmatprep.subr.bf16.mxu1 %v5145_v62 }
  0x3f   :  { %493 = vmatpush1.bf16.msra.mxu0 %v5147_v63  ;;  %564 = vmatpush1.bf16.msra.mxu1 %v5148_v0 }
  0x40   :  { %4530 = vmatprep.subr.bf16.mxu1 %v5401_v5  ;;  %4510 = vmatprep.subr.bf16.mxu0 %v5401_v5 }
  0x42   :  { %495 = vmatmul.mubr.bf16.vlgmr.msra.gmra.mrb[0].mxu0 %v5149_v1  ;;  %566 = vmatmul.mubr.bf16.vlgmr.msra.gmra.mrb[0].mxu1 %v5149_v1 }
  0x43   :  { %504 = vmatprep.mubr.bf16.mxu0 %v5152_v2  ;;  %575 = vmatprep.mubr.bf16.mxu1 %v5152_v2 }
  0x44   :  { %4531 = vmatpush3.bf16.msra.mxu1 %v5155_v3  ;;  %4511 = vmatpush3.bf16.msra.mxu0 %v5156_v4 }
  0x45   :  { %4532 = vmatprep.subr.bf16.mxu1 %v5401_v5  ;;  %4512 = vmatprep.subr.bf16.mxu0 %v5401_v5 }
  0x48   :  { %4533 = vmatpush3.bf16.msra.mxu1 %v5157_v6  ;;  %4513 = vmatpush3.bf16.msra.mxu0 %v5158_v7 }
  0x49   :  { %4534 = vmatprep.subr.bf16.mxu1 %v5401_v5  ;;  %4514 = vmatprep.subr.bf16.mxu0 %v5401_v5 }
  0x4a   :  { %505 = vmatmul.mubr.bf16.gmra.mrb[4].mxu0 %v5154_v8  ;;  %576 = vmatmul.mubr.bf16.gmra.mrb[4].mxu1 %v5154_v8 }
  0x4b   :  { %514 = vmatprep.mubr.bf16.mxu0 %v5162_v9  ;;  %585 = vmatprep.mubr.bf16.mxu1 %v5162_v9 }
  0x4c   :  { %4535 = vmatpush3.bf16.msra.mxu1 %v5159_v10  ;;  %4515 = vmatpush3.bf16.msra.mxu0 %v5160_v11 }
  0x4d   :  { %4536 = vmatprep.subr.bf16.mxu1 %v5401_v5  ;;  %4516 = vmatprep.subr.bf16.mxu0 %v5401_v5 }
  0x50   :  { %4537 = vmatpush3.bf16.msra.mxu1 %v5161_v12  ;;  %4517 = vmatpush3.bf16.msra.mxu0 %v5164_v13 }
  0x51   :  { %4538 = vmatprep.subr.bf16.mxu1 %v5401_v5  ;;  %4518 = vmatprep.subr.bf16.mxu0 %v5401_v5 }
  0x52   :  { %515 = vmatmul.mubr.bf16.gmra.mrb[8].mxu0 %v5165_v14  ;;  %586 = vmatmul.mubr.bf16.gmra.mrb[8].mxu1 %v5165_v14 }
  0x53   :  { %524 = vmatprep.mubr.bf16.mxu0 %v3598_v19  ;;  %595 = vmatprep.mubr.bf16.mxu1 %v3598_v19 }
  0x54   :  { %4539 = vmatpush3.bf16.msra.mxu1 %v5166_v15  ;;  %4519 = vmatpush3.bf16.msra.mxu0 %v5167_v16 }
  0x55   :  { %4540 = vmatprep.subr.bf16.mxu1 %v5401_v5  ;;  %4520 = vmatprep.subr.bf16.mxu0 %v5401_v5 }
  0x58   :  { %4541 = vmatpush3.bf16.msra.mxu1 %v5168_v17  ;;  %4521 = vmatpush3.bf16.msra.mxu0 %v5170_v20 }
  0x59   :  { %4542 = vmatprep.subr.bf16.mxu1 %v5401_v5  ;;  %4522 = vmatprep.subr.bf16.mxu0 %v5401_v5 }
  0x5a   :  { %525 = vmatmul.mubr.bf16.gmra.mrb[12].mxu0 %v3597_v21  ;;  %596 = vmatmul.mubr.bf16.gmra.mrb[12].mxu1 %v3597_v21 }
  0x5b   :  { %4546 = vmatprep.mubr.msk.bf16.mxu1 %vm5402_vm0, %v5401_v5  ;;  %4526 = vmatprep.mubr.msk.bf16.mxu0 %vm5402_vm0, %v5401_v5 }
  0x5c   :  { %4543 = vmatpush3.bf16.msra.mxu1 %v5172_v22  ;;  %4523 = vmatpush3.bf16.msra.mxu0 %v5173_v23 }
  0x5d   :  { %4544 = vmatprep.subr.bf16.mxu1 %v5401_v5  ;;  %4524 = vmatprep.subr.bf16.mxu0 %v5401_v5 }
  0x60   :  { %4545 = vmatpush3.bf16.msra.mxu1 %v5174_v24  ;;  %4525 = vmatpush3.bf16.msra.mxu0 %v5175_v25 }
  0x61   :  { %4570 = vmatprep.subr.bf16.mxu1 %v5401_v5  ;;  %4550 = vmatprep.subr.bf16.mxu0 %v5401_v5 }
  0x62   :  { %14 = vsyncpa [#allocation3], 0  ;;  %v5740_v34 = vld [vmem:[%s6658_s2] ss:$0 sm:$0xff]  ;;  %v5178_v62 = vld [vmem:[%s6659_s3 + $0xc8] sm:$0xff]   ;;  %s5403_s24 = smov [#allocation2]  }
  0x63   :  { %v5176_v53 = vld [vmem:[%s6659_s3 + $0xc0] sm:$0xff]   ;;  %v5179_v1 = vld [vmem:[%s6659_s3 + $0x88] sm:$0xff]   ;;  %v5180_v4 = vld [vmem:[%s6659_s3 + $0xd0] sm:$0xff]   ;;  %s3583_s25 = sshll.u32 %s5403_s24, 4  ;;  %s3584_s25 = int_to_ptr.vmem [resolvable:$true] %s3583_s25 }
  0x64   :  { %v5177_v60 = vld [vmem:[%s6659_s3 + $0x80] sm:$0xff]   ;;  %v5181_v7 = vld [vmem:[%s6659_s3 + $0x90] sm:$0xff]   ;;  %v5182_v9 = vld [vmem:[%s6659_s3 + $0xd8] sm:$0xff]   ;;  %p5382_p1 = scmp.lt.s32.totalorder %s3584_s25, %s3584_s25 }
  0x65   :  { %v5183_v10 = vld [vmem:[%s6659_s3 + $0x98] sm:$0xff]   ;;  %v5184_v11 = vld [vmem:[%s6659_s3 + $0xe0] sm:$0xff]   ;;  %v5186_v13 = vld [vmem:[%s6659_s3 + $0xe8] sm:$0xff]  }
  0x66   :  { %v5185_v12 = vld [vmem:[%s6659_s3 + $0xa0] sm:$0xff]   ;;  %v5187_v14 = vld [vmem:[%s6659_s3 + $0xa8] sm:$0xff]   ;;  %v5188_v15 = vld [vmem:[%s6659_s3 + $0xf0] sm:$0xff]  }
  0x67   :  { %v5189_v16 = vld [vmem:[%s6659_s3 + $0xb0] sm:$0xff]   ;;  %v5190_v17 = vld [vmem:[%s6659_s3 + $0xf8] sm:$0xff]   ;;  %v5192_v19 = vld [vmem:[%s6659_s3 + $0x140] sm:$0xff]  }
  0x68   :  { %v5191_v18 = vld [vmem:[%s6659_s3 + $0xb8] sm:$0xff]   ;;  %v5193_v21 = vld [vmem:[%s6659_s3 + $0x100] sm:$0xff]   ;;  %v5194_v23 = vld [vmem:[%s6659_s3 + $0x148] sm:$0xff]  }
  0x69   :  { %v5195_v24 = vld [vmem:[%s6659_s3 + $0x108] sm:$0xff]   ;;  %v5196_v25 = vld [vmem:[%s6659_s3 + $0x150] sm:$0xff]  }
 0x115   :  { %v496_v26 = vpop.f32.mrb[0].mxu0  ;;  %v567_v27 = vpop.f32.mrb[0].mxu1 }
 0x116   :  { %v498_v28 = vpop.f32.mrb[1].mxu0  ;;  %v569_v29 = vpop.f32.mrb[1].mxu1 }
 0x117   :  { %v604_v30 = vmax.f32 %v496_v26, %v498_v28  ;;  %v611_v31 = vmax.f32 %v567_v27, %v569_v29  ;;  %v500_v32 = vpop.f32.mrb[2].mxu0  ;;  %v571_v33 = vpop.f32.mrb[2].mxu1  ;;  %v5197_v26 = vld [vmem:[%s6659_s3 + $0x110] sm:$0xff]   ;;  %v5198_v27 = vld [vmem:[%s6659_s3 + $0x158] sm:$0xff]   ;;  %v5200_v29 = vld [vmem:[%s6659_s3 + $0x160] sm:$0xff]  }
 0x118   :  { %v502_v35 = vpop.f32.mrb[3].mxu0  ;;  %v573_v36 = vpop.f32.mrb[3].mxu1  ;;  %v5199_v28 = vld [vmem:[%s6659_s3 + $0x118] sm:$0xff]  }
 0x119   :  { %v618_v37 = vmax.f32 %v604_v30, %v611_v31  ;;  %v605_v38 = vmax.f32 %v500_v32, %v502_v35  ;;  %v612_v39 = vmax.f32 %v571_v33, %v573_v36  ;;  %v5201_v30 = vld [vmem:[%s6659_s3 + $0x120] sm:$0xff]   ;;  %v5202_v31 = vld [vmem:[%s6659_s3 + $0x168] sm:$0xff]   ;;  %v5204_v33 = vld [vmem:[%s6659_s3 + $0x170] sm:$0xff]  }
 0x11a   :  { %v5203_v32 = vld [vmem:[%s6659_s3 + $0x128] sm:$0xff]   ;;  %v5205_v35 = vld [vmem:[%s6659_s3 + $0x130] sm:$0xff]   ;;  %v5206_v36 = vld [vmem:[%s6659_s3 + $0x178] sm:$0xff]  }
 0x11b   :  { %v632_v40 = vadd.f32 %v5740_v34, %v618_v37  ;;  %v619_v41 = vmax.f32 %v605_v38, %v612_v39  ;;  %v5207_v37 = vld [vmem:[%s6659_s3 + $0x138] sm:$0xff]   ;;  %v5208_v38 = vld [vmem:[%s6659_s3 + $0x1c0] sm:$0xff]  }
 0x11d   :  { %v633_v42 = vadd.f32 %v5740_v34, %v619_v41  ;;  %v506_v43 = vpop.f32.mrb[4].mxu0  ;;  %v577_v44 = vpop.f32.mrb[4].mxu1  ;;  %v639_v47 = vmax.f32 %v632_v40, 0.0  ;;  %v5209_v40 = vld [vmem:[%s6659_s3 + $0x180] sm:$0xff]  }
 0x11e   :  { %v508_v45 = vpop.f32.mrb[5].mxu0  ;;  %v579_v46 = vpop.f32.mrb[5].mxu1 }
 0x11f   :  { %v640_v48 = vmax.f32 %v633_v42, 0.0  ;;  %v606_v49 = vmax.f32 %v506_v43, %v508_v45  ;;  %v613_v50 = vmax.f32 %v577_v44, %v579_v46  ;;  %v510_v51 = vpop.f32.mrb[6].mxu0  ;;  %v581_v52 = vpop.f32.mrb[6].mxu1  ;;  %v5210_v42 = vld [vmem:[%s6659_s3 + $0x1c8] sm:$0xff]  }
 0x120   :  { %v512_v54 = vpop.f32.mrb[7].mxu0  ;;  %v583_v55 = vpop.f32.mrb[7].mxu1  ;;  %v5211_v45 = vld [vmem:[%s6659_s3 + $0x188] sm:$0xff]  }
 0x121   :  { %v5747_v56 = vpack.c.bf16 %v640_v48, %v639_v47  ;;  %v620_v57 = vmax.f32 %v606_v49, %v613_v50  ;;  %v607_v58 = vmax.f32 %v510_v51, %v512_v54  ;;  %v614_v59 = vmax.f32 %v581_v52, %v583_v55  ;;  %v5212_v52 = vld [vmem:[%s6659_s3 + $0x1d0] sm:$0xff]  }
 0x123   :  { %4547 = vmatmul.mubr.bf16.vlgmr.msra.gmra.mrb[16].mxu1 %v5747_v56  ;;  %v684_v61 = vrot.slane %v5747_v56, 1  ;;  %v634_v63 = vadd.f32 %v5740_v34, %v620_v57  ;;  %v621_v0 = vmax.f32 %v607_v58, %v614_v59  ;;  %v987_v20 = vrot.slane %v5747_v56, 3  ;;  %v5213_v59 = vld [vmem:[%s6659_s3 + $0x190] sm:$0xff]  }
 0x124   :  { %4571 = vmatpush3.bf16.msra.mxu1 %v5176_v53  ;;  %4586 = vmatprep.mubr.msk.bf16.mxu1 %vm5402_vm0, %v5401_v5  ;;  %v879_v22 = vrot.slane %v5747_v56, 2  ;;  %v1203_v39 = vrot.slane %v5747_v56, 5  ;;  %v1095_v41 = vrot.slane %v5747_v56, 4 }
 0x125   :  { %4527 = vmatmul.mubr.bf16.vlgmr.msra.gmra.mrb[16].mxu0 %v684_v61  ;;  %4572 = vmatprep.subr.bf16.mxu1 %v5401_v5  ;;  %v641_v2 = vmax.f32 %v634_v63, 0.0  ;;  %v635_v3 = vadd.f32 %v5740_v34, %v621_v0  ;;  %v516_v43 = vpop.f32.mrb[8].mxu0  ;;  %v587_v44 = vpop.f32.mrb[8].mxu1 }
 0x126   :  { %4551 = vmatpush3.bf16.msra.mxu0 %v5177_v60  ;;  %4566 = vmatprep.mubr.msk.bf16.mxu0 %vm5402_vm0, %v5401_v5  ;;  %v518_v46 = vpop.f32.mrb[9].mxu0  ;;  %v589_v47 = vpop.f32.mrb[9].mxu1 }
 0x127   :  { %4552 = vmatprep.subr.bf16.mxu0 %v5401_v5  ;;  %v642_v6 = vmax.f32 %v635_v3, 0.0  ;;  %v608_v48 = vmax.f32 %v516_v43, %v518_v46  ;;  %v615_v49 = vmax.f32 %v587_v44, %v589_v47  ;;  %v520_v50 = vpop.f32.mrb[10].mxu0  ;;  %v591_v51 = vpop.f32.mrb[10].mxu1  ;;  %v5240_v43 = vld [vmem:[%s6659_s3 + $0x2c0] sm:$0xff]   ;;  %v5243_v46 = vld [vmem:[%s6659_s3 + $0x288] sm:$0xff]   ;;  %v5244_v47 = vld [vmem:[%s6659_s3 + $0x2d0] sm:$0xff]  }
 0x128   :  { %4573 = vmatpush3.bf16.msra.mxu1 %v5178_v62  ;;  %v522_v53 = vpop.f32.mrb[11].mxu0  ;;  %v593_v54 = vpop.f32.mrb[11].mxu1  ;;  %v5214_v62 = vld [vmem:[%s6659_s3 + $0x1d8] sm:$0xff]   ;;  %v5241_v44 = vld [vmem:[%s6659_s3 + $0x280] sm:$0xff]  }
 0x129   :  { %4574 = vmatprep.subr.bf16.mxu1 %v5401_v5  ;;  %v5776_v8 = vpack.c.bf16 %v642_v6, %v641_v2  ;;  %v622_v55 = vmax.f32 %v608_v48, %v615_v49  ;;  %v609_v57 = vmax.f32 %v520_v50, %v522_v53  ;;  %v616_v58 = vmax.f32 %v591_v51, %v593_v54  ;;  %v5215_v2 = vld [vmem:[%s6659_s3 + $0x198] sm:$0xff]   ;;  %v5245_v48 = vld [vmem:[%s6659_s3 + $0x290] sm:$0xff]   ;;  %v5248_v51 = vld [vmem:[%s6659_s3 + $0x2e0] sm:$0xff]  }
 0x12a   :  { %4553 = vmatpush3.bf16.msra.mxu0 %v5179_v1  ;;  %v5246_v49 = vld [vmem:[%s6659_s3 + $0x2d8] sm:$0xff]   ;;  %v5250_v53 = vld [vmem:[%s6659_s3 + $0x2e8] sm:$0xff]  }
 0x12b   :  { %4554 = vmatprep.subr.bf16.mxu0 %v5401_v5  ;;  %v636_v60 = vadd.f32 %v5740_v34, %v622_v55  ;;  %v623_v61 = vmax.f32 %v609_v57, %v616_v58  ;;  %v5247_v50 = vld [vmem:[%s6659_s3 + $0x298] sm:$0xff]   ;;  %v5251_v54 = vld [vmem:[%s6659_s3 + $0x2a8] sm:$0xff]   ;;  %v5252_v55 = vld [vmem:[%s6659_s3 + $0x2f0] sm:$0xff]  }
 0x12c   :  { %4575 = vmatpush3.bf16.msra.mxu1 %v5180_v4  ;;  %v5253_v57 = vld [vmem:[%s6659_s3 + $0x2b0] sm:$0xff]   ;;  %v5254_v58 = vld [vmem:[%s6659_s3 + $0x2f8] sm:$0xff]  }
 0x12d   :  { %4576 = vmatprep.subr.bf16.mxu1 %v5401_v5  ;;  %v643_v63 = vmax.f32 %v636_v60, 0.0  ;;  %v637_v0 = vadd.f32 %v5740_v34, %v623_v61  ;;  %v526_v1 = vpop.f32.mrb[12].mxu0  ;;  %v597_v4 = vpop.f32.mrb[12].mxu1  ;;  %v5256_v60 = vld [vmem:[%s6659_s3 + $0x340] sm:$0xff]   ;;  %v1850_v61 = vrot.slane %v5776_v8, 3 }
 0x12e   :  { %4555 = vmatpush3.bf16.msra.mxu0 %v5181_v7  ;;  %v528_v3 = vpop.f32.mrb[13].mxu0  ;;  %v599_v34 = vpop.f32.mrb[13].mxu1 }
 0x12f   :  { %4556 = vmatprep.subr.bf16.mxu0 %v5401_v5  ;;  %v644_v6 = vmax.f32 %v637_v0, 0.0  ;;  %v610_v7 = vmax.f32 %v526_v1, %v528_v3  ;;  %v5258_v0 = vld [vmem:[%s6659_s3 + $0x348] sm:$0xff]   ;;  %v5261_v3 = vld [vmem:[%s6659_s3 + $0x310] sm:$0xff]  }
 0x130   :  { %4577 = vmatpush3.bf16.msra.mxu1 %v5182_v9  ;;  %v530_v9 = vpop.f32.mrb[14].mxu0  ;;  %v5259_v1 = vld [vmem:[%s6659_s3 + $0x308] sm:$0xff]  }
 0x131   :  { %4578 = vmatprep.subr.bf16.mxu1 %v5401_v5  ;;  %v5265_v9 = vld [vmem:[%s6659_s3 + $0x320] sm:$0xff]  }
 0x132   :  { %4557 = vmatpush3.bf16.msra.mxu0 %v5183_v10  ;;  %v5216_v10 = vld [vmem:[%s6659_s3 + $0x1e0] sm:$0xff]  }
 0x133   :  { %4558 = vmatprep.subr.bf16.mxu0 %v5401_v5 }
 0x134   :  { %4579 = vmatpush3.bf16.msra.mxu1 %v5184_v11  ;;  %v531_v11 = vpop.f32.mrb[15].mxu0 }
 0x135   :  { %4580 = vmatprep.subr.bf16.mxu1 %v5401_v5  ;;  %v5267_v11 = vld [vmem:[%s6659_s3 + $0x328] sm:$0xff]  }
 0x136   :  { %4559 = vmatpush3.bf16.msra.mxu0 %v5185_v12  ;;  %v5932_v12 = vpack.c.bf16 %v644_v6, %v643_v63  ;;  %v1742_v63 = vrot.slane %v5776_v8, 2  ;;  %v5263_v6 = vld [vmem:[%s6659_s3 + $0x318] sm:$0xff]  }
 0x137   :  { %4560 = vmatprep.subr.bf16.mxu0 %v5401_v5 }
 0x138   :  { %4581 = vmatpush3.bf16.msra.mxu1 %v5186_v13  ;;  %v617_v13 = vmax.f32 %v597_v4, %v599_v34  ;;  %v5262_v4 = vld [vmem:[%s6659_s3 + $0x358] sm:$0xff]   ;;  %v5268_v34 = vld [vmem:[%s6659_s3 + $0x370] sm:$0xff]  }
 0x139   :  { %4582 = vmatprep.subr.bf16.mxu1 %v5401_v5 }
 0x13a   :  { %4561 = vmatpush3.bf16.msra.mxu0 %v5187_v14  ;;  %v601_v14 = vpop.f32.mrb[14].mxu1 }
 0x13b   :  { %4562 = vmatprep.subr.bf16.mxu0 %v5401_v5  ;;  %v5270_v14 = vld [vmem:[%s6659_s3 + $0x378] sm:$0xff]  }
 0x13c   :  { %4583 = vmatpush3.bf16.msra.mxu1 %v5188_v15  ;;  %v5217_v15 = vld [vmem:[%s6659_s3 + $0x1a0] sm:$0xff]  }
 0x13d   :  { %4584 = vmatprep.subr.bf16.mxu1 %v5401_v5 }
 0x13e   :  { %4563 = vmatpush3.bf16.msra.mxu0 %v5189_v16  ;;  %v602_v16 = vpop.f32.mrb[15].mxu1 }
 0x13f   :  { %4564 = vmatprep.subr.bf16.mxu0 %v5401_v5  ;;  %v5272_v16 = vld [vmem:[%s6659_s3 + $0x3c0] sm:$0xff]  }
 0x140   :  { %4585 = vmatpush3.bf16.msra.mxu1 %v5190_v17  ;;  %v5938_v17 = vmax.f32 %v610_v7, %v617_v13  ;;  %v5264_v7 = vld [vmem:[%s6659_s3 + $0x360] sm:$0xff]   ;;  %v5269_v13 = vld [vmem:[%s6659_s3 + $0x330] sm:$0xff]  }
 0x141   :  { %4610 = vmatprep.subr.bf16.mxu1 %v5401_v5 }
 0x142   :  { %4565 = vmatpush3.bf16.msra.mxu0 %v5191_v18  ;;  %v5218_v18 = vld [vmem:[%s6659_s3 + $0x1e8] sm:$0xff]  }
 0x143   :  { %4587 = vmatmul.mubr.bf16.vlgmr.msra.gmra.mrb[20].mxu1 %v987_v20  ;;  %4590 = vmatprep.subr.bf16.mxu0 %v5401_v5  ;;  %v5220_v20 = vld [vmem:[%s6659_s3 + $0x1f0] sm:$0xff]  }
 0x144   :  { %4611 = vmatpush3.bf16.msra.mxu1 %v5192_v19  ;;  %4626 = vmatprep.mubr.msk.bf16.mxu1 %vm5402_vm0, %v5401_v5  ;;  %v5219_v19 = vld [vmem:[%s6659_s3 + $0x1a8] sm:$0xff]  }
 0x145   :  { %4567 = vmatmul.mubr.bf16.vlgmr.msra.gmra.mrb[20].mxu0 %v879_v22  ;;  %4612 = vmatprep.subr.bf16.mxu1 %v5401_v5  ;;  %v5222_v22 = vld [vmem:[%s6659_s3 + $0x1f8] sm:$0xff]  }
 0x146   :  { %4591 = vmatpush3.bf16.msra.mxu0 %v5193_v21  ;;  %4606 = vmatprep.mubr.msk.bf16.mxu0 %vm5402_vm0, %v5401_v5  ;;  %v5221_v21 = vld [vmem:[%s6659_s3 + $0x1b0] sm:$0xff]  }
 0x147   :  { %4592 = vmatprep.subr.bf16.mxu0 %v5401_v5 }
 0x148   :  { %4613 = vmatpush3.bf16.msra.mxu1 %v5194_v23  ;;  %v5223_v23 = vld [vmem:[%s6659_s3 + $0x1b8] sm:$0xff]  }
 0x149   :  { %4614 = vmatprep.subr.bf16.mxu1 %v5401_v5 }
 0x14a   :  { %4593 = vmatpush3.bf16.msra.mxu0 %v5195_v24  ;;  %v5224_v24 = vld [vmem:[%s6659_s3 + $0x240] sm:$0xff]  }
 0x14b   :  { %4594 = vmatprep.subr.bf16.mxu0 %v5401_v5 }
 0x14c   :  { %4615 = vmatpush3.bf16.msra.mxu1 %v5196_v25  ;;  %v1419_v25 = vrot.slane %v5747_v56, 7 }
 0x14d   :  { %4616 = vmatprep.subr.bf16.mxu1 %v5401_v5 }
 0x14e   :  { %4595 = vmatpush3.bf16.msra.mxu0 %v5197_v26  ;;  %v5225_v26 = vld [vmem:[%s6659_s3 + $0x200] sm:$0xff]  }
 0x14f   :  { %4596 = vmatprep.subr.bf16.mxu0 %v5401_v5 }
 0x150   :  { %4617 = vmatpush3.bf16.msra.mxu1 %v5198_v27  ;;  %v1311_v27 = vrot.slane %v5747_v56, 6  ;;  %v5228_v56 = vld [vmem:[%s6659_s3 + $0x250] sm:$0xff]  }
 0x151   :  { %4618 = vmatprep.subr.bf16.mxu1 %v5401_v5 }
 0x152   :  { %4597 = vmatpush3.bf16.msra.mxu0 %v5199_v28  ;;  %v5226_v28 = vld [vmem:[%s6659_s3 + $0x248] sm:$0xff]  }
 0x153   :  { %4598 = vmatprep.subr.bf16.mxu0 %v5401_v5 }
 0x154   :  { %4619 = vmatpush3.bf16.msra.mxu1 %v5200_v29  ;;  %v5227_v29 = vld [vmem:[%s6659_s3 + $0x208] sm:$0xff]  }
 0x155   :  { %4620 = vmatprep.subr.bf16.mxu1 %v5401_v5 }
 0x156   :  { %4599 = vmatpush3.bf16.msra.mxu0 %v5201_v30  ;;  %v5229_v30 = vld [vmem:[%s6659_s3 + $0x210] sm:$0xff]  }
 0x157   :  { %4600 = vmatprep.subr.bf16.mxu0 %v5401_v5 }
 0x158   :  { %4621 = vmatpush3.bf16.msra.mxu1 %v5202_v31  ;;  %v5230_v31 = vld [vmem:[%s6659_s3 + $0x258] sm:$0xff]  }
 0x159   :  { %4622 = vmatprep.subr.bf16.mxu1 %v5401_v5 }
 0x15a   :  { %4601 = vmatpush3.bf16.msra.mxu0 %v5203_v32  ;;  %v5231_v32 = vld [vmem:[%s6659_s3 + $0x218] sm:$0xff]  }
 0x15b   :  { %4602 = vmatprep.subr.bf16.mxu0 %v5401_v5 }
 0x15c   :  { %4623 = vmatpush3.bf16.msra.mxu1 %v5204_v33  ;;  %v5232_v33 = vld [vmem:[%s6659_s3 + $0x260] sm:$0xff]  }
 0x15d   :  { %4624 = vmatprep.subr.bf16.mxu1 %v5401_v5 }
 0x15e   :  { %4603 = vmatpush3.bf16.msra.mxu0 %v5205_v35  ;;  %v5233_v35 = vld [vmem:[%s6659_s3 + $0x220] sm:$0xff]  }
 0x15f   :  { %4604 = vmatprep.subr.bf16.mxu0 %v5401_v5 }
 0x160   :  { %4625 = vmatpush3.bf16.msra.mxu1 %v5206_v36  ;;  %v5234_v36 = vld [vmem:[%s6659_s3 + $0x268] sm:$0xff]  }
 0x161   :  { %4650 = vmatprep.subr.bf16.mxu1 %v5401_v5 }
 0x162   :  { %4605 = vmatpush3.bf16.msra.mxu0 %v5207_v37  ;;  %v5235_v37 = vld [vmem:[%s6659_s3 + $0x228] sm:$0xff]  }
 0x163   :  { %4627 = vmatmul.mubr.bf16.vlgmr.msra.gmra.mrb[24].mxu1 %v1203_v39  ;;  %4630 = vmatprep.subr.bf16.mxu0 %v5401_v5  ;;  %v5237_v39 = vld [vmem:[%s6659_s3 + $0x230] sm:$0xff]  }
 0x164   :  { %4651 = vmatpush3.bf16.msra.mxu1 %v5208_v38  ;;  %4666 = vmatprep.mubr.msk.bf16.mxu1 %vm5402_vm0, %v5401_v5  ;;  %v5236_v38 = vld [vmem:[%s6659_s3 + $0x270] sm:$0xff]  }
 0x165   :  { %4607 = vmatmul.mubr.bf16.vlgmr.msra.gmra.mrb[24].mxu0 %v1095_v41  ;;  %4652 = vmatprep.subr.bf16.mxu1 %v5401_v5  ;;  %v5239_v41 = vld [vmem:[%s6659_s3 + $0x238] sm:$0xff]  }
 0x166   :  { %4631 = vmatpush3.bf16.msra.mxu0 %v5209_v40  ;;  %4646 = vmatprep.mubr.msk.bf16.mxu0 %vm5402_vm0, %v5401_v5  ;;  %v5238_v40 = vld [vmem:[%s6659_s3 + $0x278] sm:$0xff]  }
 0x167   :  { %4632 = vmatprep.subr.bf16.mxu0 %v5401_v5 }
 0x168   :  { %4653 = vmatpush3.bf16.msra.mxu1 %v5210_v42  ;;  %v1634_v42 = vrot.slane %v5776_v8, 1 }
 0x169   :  { %4654 = vmatprep.subr.bf16.mxu1 %v5401_v5 }
 0x16a   :  { %4633 = vmatpush3.bf16.msra.mxu0 %v5211_v45  ;;  %v5242_v45 = vld [vmem:[%s6659_s3 + $0x2c8] sm:$0xff]  }
 0x16b   :  { %4634 = vmatprep.subr.bf16.mxu0 %v5401_v5 }
 0x16c   :  { %4655 = vmatpush3.bf16.msra.mxu1 %v5212_v52  ;;  %v5249_v52 = vld [vmem:[%s6659_s3 + $0x2a0] sm:$0xff]  }
 0x16d   :  { %4656 = vmatprep.subr.bf16.mxu1 %v5401_v5 }
 0x16e   :  { %4635 = vmatpush3.bf16.msra.mxu0 %v5213_v59  ;;  %v5255_v59 = vld [vmem:[%s6659_s3 + $0x2b8] sm:$0xff]  }
 0x16f   :  { %4636 = vmatprep.subr.bf16.mxu0 %v5401_v5 }
 0x170   :  { %4657 = vmatpush3.bf16.msra.mxu1 %v5214_v62  ;;  %v5257_v62 = vld [vmem:[%s6659_s3 + $0x300] sm:$0xff]  }
 0x171   :  { %4658 = vmatprep.subr.bf16.mxu1 %v5401_v5 }
 0x172   :  { %4637 = vmatpush3.bf16.msra.mxu0 %v5215_v2  ;;  %v5260_v2 = vld [vmem:[%s6659_s3 + $0x350] sm:$0xff]  }
 0x173   :  { %4638 = vmatprep.subr.bf16.mxu0 %v5401_v5 }
 0x174   :  { %4659 = vmatpush3.bf16.msra.mxu1 %v5216_v10  ;;  %v5266_v10 = vld [vmem:[%s6659_s3 + $0x368] sm:$0xff]  }
 0x175   :  { %4660 = vmatprep.subr.bf16.mxu1 %v5401_v5 }
 0x176   :  { %4639 = vmatpush3.bf16.msra.mxu0 %v5217_v15  ;;  %v5271_v15 = vld [vmem:[%s6659_s3 + $0x338] sm:$0xff]  }
 0x177   :  { %4640 = vmatprep.subr.bf16.mxu0 %v5401_v5 }
 0x178   :  { %4661 = vmatpush3.bf16.msra.mxu1 %v5218_v18  ;;  %v2066_v18 = vrot.slane %v5776_v8, 5 }
 0x179   :  { %4662 = vmatprep.subr.bf16.mxu1 %v5401_v5 }
 0x17a   :  { %4641 = vmatpush3.bf16.msra.mxu0 %v5219_v19  ;;  %v5273_v19 = vld [vmem:[%s6659_s3 + $0x380] sm:$0xff]  }
 0x17b   :  { %4642 = vmatprep.subr.bf16.mxu0 %v5401_v5 }
 0x17c   :  { %4663 = vmatpush3.bf16.msra.mxu1 %v5220_v20  ;;  %v1958_v20 = vrot.slane %v5776_v8, 4 }
 0x17d   :  { %4664 = vmatprep.subr.bf16.mxu1 %v5401_v5 }
 0x17e   :  { %4643 = vmatpush3.bf16.msra.mxu0 %v5221_v21  ;;  %v5274_v21 = vld [vmem:[%s6659_s3 + $0x3c8] sm:$0xff]  }
 0x17f   :  { %4644 = vmatprep.subr.bf16.mxu0 %v5401_v5 }
 0x180   :  { %4665 = vmatpush3.bf16.msra.mxu1 %v5222_v22  ;;  %v5275_v22 = vld [vmem:[%s6659_s3 + $0x388] sm:$0xff]  }
 0x181   :  { %4690 = vmatprep.subr.bf16.mxu1 %v5401_v5 }
 0x182   :  { %4645 = vmatpush3.bf16.msra.mxu0 %v5223_v23  ;;  %v5276_v23 = vld [vmem:[%s6659_s3 + $0x3d0] sm:$0xff]  }
 0x183   :  { %4667 = vmatmul.mubr.bf16.vlgmr.msra.gmra.mrb[28].mxu1 %v1419_v25  ;;  %4670 = vmatprep.subr.bf16.mxu0 %v5401_v5  ;;  %v5278_v25 = vld [vmem:[%s6659_s3 + $0x3d8] sm:$0xff]  }
 0x184   :  { %4691 = vmatpush3.bf16.msra.mxu1 %v5224_v24  ;;  %4706 = vmatprep.mubr.msk.bf16.mxu1 %vm5402_vm0, %v5401_v5  ;;  %v5277_v24 = vld [vmem:[%s6659_s3 + $0x390] sm:$0xff]  }
 0x185   :  { %4647 = vmatmul.mubr.bf16.vlgmr.msra.gmra.mrb[28].mxu0 %v1311_v27  ;;  %4692 = vmatprep.subr.bf16.mxu1 %v5401_v5  ;;  %v5280_v27 = vld [vmem:[%s6659_s3 + $0x3e0] sm:$0xff]  }
 0x186   :  { %4671 = vmatpush3.bf16.msra.mxu0 %v5225_v26  ;;  %4686 = vmatprep.mubr.msk.bf16.mxu0 %vm5402_vm0, %v5401_v5  ;;  %v5279_v26 = vld [vmem:[%s6659_s3 + $0x398] sm:$0xff]  }
 0x187   :  { %4672 = vmatprep.subr.bf16.mxu0 %v5401_v5 }
 0x188   :  { %4693 = vmatpush3.bf16.msra.mxu1 %v5226_v28  ;;  %v5281_v28 = vld [vmem:[%s6659_s3 + $0x3a0] sm:$0xff]  }
 0x189   :  { %4694 = vmatprep.subr.bf16.mxu1 %v5401_v5 }
 0x18a   :  { %4673 = vmatpush3.bf16.msra.mxu0 %v5227_v29  ;;  %v5282_v29 = vld [vmem:[%s6659_s3 + $0x3e8] sm:$0xff]  }
 0x18b   :  { %4674 = vmatprep.subr.bf16.mxu0 %v5401_v5 }
 0x18c   :  { %4695 = vmatpush3.bf16.msra.mxu1 %v5228_v56 }
 0x18d   :  { %4696 = vmatprep.subr.bf16.mxu1 %v5401_v5 }
 0x18e   :  { %4675 = vmatpush3.bf16.msra.mxu0 %v5229_v30  ;;  %v5283_v30 = vld [vmem:[%s6659_s3 + $0x3a8] sm:$0xff]  }
 0x18f   :  { %4676 = vmatprep.subr.bf16.mxu0 %v5401_v5 }
 0x190   :  { %4697 = vmatpush3.bf16.msra.mxu1 %v5230_v31 }
 0x191   :  { %4698 = vmatprep.subr.bf16.mxu1 %v5401_v5 }
 0x192   :  { %4677 = vmatpush3.bf16.msra.mxu0 %v5231_v32 }
 0x193   :  { %4678 = vmatprep.subr.bf16.mxu0 %v5401_v5 }
 0x194   :  { %4699 = vmatpush3.bf16.msra.mxu1 %v5232_v33 }
 0x195   :  { %4700 = vmatprep.subr.bf16.mxu1 %v5401_v5 }
 0x196   :  { %4679 = vmatpush3.bf16.msra.mxu0 %v5233_v35  ;;  %v5284_v35 = vld [vmem:[%s6659_s3 + $0x3f0] sm:$0xff]  }
 0x197   :  { %4680 = vmatprep.subr.bf16.mxu0 %v5401_v5 }
 0x198   :  { %4701 = vmatpush3.bf16.msra.mxu1 %v5234_v36 }
 0x199   :  { %4702 = vmatprep.subr.bf16.mxu1 %v5401_v5 }
 0x19a   :  { %4681 = vmatpush3.bf16.msra.mxu0 %v5235_v37 }
 0x19b   :  { %4682 = vmatprep.subr.bf16.mxu0 %v5401_v5 }
 0x19c   :  { %4703 = vmatpush3.bf16.msra.mxu1 %v5236_v38 }
 0x19d   :  { %4704 = vmatprep.subr.bf16.mxu1 %v5401_v5 }
 0x19e   :  { %4683 = vmatpush3.bf16.msra.mxu0 %v5237_v39 }
 0x19f   :  { %4684 = vmatprep.subr.bf16.mxu0 %v5401_v5 }
 0x1a0   :  { %4705 = vmatpush3.bf16.msra.mxu1 %v5238_v40  ;;  %v5285_v40 = vld [vmem:[%s6659_s3 + $0x3b0] sm:$0xff]  }
 0x1a1   :  { %4730 = vmatprep.subr.bf16.mxu1 %v5401_v5 }
 0x1a2   :  { %4685 = vmatpush3.bf16.msra.mxu0 %v5239_v41 }
 0x1a3   :  { %4707 = vmatmul.mubr.bf16.vlgmr.msra.gmra.mrb[32].mxu1 %v1634_v42  ;;  %4710 = vmatprep.subr.bf16.mxu0 %v5401_v5  ;;  %v5286_v42 = vld [vmem:[%s6659_s3 + $0x3f8] sm:$0xff]  }
 0x1a4   :  { %4731 = vmatpush3.bf16.msra.mxu1 %v5240_v43  ;;  %4746 = vmatprep.mubr.msk.bf16.mxu1 %vm5402_vm0, %v5401_v5  ;;  %v5287_v43 = vld [vmem:[%s6659_s3 + $0x3b8] sm:$0xff]  }
 0x1a5   :  { %4687 = vmatmul.mubr.bf16.vlgmr.msra.gmra.mrb[32].mxu0 %v5776_v8  ;;  %4732 = vmatprep.subr.bf16.mxu1 %v5401_v5 }
 0x1a6   :  { %4711 = vmatpush3.bf16.msra.mxu0 %v5241_v44  ;;  %4726 = vmatprep.mubr.msk.bf16.mxu0 %vm5402_vm0, %v5401_v5  ;;  %v5288_v44 = vld [vmem:[%s6659_s3 + $0x440] sm:$0xff]  }
 0x1a7   :  { %4712 = vmatprep.subr.bf16.mxu0 %v5401_v5 }
 0x1a8   :  { %4733 = vmatpush3.bf16.msra.mxu1 %v5242_v45  ;;  %v2282_v45 = vrot.slane %v5776_v8, 7 }
 0x1a9   :  { %4734 = vmatprep.subr.bf16.mxu1 %v5401_v5 }
 0x1aa   :  { %4713 = vmatpush3.bf16.msra.mxu0 %v5243_v46  ;;  %v5289_v46 = vld [vmem:[%s6659_s3 + $0x400] sm:$0xff]  }
 0x1ab   :  { %4714 = vmatprep.subr.bf16.mxu0 %v5401_v5 }
 0x1ac   :  { %4735 = vmatpush3.bf16.msra.mxu1 %v5244_v47  ;;  %v2174_v47 = vrot.slane %v5776_v8, 6  ;;  %v5292_v8 = vld [vmem:[%s6659_s3 + $0x450] sm:$0xff]  }
 0x1ad   :  { %4736 = vmatprep.subr.bf16.mxu1 %v5401_v5 }
 0x1ae   :  { %4715 = vmatpush3.bf16.msra.mxu0 %v5245_v48  ;;  %v5290_v48 = vld [vmem:[%s6659_s3 + $0x448] sm:$0xff]  }
 0x1af   :  { %4716 = vmatprep.subr.bf16.mxu0 %v5401_v5 }
 0x1b0   :  { %4737 = vmatpush3.bf16.msra.mxu1 %v5246_v49  ;;  %v5291_v49 = vld [vmem:[%s6659_s3 + $0x408] sm:$0xff]  }
 0x1b1   :  { %4738 = vmatprep.subr.bf16.mxu1 %v5401_v5 }
 0x1b2   :  { %4717 = vmatpush3.bf16.msra.mxu0 %v5247_v50  ;;  %v5293_v50 = vld [vmem:[%s6659_s3 + $0x410] sm:$0xff]  }
 0x1b3   :  { %4718 = vmatprep.subr.bf16.mxu0 %v5401_v5 }
 0x1b4   :  { %4739 = vmatpush3.bf16.msra.mxu1 %v5248_v51  ;;  %v5294_v51 = vld [vmem:[%s6659_s3 + $0x458] sm:$0xff]  }
 0x1b5   :  { %4740 = vmatprep.subr.bf16.mxu1 %v5401_v5 }
 0x1b6   :  { %4719 = vmatpush3.bf16.msra.mxu0 %v5249_v52  ;;  %v5295_v52 = vld [vmem:[%s6659_s3 + $0x418] sm:$0xff]  }
 0x1b7   :  { %4720 = vmatprep.subr.bf16.mxu0 %v5401_v5 }
 0x1b8   :  { %4741 = vmatpush3.bf16.msra.mxu1 %v5250_v53  ;;  %v5296_v53 = vld [vmem:[%s6659_s3 + $0x460] sm:$0xff]  }
 0x1b9   :  { %4742 = vmatprep.subr.bf16.mxu1 %v5401_v5 }
 0x1ba   :  { %4721 = vmatpush3.bf16.msra.mxu0 %v5251_v54  ;;  %v5297_v54 = vld [vmem:[%s6659_s3 + $0x420] sm:$0xff]  }
 0x1bb   :  { %4722 = vmatprep.subr.bf16.mxu0 %v5401_v5 }
 0x1bc   :  { %4743 = vmatpush3.bf16.msra.mxu1 %v5252_v55  ;;  %v5298_v55 = vld [vmem:[%s6659_s3 + $0x468] sm:$0xff]  }
 0x1bd   :  { %4744 = vmatprep.subr.bf16.mxu1 %v5401_v5 }
 0x1be   :  { %4723 = vmatpush3.bf16.msra.mxu0 %v5253_v57 }
 0x1bf   :  { %4724 = vmatprep.subr.bf16.mxu0 %v5401_v5 }
 0x1c0   :  { %4745 = vmatpush3.bf16.msra.mxu1 %v5254_v58  ;;  %v5299_v58 = vld [vmem:[%s6659_s3 + $0x428] sm:$0xff]  }
 0x1c1   :  { %4770 = vmatprep.subr.bf16.mxu1 %v5401_v5 }
 0x1c2   :  { %4725 = vmatpush3.bf16.msra.mxu0 %v5255_v59 }
 0x1c3   :  { %4747 = vmatmul.mubr.bf16.vlgmr.msra.gmra.mrb[36].mxu1 %v1850_v61  ;;  %4750 = vmatprep.subr.bf16.mxu0 %v5401_v5 }
 0x1c4   :  { %4771 = vmatpush3.bf16.msra.mxu1 %v5256_v60  ;;  %4786 = vmatprep.mubr.msk.bf16.mxu1 %vm5402_vm0, %v5401_v5 }
 0x1c5   :  { %4727 = vmatmul.mubr.bf16.vlgmr.msra.gmra.mrb[36].mxu0 %v1742_v63  ;;  %4772 = vmatprep.subr.bf16.mxu1 %v5401_v5 }
 0x1c6   :  { %4751 = vmatpush3.bf16.msra.mxu0 %v5257_v62  ;;  %4766 = vmatprep.mubr.msk.bf16.mxu0 %vm5402_vm0, %v5401_v5  ;;  %v5300_v62 = vld [vmem:[%s6659_s3 + $0x470] sm:$0xff]  }
 0x1c7   :  { %4752 = vmatprep.subr.bf16.mxu0 %v5401_v5 }
 0x1c8   :  { %4773 = vmatpush3.bf16.msra.mxu1 %v5258_v0 }
 0x1c9   :  { %4774 = vmatprep.subr.bf16.mxu1 %v5401_v5 }
 0x1ca   :  { %4753 = vmatpush3.bf16.msra.mxu0 %v5259_v1 }
 0x1cb   :  { %4754 = vmatprep.subr.bf16.mxu0 %v5401_v5 }
 0x1cc   :  { %4775 = vmatpush3.bf16.msra.mxu1 %v5260_v2 }
 0x1cd   :  { %4776 = vmatprep.subr.bf16.mxu1 %v5401_v5 }
 0x1ce   :  { %4755 = vmatpush3.bf16.msra.mxu0 %v5261_v3  ;;  %v5301_v3 = vld [vmem:[%s6659_s3 + $0x430] sm:$0xff]  }
 0x1cf   :  { %4756 = vmatprep.subr.bf16.mxu0 %v5401_v5 }
 0x1d0   :  { %4777 = vmatpush3.bf16.msra.mxu1 %v5262_v4 }
 0x1d1   :  { %4778 = vmatprep.subr.bf16.mxu1 %v5401_v5 }
 0x1d2   :  { %4757 = vmatpush3.bf16.msra.mxu0 %v5263_v6 }
 0x1d3   :  { %4758 = vmatprep.subr.bf16.mxu0 %v5401_v5 }
 0x1d4   :  { %4779 = vmatpush3.bf16.msra.mxu1 %v5264_v7  ;;  %v5302_v7 = vld [vmem:[%s6659_s3 + $0x478] sm:$0xff]  }
 0x1d5   :  { %4780 = vmatprep.subr.bf16.mxu1 %v5401_v5 }
 0x1d6   :  { %4759 = vmatpush3.bf16.msra.mxu0 %v5265_v9  ;;  %v5303_v9 = vld [vmem:[%s6659_s3 + $0x438] sm:$0xff]  }
 0x1d7   :  { %4760 = vmatprep.subr.bf16.mxu0 %v5401_v5 }
 0x1d8   :  { %4781 = vmatpush3.bf16.msra.mxu1 %v5266_v10  ;;  %v5304_v10 = vld [vmem:[%s6659_s3 + $0x4c0] sm:$0xff]  }
 0x1d9   :  { %4782 = vmatprep.subr.bf16.mxu1 %v5401_v5 }
 0x1da   :  { %4761 = vmatpush3.bf16.msra.mxu0 %v5267_v11  ;;  %v2497_v11 = vrot.slane %v5932_v12, 1 }
 0x1db   :  { %4762 = vmatprep.subr.bf16.mxu0 %v5401_v5 }
 0x1dc   :  { %4783 = vmatpush3.bf16.msra.mxu1 %v5268_v34  ;;  %v5305_v34 = vld [vmem:[%s6659_s3 + $0x480] sm:$0xff]  }
 0x1dd   :  { %4784 = vmatprep.subr.bf16.mxu1 %v5401_v5 }
 0x1de   :  { %4763 = vmatpush3.bf16.msra.mxu0 %v5269_v13  ;;  %v5306_v13 = vld [vmem:[%s6659_s3 + $0x4c8] sm:$0xff]  }
 0x1df   :  { %4764 = vmatprep.subr.bf16.mxu0 %v5401_v5 }
 0x1e0   :  { %4785 = vmatpush3.bf16.msra.mxu1 %v5270_v14  ;;  %v5307_v14 = vld [vmem:[%s6659_s3 + $0x488] sm:$0xff]  }
 0x1e1   :  { %4810 = vmatprep.subr.bf16.mxu1 %v5401_v5 }
 0x1e2   :  { %4765 = vmatpush3.bf16.msra.mxu0 %v5271_v15  ;;  %v5308_v15 = vld [vmem:[%s6659_s3 + $0x4d0] sm:$0xff]  }
 0x1e3   :  { %4787 = vmatmul.mubr.bf16.vlgmr.msra.gmra.mrb[40].mxu1 %v2066_v18  ;;  %4790 = vmatprep.subr.bf16.mxu0 %v5401_v5  ;;  %v5310_v18 = vld [vmem:[%s6659_s3 + $0x4d8] sm:$0xff]  }
 0x1e4   :  { %4811 = vmatpush3.bf16.msra.mxu1 %v5272_v16  ;;  %4826 = vmatprep.mubr.msk.bf16.mxu1 %vm5402_vm0, %v5401_v5  ;;  %v5309_v16 = vld [vmem:[%s6659_s3 + $0x490] sm:$0xff]  }
 0x1e5   :  { %4767 = vmatmul.mubr.bf16.vlgmr.msra.gmra.mrb[40].mxu0 %v1958_v20  ;;  %4812 = vmatprep.subr.bf16.mxu1 %v5401_v5  ;;  %v5312_v20 = vld [vmem:[%s6659_s3 + $0x4e0] sm:$0xff]  }
 0x1e6   :  { %4791 = vmatpush3.bf16.msra.mxu0 %v5273_v19  ;;  %4806 = vmatprep.mubr.msk.bf16.mxu0 %vm5402_vm0, %v5401_v5  ;;  %v5311_v19 = vld [vmem:[%s6659_s3 + $0x498] sm:$0xff]  }
 0x1e7   :  { %4792 = vmatprep.subr.bf16.mxu0 %v5401_v5 }
 0x1e8   :  { %4813 = vmatpush3.bf16.msra.mxu1 %v5274_v21  ;;  %v5313_v21 = vld [vmem:[%s6659_s3 + $0x4a0] sm:$0xff]  }
 0x1e9   :  { %4814 = vmatprep.subr.bf16.mxu1 %v5401_v5 }
 0x1ea   :  { %4793 = vmatpush3.bf16.msra.mxu0 %v5275_v22  ;;  %v5314_v22 = vld [vmem:[%s6659_s3 + $0x4e8] sm:$0xff]  }
 0x1eb   :  { %4794 = vmatprep.subr.bf16.mxu0 %v5401_v5 }
 0x1ec   :  { %4815 = vmatpush3.bf16.msra.mxu1 %v5276_v23 }
 0x1ed   :  { %4816 = vmatprep.subr.bf16.mxu1 %v5401_v5 }
 0x1ee   :  { %4795 = vmatpush3.bf16.msra.mxu0 %v5277_v24  ;;  %v5315_v24 = vld [vmem:[%s6659_s3 + $0x4a8] sm:$0xff]  }
 0x1ef   :  { %4796 = vmatprep.subr.bf16.mxu0 %v5401_v5 }
 0x1f0   :  { %4817 = vmatpush3.bf16.msra.mxu1 %v5278_v25 }
 0x1f1   :  { %4818 = vmatprep.subr.bf16.mxu1 %v5401_v5 }
 0x1f2   :  { %4797 = vmatpush3.bf16.msra.mxu0 %v5279_v26 }
 0x1f3   :  { %4798 = vmatprep.subr.bf16.mxu0 %v5401_v5 }
 0x1f4   :  { %4819 = vmatpush3.bf16.msra.mxu1 %v5280_v27 }
 0x1f5   :  { %4820 = vmatprep.subr.bf16.mxu1 %v5401_v5 }
 0x1f6   :  { %4799 = vmatpush3.bf16.msra.mxu0 %v5281_v28  ;;  %v856_v56 = vpop.f32.mrb[16].mxu1  ;;  %v5316_v28 = vld [vmem:[%s6659_s3 + $0x4f0] sm:$0xff]  }
 0x1f7   :  { %v4548_v31 = vpop.f32.mrb[17].mxu1  ;;  %4800 = vmatprep.subr.bf16.mxu0 %v5401_v5 }
 0x1f8   :  { %4821 = vmatpush3.bf16.msra.mxu1 %v5282_v29  ;;  %v768_v32 = vpop.f32.mrb[16].mxu0  ;;  %v859_v33 = vpop.f32.mrb[18].mxu1 }
 0x1f9   :  { %v6231_v36 = vadd.f32 %v856_v56, %v768_v32  ;;  %v4528_v37 = vpop.f32.mrb[17].mxu0  ;;  %v4549_v38 = vpop.f32.mrb[19].mxu1  ;;  %4822 = vmatprep.subr.bf16.mxu1 %v5401_v5  ;;  %v5317_v32 = vld [vmem:[%s6659_s3 + $0x4b0] sm:$0xff]  }
 0x1fa   :  { %4801 = vmatpush3.bf16.msra.mxu0 %v5283_v30  ;;  %v771_v39 = vpop.f32.mrb[18].mxu0  ;;  %v5319_v37 = vld [vmem:[%s6659_s3 + $0x4b8] sm:$0xff]   ;;  %v5320_v38 = vld [vmem:[%s6659_s3 + $0x540] sm:$0xff]  }
 0x1fb   :  { %v4529_v41 = vpop.f32.mrb[19].mxu0  ;;  %4802 = vmatprep.subr.bf16.mxu0 %v5401_v5  ;;  %v2713_v39 = vrot.slane %v5932_v12, 3 }
 0x1fc   :  { %4823 = vmatpush3.bf16.msra.mxu1 %v5284_v35  ;;  %v2605_v41 = vrot.slane %v5932_v12, 2 }
 0x1fd   :  { %4824 = vmatprep.subr.bf16.mxu1 %v5401_v5 }
 0x1fe   :  { %4803 = vmatpush3.bf16.msra.mxu0 %v5285_v40  ;;  %v5321_v40 = vld [vmem:[%s6659_s3 + $0x500] sm:$0xff]  }
 0x1ff   :  { %4804 = vmatprep.subr.bf16.mxu0 %v5401_v5 }
 0x200   :  { %4825 = vmatpush3.bf16.msra.mxu1 %v5286_v42  ;;  %v5322_v42 = vld [vmem:[%s6659_s3 + $0x548] sm:$0xff]  }
 0x201   :  { %4850 = vmatprep.subr.bf16.mxu1 %v5401_v5 }
 0x202   :  { %4805 = vmatpush3.bf16.msra.mxu0 %v5287_v43  ;;  %v5323_v43 = vld [vmem:[%s6659_s3 + $0x508] sm:$0xff]  }
 0x203   :  { %4827 = vmatmul.mubr.bf16.vlgmr.msra.gmra.mrb[44].mxu1 %v2282_v45  ;;  %4830 = vmatprep.subr.bf16.mxu0 %v5401_v5  ;;  %v5325_v45 = vld [vmem:[%s6659_s3 + $0x510] sm:$0xff]  }
 0x204   :  { %4851 = vmatpush3.bf16.msra.mxu1 %v5288_v44  ;;  %4866 = vmatprep.mubr.msk.bf16.mxu1 %vm5402_vm0, %v5401_v5  ;;  %v5324_v44 = vld [vmem:[%s6659_s3 + $0x550] sm:$0xff]  }
 0x205   :  { %4807 = vmatmul.mubr.bf16.vlgmr.msra.gmra.mrb[44].mxu0 %v2174_v47  ;;  %4852 = vmatprep.subr.bf16.mxu1 %v5401_v5  ;;  %v5327_v47 = vld [vmem:[%s6659_s3 + $0x518] sm:$0xff]  }
 0x206   :  { %4831 = vmatpush3.bf16.msra.mxu0 %v5289_v46  ;;  %4846 = vmatprep.mubr.msk.bf16.mxu0 %vm5402_vm0, %v5401_v5  ;;  %v5326_v46 = vld [vmem:[%s6659_s3 + $0x558] sm:$0xff]  }
 0x207   :  { %4832 = vmatprep.subr.bf16.mxu0 %v5401_v5 }
 0x208   :  { %4853 = vmatpush3.bf16.msra.mxu1 %v5290_v48  ;;  %v5328_v48 = vld [vmem:[%s6659_s3 + $0x560] sm:$0xff]  }
 0x209   :  { %4854 = vmatprep.subr.bf16.mxu1 %v5401_v5 }
 0x20a   :  { %4833 = vmatpush3.bf16.msra.mxu0 %v5291_v49  ;;  %v5329_v49 = vld [vmem:[%s6659_s3 + $0x520] sm:$0xff]  }
 0x20b   :  { %4834 = vmatprep.subr.bf16.mxu0 %v5401_v5 }
 0x20c   :  { %4855 = vmatpush3.bf16.msra.mxu1 %v5292_v8  ;;  %v5330_v8 = vld [vmem:[%s6659_s3 + $0x568] sm:$0xff]  }
 0x20d   :  { %4856 = vmatprep.subr.bf16.mxu1 %v5401_v5 }
 0x20e   :  { %4835 = vmatpush3.bf16.msra.mxu0 %v5293_v50 }
 0x20f   :  { %4836 = vmatprep.subr.bf16.mxu0 %v5401_v5 }
 0x210   :  { %4857 = vmatpush3.bf16.msra.mxu1 %v5294_v51  ;;  %v5331_v51 = vld [vmem:[%s6659_s3 + $0x528] sm:$0xff]  }
 0x211   :  { %4858 = vmatprep.subr.bf16.mxu1 %v5401_v5 }
 0x212   :  { %4837 = vmatpush3.bf16.msra.mxu0 %v5295_v52 }
 0x213   :  { %4838 = vmatprep.subr.bf16.mxu0 %v5401_v5 }
 0x214   :  { %4859 = vmatpush3.bf16.msra.mxu1 %v5296_v53 }
 0x215   :  { %4860 = vmatprep.subr.bf16.mxu1 %v5401_v5 }
 0x216   :  { %v1071_v57 = vpop.f32.mrb[20].mxu1  ;;  %4839 = vmatpush3.bf16.msra.mxu0 %v5297_v54 }
 0x217   :  { %v4588_v59 = vpop.f32.mrb[21].mxu1  ;;  %4840 = vmatprep.subr.bf16.mxu0 %v5401_v5 }
 0x218   :  { %v963_v60 = vpop.f32.mrb[20].mxu0  ;;  %v1074_v61 = vpop.f32.mrb[22].mxu1  ;;  %4861 = vmatpush3.bf16.msra.mxu1 %v5298_v55  ;;  %v5332_v55 = vld [vmem:[%s6659_s3 + $0x570] sm:$0xff]  }
 0x219   :  { %v969_v63 = vadd.f32 %v963_v60, %v6231_v36  ;;  %v4568_v0 = vpop.f32.mrb[21].mxu0  ;;  %v4589_v1 = vpop.f32.mrb[23].mxu1  ;;  %4862 = vmatprep.subr.bf16.mxu1 %v5401_v5  ;;  %v5318_v36 = vld [vmem:[%s6659_s3 + $0x4f8] sm:$0xff]   ;;  %v5333_v61 = vld [vmem:[%s6659_s3 + $0x530] sm:$0xff]  }
 0x21a   :  { %v966_v2 = vpop.f32.mrb[22].mxu0  ;;  %4841 = vmatpush3.bf16.msra.mxu0 %v5299_v58  ;;  %v5334_v0 = vld [vmem:[%s6659_s3 + $0x578] sm:$0xff]  }
 0x21b   :  { %v4569_v4 = vpop.f32.mrb[23].mxu0  ;;  %4842 = vmatprep.subr.bf16.mxu0 %v5401_v5  ;;  %v1077_v6 = vadd.f32 %v1071_v57, %v969_v63  ;;  %v5335_v1 = vld [vmem:[%s6659_s3 + $0x538] sm:$0xff]   ;;  %v5336_v2 = vld [vmem:[%s6659_s3 + $0x5c0] sm:$0xff]  }
 0x21c   :  { %4863 = vmatpush3.bf16.msra.mxu1 %v5300_v62  ;;  %v5337_v4 = vld [vmem:[%s6659_s3 + $0x580] sm:$0xff]  }
 0x21d   :  { %4864 = vmatprep.subr.bf16.mxu1 %v5401_v5 }
 0x21e   :  { %4843 = vmatpush3.bf16.msra.mxu0 %v5301_v3  ;;  %v2929_v3 = vrot.slane %v5932_v12, 5 }
 0x21f   :  { %4844 = vmatprep.subr.bf16.mxu0 %v5401_v5 }
 0x220   :  { %4865 = vmatpush3.bf16.msra.mxu1 %v5302_v7  ;;  %v5338_v7 = vld [vmem:[%s6659_s3 + $0x5c8] sm:$0xff]  }
 0x221   :  { %4890 = vmatprep.subr.bf16.mxu1 %v5401_v5 }
 0x222   :  { %4845 = vmatpush3.bf16.msra.mxu0 %v5303_v9  ;;  %v5339_v9 = vld [vmem:[%s6659_s3 + $0x588] sm:$0xff]  }
 0x223   :  { %4867 = vmatmul.mubr.bf16.vlgmr.msra.gmra.mrb[48].mxu1 %v2497_v11  ;;  %4870 = vmatprep.subr.bf16.mxu0 %v5401_v5  ;;  %v5341_v11 = vld [vmem:[%s6659_s3 + $0x590] sm:$0xff]  }
 0x224   :  { %4891 = vmatpush3.bf16.msra.mxu1 %v5304_v10  ;;  %4906 = vmatprep.mubr.msk.bf16.mxu1 %vm5402_vm0, %v5401_v5  ;;  %v5340_v10 = vld [vmem:[%s6659_s3 + $0x5d0] sm:$0xff]  }
 0x225   :  { %4847 = vmatmul.mubr.bf16.vlgmr.msra.gmra.mrb[48].mxu0 %v5932_v12  ;;  %4892 = vmatprep.subr.bf16.mxu1 %v5401_v5 }
 0x226   :  { %4871 = vmatpush3.bf16.msra.mxu0 %v5305_v34  ;;  %4886 = vmatprep.mubr.msk.bf16.mxu0 %vm5402_vm0, %v5401_v5  ;;  %v5342_v34 = vld [vmem:[%s6659_s3 + $0x5d8] sm:$0xff]  }
 0x227   :  { %4872 = vmatprep.subr.bf16.mxu0 %v5401_v5 }
 0x228   :  { %4893 = vmatpush3.bf16.msra.mxu1 %v5306_v13  ;;  %v5343_v13 = vld [vmem:[%s6659_s3 + $0x598] sm:$0xff]  }
 0x229   :  { %4894 = vmatprep.subr.bf16.mxu1 %v5401_v5 }
 0x22a   :  { %4873 = vmatpush3.bf16.msra.mxu0 %v5307_v14  ;;  %v5344_v14 = vld [vmem:[%s6659_s3 + $0x5e0] sm:$0xff]  }
 0x22b   :  { %4874 = vmatprep.subr.bf16.mxu0 %v5401_v5 }
 0x22c   :  { %4895 = vmatpush3.bf16.msra.mxu1 %v5308_v15  ;;  %v5345_v15 = vld [vmem:[%s6659_s3 + $0x5a0] sm:$0xff]  }
 0x22d   :  { %4896 = vmatprep.subr.bf16.mxu1 %v5401_v5 }
 0x22e   :  { %4875 = vmatpush3.bf16.msra.mxu0 %v5309_v16  ;;  %v5346_v16 = vld [vmem:[%s6659_s3 + $0x5e8] sm:$0xff]  }
 0x22f   :  { %4876 = vmatprep.subr.bf16.mxu0 %v5401_v5 }
 0x230   :  { %4897 = vmatpush3.bf16.msra.mxu1 %v5310_v18 }
 0x231   :  { %4898 = vmatprep.subr.bf16.mxu1 %v5401_v5 }
 0x232   :  { %4877 = vmatpush3.bf16.msra.mxu0 %v5311_v19  ;;  %v5347_v19 = vld [vmem:[%s6659_s3 + $0x5a8] sm:$0xff]  }
 0x233   :  { %4878 = vmatprep.subr.bf16.mxu0 %v5401_v5 }
 0x234   :  { %4899 = vmatpush3.bf16.msra.mxu1 %v5312_v20 }
 0x235   :  { %4900 = vmatprep.subr.bf16.mxu1 %v5401_v5 }
 0x236   :  { %v1287_v23 = vpop.f32.mrb[24].mxu1  ;;  %4879 = vmatpush3.bf16.msra.mxu0 %v5313_v21 }
 0x237   :  { %v4628_v25 = vpop.f32.mrb[25].mxu1  ;;  %4880 = vmatprep.subr.bf16.mxu0 %v5401_v5 }
 0x238   :  { %v1179_v26 = vpop.f32.mrb[24].mxu0  ;;  %v1290_v27 = vpop.f32.mrb[26].mxu1  ;;  %4901 = vmatpush3.bf16.msra.mxu1 %v5314_v22 }
 0x239   :  { %v1185_v29 = vadd.f32 %v1179_v26, %v1077_v6  ;;  %v4608_v56 = vpop.f32.mrb[25].mxu0  ;;  %v4629_v30 = vpop.f32.mrb[27].mxu1  ;;  %4902 = vmatprep.subr.bf16.mxu1 %v5401_v5  ;;  %v2821_v6 = vrot.slane %v5932_v12, 4 }
 0x23a   :  { %v1182_v31 = vpop.f32.mrb[26].mxu0  ;;  %4881 = vmatpush3.bf16.msra.mxu0 %v5315_v24  ;;  %v5350_v30 = vld [vmem:[%s6659_s3 + $0x5f8] sm:$0xff]  }
 0x23b   :  { %v4609_v33 = vpop.f32.mrb[27].mxu0  ;;  %4882 = vmatprep.subr.bf16.mxu0 %v5401_v5  ;;  %v1293_v35 = vadd.f32 %v1287_v23, %v1185_v29  ;;  %v5348_v23 = vld [vmem:[%s6659_s3 + $0x5f0] sm:$0xff]   ;;  %v5351_v31 = vld [vmem:[%s6659_s3 + $0x5b8] sm:$0xff]  }
 0x23c   :  { %4903 = vmatpush3.bf16.msra.mxu1 %v5316_v28  ;;  %v5349_v28 = vld [vmem:[%s6659_s3 + $0x5b0] sm:$0xff]   ;;  %v5352_v33 = vld [vmem:[%s6659_s3 + $0x600] sm:$0xff]  }
 0x23d   :  { %4904 = vmatprep.subr.bf16.mxu1 %v5401_v5 }
 0x23e   :  { %4883 = vmatpush3.bf16.msra.mxu0 %v5317_v32  ;;  %v3145_v32 = vrot.slane %v5932_v12, 7 }
 0x23f   :  { %4884 = vmatprep.subr.bf16.mxu0 %v5401_v5 }
 0x240   :  { %4905 = vmatpush3.bf16.msra.mxu1 %v5318_v36  ;;  %v5353_v36 = vld [vmem:[%s6659_s3 + $0x608] sm:$0xff]  }
 0x241   :  { %4930 = vmatprep.subr.bf16.mxu1 %v5401_v5 }
 0x242   :  { %4885 = vmatpush3.bf16.msra.mxu0 %v5319_v37  ;;  %v5355_v37 = vld [vmem:[%s6659_s3 + $0x618] sm:$0xff]  }
 0x243   :  { %4907 = vmatmul.mubr.bf16.vlgmr.msra.gmra.mrb[52].mxu1 %v2713_v39  ;;  %4910 = vmatprep.subr.bf16.mxu0 %v5401_v5 }
 0x244   :  { %4931 = vmatpush3.bf16.msra.mxu1 %v5320_v38  ;;  %4946 = vmatprep.mubr.msk.bf16.mxu1 %vm5402_vm0, %v5401_v5  ;;  %v5356_v38 = vld [vmem:[%s6659_s3 + $0x620] sm:$0xff]  }
 0x245   :  { %4887 = vmatmul.mubr.bf16.vlgmr.msra.gmra.mrb[52].mxu0 %v2605_v41  ;;  %4932 = vmatprep.subr.bf16.mxu1 %v5401_v5 }
 0x246   :  { %4911 = vmatpush3.bf16.msra.mxu0 %v5321_v40  ;;  %4926 = vmatprep.mubr.msk.bf16.mxu0 %vm5402_vm0, %v5401_v5  ;;  %v5357_v40 = vld [vmem:[%s6659_s3 + $0x628] sm:$0xff]  }
 0x247   :  { %4912 = vmatprep.subr.bf16.mxu0 %v5401_v5 }
 0x248   :  { %4933 = vmatpush3.bf16.msra.mxu1 %v5322_v42 }
 0x249   :  { %4934 = vmatprep.subr.bf16.mxu1 %v5401_v5 }
 0x24a   :  { %4913 = vmatpush3.bf16.msra.mxu0 %v5323_v43 }
 0x24b   :  { %4914 = vmatprep.subr.bf16.mxu0 %v5401_v5 }
 0x24c   :  { %4935 = vmatpush3.bf16.msra.mxu1 %v5324_v44 }
 0x24d   :  { %4936 = vmatprep.subr.bf16.mxu1 %v5401_v5 }
 0x24e   :  { %4915 = vmatpush3.bf16.msra.mxu0 %v5325_v45 }
 0x24f   :  { %4916 = vmatprep.subr.bf16.mxu0 %v5401_v5 }
 0x250   :  { %4937 = vmatpush3.bf16.msra.mxu1 %v5326_v46 }
 0x251   :  { %4938 = vmatprep.subr.bf16.mxu1 %v5401_v5 }
 0x252   :  { %4917 = vmatpush3.bf16.msra.mxu0 %v5327_v47 }
 0x253   :  { %4918 = vmatprep.subr.bf16.mxu0 %v5401_v5 }
 0x254   :  { %4939 = vmatpush3.bf16.msra.mxu1 %v5328_v48  ;;  %v5358_v48 = vld [vmem:[%s6659_s3 + $0x630] sm:$0xff]  }
 0x255   :  { %4940 = vmatprep.subr.bf16.mxu1 %v5401_v5 }
 0x256   :  { %v1503_v50 = vpop.f32.mrb[28].mxu1  ;;  %4919 = vmatpush3.bf16.msra.mxu0 %v5329_v49  ;;  %v5376_v49 = vld [vmem:[%s6658_s2] ss:$0 sm:$0xff] }
 0x257   :  { %v4668_v52 = vpop.f32.mrb[29].mxu1  ;;  %4920 = vmatprep.subr.bf16.mxu0 %v5401_v5 }
 0x258   :  { %v1395_v53 = vpop.f32.mrb[28].mxu0  ;;  %v1506_v54 = vpop.f32.mrb[30].mxu1  ;;  %4941 = vmatpush3.bf16.msra.mxu1 %v5330_v8  ;;  %v638_v8 = vadd.f32 %v5376_v49, %v5938_v17  ;;  %v5359_v52 = vld [vmem:[%s6659_s3 + $0x638] sm:$0xff]  }
 0x259   :  { %v1401_v57 = vadd.f32 %v1395_v53, %v1293_v35  ;;  %v4648_v58 = vpop.f32.mrb[29].mxu0  ;;  %v4669_v59 = vpop.f32.mrb[31].mxu1  ;;  %4942 = vmatprep.subr.bf16.mxu1 %v5401_v5  ;;  %v3037_v35 = vrot.slane %v5932_v12, 6  ;;  %v5354_v12 = vld [vmem:[%s6659_s3 + $0x610] sm:$0xff]  }
 0x25a   :  { %v1398_v60 = vpop.f32.mrb[30].mxu0  ;;  %4921 = vmatpush3.bf16.msra.mxu0 %v5331_v51  ;;  %v645_v53 = vmax.f32 %v638_v8, 0.0 }
 0x25b   :  { %v4649_v62 = vpop.f32.mrb[31].mxu0  ;;  %4922 = vmatprep.subr.bf16.mxu0 %v5401_v5  ;;  %v1509_v63 = vadd.f32 %v1503_v50, %v1401_v57 }
 0x25c   :  { %4943 = vmatpush3.bf16.msra.mxu1 %v5332_v55  ;;  %v649_v54 = vpack.c.bf16 %v645_v53, %v645_v53 }
 0x25d   :  { %4944 = vmatprep.subr.bf16.mxu1 %v5401_v5 }
 0x25e   :  { %4923 = vmatpush3.bf16.msra.mxu0 %v5333_v61 }
 0x25f   :  { %4924 = vmatprep.subr.bf16.mxu0 %v5401_v5 }
 0x260   :  { %4945 = vmatpush3.bf16.msra.mxu1 %v5334_v0 }
 0x261   :  { %4970 = vmatprep.subr.bf16.mxu1 %v5401_v5 }
 0x262   :  { %4925 = vmatpush3.bf16.msra.mxu0 %v5335_v1 }
 0x263   :  { %4947 = vmatmul.mubr.bf16.vlgmr.msra.gmra.mrb[56].mxu1 %v2929_v3  ;;  %4950 = vmatprep.subr.bf16.mxu0 %v5401_v5 }
 0x264   :  { %4971 = vmatpush3.bf16.msra.mxu1 %v5336_v2  ;;  %4986 = vmatprep.mubr.msk.bf16.mxu1 %vm5402_vm0, %v5401_v5 }
 0x265   :  { %4927 = vmatmul.mubr.bf16.vlgmr.msra.gmra.mrb[56].mxu0 %v2821_v6  ;;  %4972 = vmatprep.subr.bf16.mxu1 %v5401_v5 }
 0x266   :  { %4951 = vmatpush3.bf16.msra.mxu0 %v5337_v4  ;;  %4966 = vmatprep.mubr.msk.bf16.mxu0 %vm5402_vm0, %v5401_v5 }
 0x267   :  { %4952 = vmatprep.subr.bf16.mxu0 %v5401_v5 }
 0x268   :  { %4973 = vmatpush3.bf16.msra.mxu1 %v5338_v7 }
 0x269   :  { %4974 = vmatprep.subr.bf16.mxu1 %v5401_v5 }
 0x26a   :  { %4953 = vmatpush3.bf16.msra.mxu0 %v5339_v9 }
 0x26b   :  { %4954 = vmatprep.subr.bf16.mxu0 %v5401_v5 }
 0x26c   :  { %4975 = vmatpush3.bf16.msra.mxu1 %v5340_v10 }
 0x26d   :  { %4976 = vmatprep.subr.bf16.mxu1 %v5401_v5 }
 0x26e   :  { %4955 = vmatpush3.bf16.msra.mxu0 %v5341_v11 }
 0x26f   :  { %4956 = vmatprep.subr.bf16.mxu0 %v5401_v5 }
 0x270   :  { %4977 = vmatpush3.bf16.msra.mxu1 %v5342_v34 }
 0x271   :  { %4978 = vmatprep.subr.bf16.mxu1 %v5401_v5 }
 0x272   :  { %4957 = vmatpush3.bf16.msra.mxu0 %v5343_v13  ;;  %v5360_v13 = vld [vmem:[%s6661_s5] sm:$0xff]  }
 0x273   :  { %4958 = vmatprep.subr.bf16.mxu0 %v5401_v5 }
 0x274   :  { %4979 = vmatpush3.bf16.msra.mxu1 %v5344_v14  ;;  %v5361_v14 = vld [vmem:[%s6661_s5 + $0x8] sm:$0xff]  }
 0x275   :  { %4980 = vmatprep.subr.bf16.mxu1 %v5401_v5 }
 0x276   :  { %v1718_v18 = vpop.f32.mrb[32].mxu1  ;;  %4959 = vmatpush3.bf16.msra.mxu0 %v5345_v15  ;;  %v5362_v15 = vld [vmem:[%s6661_s5 + $0x10] sm:$0xff]  }
 0x277   :  { %v4708_v20 = vpop.f32.mrb[33].mxu1  ;;  %4960 = vmatprep.subr.bf16.mxu0 %v5401_v5 }
 0x278   :  { %v1609_v21 = vpop.f32.mrb[32].mxu0  ;;  %v1721_v22 = vpop.f32.mrb[34].mxu1  ;;  %4981 = vmatpush3.bf16.msra.mxu1 %v5346_v16  ;;  %v5363_v16 = vld [vmem:[%s6661_s5 + $0x18] sm:$0xff]  }
 0x279   :  { %v1615_v24 = vadd.f32 %v1609_v21, %v1509_v63  ;;  %v4688_v25 = vpop.f32.mrb[33].mxu0  ;;  %v4709_v26 = vpop.f32.mrb[35].mxu1  ;;  %4982 = vmatprep.subr.bf16.mxu1 %v5401_v5 }
 0x27a   :  { %v1612_v27 = vpop.f32.mrb[34].mxu0  ;;  %4961 = vmatpush3.bf16.msra.mxu0 %v5347_v19  ;;  %v5365_v19 = vld [vmem:[%s6661_s5 + $0x28] sm:$0xff]  }
 0x27b   :  { %v4689_v29 = vpop.f32.mrb[35].mxu0  ;;  %4962 = vmatprep.subr.bf16.mxu0 %v5401_v5  ;;  %v1724_v56 = vadd.f32 %v1718_v18, %v1615_v24  ;;  %v5364_v18 = vld [vmem:[%s6661_s5 + $0x20] sm:$0xff]   ;;  %v5366_v24 = vld [vmem:[%s6661_s5 + $0x30] sm:$0xff]  }
 0x27c   :  { %4983 = vmatpush3.bf16.msra.mxu1 %v5348_v23 }
 0x27d   :  { %4984 = vmatprep.subr.bf16.mxu1 %v5401_v5 }
 0x27e   :  { %4963 = vmatpush3.bf16.msra.mxu0 %v5349_v28 }
 0x27f   :  { %4964 = vmatprep.subr.bf16.mxu0 %v5401_v5 }
 0x280   :  { %4985 = vmatpush3.bf16.msra.mxu1 %v5350_v30  ;;  %v5367_v30 = vld [vmem:[%s6661_s5 + $0x38] sm:$0xff]  }
 0x281   :  { %5010 = vmatprep.subr.bf16.mxu1 %v5401_v5 }
 0x282   :  { %4965 = vmatpush3.bf16.msra.mxu0 %v5351_v31  ;;  %v5368_v31 = vld [vmem:[%s6663_s7] sm:$0xff]  }
 0x283   :  { %4987 = vmatmul.mubr.bf16.vlgmr.msra.gmra.mrb[60].mxu1 %v3145_v32  ;;  %4990 = vmatprep.subr.bf16.mxu0 %v5401_v5  ;;  %v5369_v32 = vld [vmem:[%s6663_s7 + $0x8] sm:$0xff]  }
 0x284   :  { %5026 = vmatprep.mubr.msk.bf16.mxu1 %vm5402_vm0, %v5401_v5  ;;  %5011 = vmatpush3.bf16.msra.mxu1 %v5360_v13  ;;  %v5374_v13 = vld [vmem:[%s6663_s7 + $0x30] sm:$0xff]  }
 0x285   :  { %4967 = vmatmul.mubr.bf16.vlgmr.msra.gmra.mrb[60].mxu0 %v3037_v35  ;;  %5012 = vmatprep.subr.bf16.mxu1 %v5401_v5  ;;  %v5371_v35 = vld [vmem:[%s6663_s7 + $0x18] sm:$0xff]  }
 0x286   :  { %4991 = vmatpush3.bf16.msra.mxu0 %v5352_v33  ;;  %5006 = vmatprep.mubr.msk.bf16.mxu0 %vm5402_vm0, %v5401_v5  ;;  %v5370_v33 = vld [vmem:[%s6663_s7 + $0x10] sm:$0xff]  }
 0x287   :  { %4992 = vmatprep.subr.bf16.mxu0 %v5401_v5 }
 0x288   :  { %5013 = vmatpush3.bf16.msra.mxu1 %v5361_v14  ;;  %v5375_v14 = vld [vmem:[%s6663_s7 + $0x38] sm:$0xff]  }
 0x289   :  { %5014 = vmatprep.subr.bf16.mxu1 %v5401_v5 }
 0x28a   :  { %4993 = vmatpush3.bf16.msra.mxu0 %v5353_v36  ;;  %v5372_v36 = vld [vmem:[%s6663_s7 + $0x20] sm:$0xff]  }
 0x28b   :  { %4994 = vmatprep.subr.bf16.mxu0 %v5401_v5 }
 0x28c   :  { %5015 = vmatpush3.bf16.msra.mxu1 %v5362_v15  ;;  %v4249_v15 = vld [vmem:[%s6662_s6] ss:$0 sm:$0xff]  ;;  %s5377_s6 = scalar_lea.vmem %s3584_s25, 32 }
 0x28d   :  { %5016 = vmatprep.subr.bf16.mxu1 %v5401_v5  ;;  %p5378_p0 = scmp.ne.s32.totalorder %s3584_s25, %s5377_s6  ;;  %p5383_p2 = scmp.lt.s32.totalorder %s5377_s6, %s5377_s6 }
 0x28e   :  { %4995 = vmatpush3.bf16.msra.mxu0 %v5354_v12  ;;  %v5373_v12 = vld [vmem:[%s6663_s7 + $0x28] sm:$0xff]  }
 0x28f   :  { %4996 = vmatprep.subr.bf16.mxu0 %v5401_v5  ;;  %p5384_p3 = por %p5383_p2, %p5382_p1 }
 0x290   :  { %5017 = vmatpush3.bf16.msra.mxu1 %v5363_v16 }
 0x291   :  { %5018 = vmatprep.subr.bf16.mxu1 %v5401_v5  ;;  %p5385_p4 = pnand %p5384_p3, %p5378_p0 }
 0x292   :  { %4997 = vmatpush3.bf16.msra.mxu0 %v5355_v37 }
 0x293   :  { %4998 = vmatprep.subr.bf16.mxu0 %v5401_v5 }
 0x294   :  { %5019 = vmatpush3.bf16.msra.mxu1 %v5364_v18 }
 0x295   :  { %5020 = vmatprep.subr.bf16.mxu1 %v5401_v5 }
 0x296   :  { %v1934_v39 = vpop.f32.mrb[36].mxu1  ;;  %4999 = vmatpush3.bf16.msra.mxu0 %v5356_v38 }
 0x297   :  { %v4748_v41 = vpop.f32.mrb[37].mxu1  ;;  %5000 = vmatprep.subr.bf16.mxu0 %v5401_v5 }
 0x298   :  { %v1826_v42 = vpop.f32.mrb[36].mxu0  ;;  %v1937_v43 = vpop.f32.mrb[38].mxu1  ;;  %5021 = vmatpush3.bf16.msra.mxu1 %v5365_v19 }
 0x299   :  { %v1832_v44 = vadd.f32 %v1826_v42, %v1724_v56  ;;  %v4728_v45 = vpop.f32.mrb[37].mxu0  ;;  %v4749_v46 = vpop.f32.mrb[39].mxu1  ;;  %5022 = vmatprep.subr.bf16.mxu1 %v5401_v5 }
 0x29a   :  { %v1829_v47 = vpop.f32.mrb[38].mxu0  ;;  %5001 = vmatpush3.bf16.msra.mxu0 %v5357_v40 }
 0x29b   :  { %v4729_v50 = vpop.f32.mrb[39].mxu0  ;;  %5002 = vmatprep.subr.bf16.mxu0 %v5401_v5  ;;  %v1940_v51 = vadd.f32 %v1934_v39, %v1832_v44 }
 0x29c   :  { %5023 = vmatpush3.bf16.msra.mxu1 %v5366_v24 }
 0x29d   :  { %5024 = vmatprep.subr.bf16.mxu1 %v5401_v5 }
 0x29e   :  { %5003 = vmatpush3.bf16.msra.mxu0 %v5358_v48 }
 0x29f   :  { %5004 = vmatprep.subr.bf16.mxu0 %v5401_v5 }
 0x2a0   :  { %5025 = vmatpush3.bf16.msra.mxu1 %v5367_v30 }
 0x2a2   :  { %5005 = vmatpush3.bf16.msra.mxu0 %v5359_v52 }
 0x2a3   :  { %5030 = vmatprep.subr.bf16.mxu0 %v5401_v5 }
 0x2a5   :  { %5007 = vmatmul.mubr.bf16.vlgmr.msra.gmra.mrb[64].mxu0 %v649_v54 }
 0x2a6   :  { %5046 = vmatprep.mubr.msk.bf16.mxu0 %vm5402_vm0, %v5401_v5  ;;  %5031 = vmatpush3.bf16.msra.mxu0 %v5368_v31 }
 0x2a7   :  { %5032 = vmatprep.subr.bf16.mxu0 %v5401_v5 }
 0x2aa   :  { %5033 = vmatpush3.bf16.msra.mxu0 %v5369_v32 }
 0x2ab   :  { %5034 = vmatprep.subr.bf16.mxu0 %v5401_v5 }
 0x2ae   :  { %5035 = vmatpush3.bf16.msra.mxu0 %v5370_v33 }
 0x2af   :  { %5036 = vmatprep.subr.bf16.mxu0 %v5401_v5 }
 0x2b2   :  { %5037 = vmatpush3.bf16.msra.mxu0 %v5371_v35 }
 0x2b3   :  { %5038 = vmatprep.subr.bf16.mxu0 %v5401_v5 }
 0x2b6   :  { %v2150_v17 = vpop.f32.mrb[40].mxu1  ;;  %5039 = vmatpush3.bf16.msra.mxu0 %v5372_v36 }
 0x2b7   :  { %v4788_v55 = vpop.f32.mrb[41].mxu1  ;;  %5040 = vmatprep.subr.bf16.mxu0 %v5401_v5 }
 0x2b8   :  { %v2042_v57 = vpop.f32.mrb[40].mxu0  ;;  %v2153_v58 = vpop.f32.mrb[42].mxu1 }
 0x2b9   :  { %v2048_v59 = vadd.f32 %v2042_v57, %v1940_v51  ;;  %v4768_v60 = vpop.f32.mrb[41].mxu0  ;;  %v4789_v61 = vpop.f32.mrb[43].mxu1 }
 0x2ba   :  { %v2045_v62 = vpop.f32.mrb[42].mxu0  ;;  %5041 = vmatpush3.bf16.msra.mxu0 %v5373_v12 }
 0x2bb   :  { %v4769_v63 = vpop.f32.mrb[43].mxu0  ;;  %v2156_v0 = vadd.f32 %v2150_v17, %v2048_v59  ;;  %5042 = vmatprep.subr.bf16.mxu0 %v5401_v5 }
 0x2be   :  { %5043 = vmatpush3.bf16.msra.mxu0 %v5374_v13 }
 0x2bf   :  { %5044 = vmatprep.subr.bf16.mxu0 %v5401_v5  ;;  %v4258_v5 = vld [vmem:[%s6664_s8] ss:$0 sm:$0xff] }
 0x2c2   :  { %5045 = vmatpush3.bf16.msra.mxu0 %v5375_v14 }
 0x2d6   :  { %v2366_v1 = vpop.f32.mrb[44].mxu1 }
 0x2d7   :  { %v4828_v2 = vpop.f32.mrb[45].mxu1 }
 0x2d8   :  { %v2258_v3 = vpop.f32.mrb[44].mxu0  ;;  %v2369_v4 = vpop.f32.mrb[46].mxu1 }
 0x2d9   :  { %v2264_v6 = vadd.f32 %v2258_v3, %v2156_v0  ;;  %v4808_v7 = vpop.f32.mrb[45].mxu0  ;;  %v4829_v9 = vpop.f32.mrb[47].mxu1  ;;  %v4248_v3 = vld [vmem:[%s6660_s4] ss:$0 sm:$0xff] }
 0x2da   :  { %v2261_v10 = vpop.f32.mrb[46].mxu0 }
 0x2db   :  { %v4809_v11 = vpop.f32.mrb[47].mxu0  ;;  %v2372_v34 = vadd.f32 %v2366_v1, %v2264_v6 }
 0x2f6   :  { %v2581_v20 = vpop.f32.mrb[48].mxu1 }
 0x2f7   :  { %v4868_v21 = vpop.f32.mrb[49].mxu1 }
 0x2f8   :  { %v2472_v22 = vpop.f32.mrb[48].mxu0  ;;  %v2584_v23 = vpop.f32.mrb[50].mxu1 }
 0x2f9   :  { %v2478_v25 = vadd.f32 %v2472_v22, %v2372_v34  ;;  %v4848_v26 = vpop.f32.mrb[49].mxu0  ;;  %v4869_v27 = vpop.f32.mrb[51].mxu1 }
 0x2fa   :  { %v2475_v28 = vpop.f32.mrb[50].mxu0 }
 0x2fb   :  { %v4849_v29 = vpop.f32.mrb[51].mxu0  ;;  %v2587_v56 = vadd.f32 %v2581_v20, %v2478_v25 }
 0x316   :  { %v2797_v37 = vpop.f32.mrb[52].mxu1 }
 0x317   :  { %v4908_v38 = vpop.f32.mrb[53].mxu1 }
 0x318   :  { %v2689_v39 = vpop.f32.mrb[52].mxu0  ;;  %v2800_v40 = vpop.f32.mrb[54].mxu1 }
 0x319   :  { %v2695_v41 = vadd.f32 %v2689_v39, %v2587_v56  ;;  %v4888_v42 = vpop.f32.mrb[53].mxu0  ;;  %v4909_v43 = vpop.f32.mrb[55].mxu1 }
 0x31a   :  { %v2692_v44 = vpop.f32.mrb[54].mxu0 }
 0x31b   :  { %v4889_v45 = vpop.f32.mrb[55].mxu0  ;;  %v2803_v46 = vadd.f32 %v2797_v37, %v2695_v41 }
 0x336   :  { %v3013_v47 = vpop.f32.mrb[56].mxu1 }
 0x337   :  { %v4948_v48 = vpop.f32.mrb[57].mxu1 }
 0x338   :  { %v2905_v49 = vpop.f32.mrb[56].mxu0  ;;  %v3016_v8 = vpop.f32.mrb[58].mxu1 }
 0x339   :  { %v2911_v50 = vadd.f32 %v2905_v49, %v2803_v46  ;;  %v4928_v51 = vpop.f32.mrb[57].mxu0  ;;  %v4949_v52 = vpop.f32.mrb[59].mxu1 }
 0x33a   :  { %v2908_v53 = vpop.f32.mrb[58].mxu0 }
 0x33b   :  { %v4929_v54 = vpop.f32.mrb[59].mxu0  ;;  %v3019_v17 = vadd.f32 %v3013_v47, %v2911_v50 }
 0x356   :  { %v3229_v55 = vpop.f32.mrb[60].mxu1 }
 0x357   :  { %v4988_v57 = vpop.f32.mrb[61].mxu1 }
 0x358   :  { %v3121_v58 = vpop.f32.mrb[60].mxu0  ;;  %v3232_v59 = vpop.f32.mrb[62].mxu1 }
 0x359   :  { %v3127_v60 = vadd.f32 %v3121_v58, %v3019_v17  ;;  %v4968_v61 = vpop.f32.mrb[61].mxu0  ;;  %v4989_v62 = vpop.f32.mrb[63].mxu1 }
 0x35a   :  { %v3124_v63 = vpop.f32.mrb[62].mxu0 }
 0x35b   :  { %v4969_v0 = vpop.f32.mrb[63].mxu0  ;;  %v3235_v1 = vadd.f32 %v3229_v55, %v3127_v60 }
 0x378   :  { %v3335_v2 = vpop.f32.mrb[64].mxu0 }
 0x379   :  { %v3341_v4 = vadd.f32 %v3335_v2, %v3235_v1  ;;  %v5008_v6 = vpop.f32.mrb[65].mxu0 }
 0x37a   :  { %v3338_v7 = vpop.f32.mrb[66].mxu0 }
 0x37b   :  { %v3349_v9 = vadd.f32 %v4248_v3, %v3341_v4  ;;  %v5009_v10 = vpop.f32.mrb[67].mxu0 }
 0x37d   :  { %v3350_v11 = vmax.f32 %v3349_v9, 0.0 }
 0x37f   :  { %v3351_v34 = vpack.c.bf16 %v3350_v11, %v3350_v11 }
 0x381   :  { %5027 = vmatmul.mubr.bf16.vlgmr.msra.gmra.mrb[64].mxu1 %v3351_v34 }
 0x454   :  { %v3457_v16 = vpop.f32.mrb[64].mxu1 }
 0x455   :  { %v3458_v18 = vadd.f32 %v4249_v15, %v3457_v16  ;;  %v5028_v19 = vpop.f32.mrb[65].mxu1 }
 0x456   :  { %v3460_v20 = vpop.f32.mrb[66].mxu1 }
 0x457   :  { %v3463_v21 = vmax.f32 %v3458_v18, 0.0  ;;  %v5029_v22 = vpop.f32.mrb[67].mxu1 }
 0x459   :  { %v3464_v23 = vpack.c.bf16 %v3463_v21, %v3463_v21 }
 0x45b   :  { %5047 = vmatmul.mubr.bf16.vlgmr.msra.gmra.mrb[68].mxu0 %v3464_v23 }
 0x52e   :  { %v3570_v24 = vpop.f32.mrb[68].mxu0 }
 0x52f   :  { %v3571_v25 = vadd.f32 %v4258_v5, %v3570_v24  ;;  %v5048_v26 = vpop.f32.mrb[69].mxu0 }
 0x530   :  { %v3573_v27 = vpop.f32.mrb[70].mxu0 }
 0x531   :  { %3576 = vst [vmem:[#allocation2] sm:$0x3] %v3571_v25  ;;  %v5049_v28 = vpop.f32.mrb[71].mxu0 }
 0x532   :  { %5388 = shalt.err (!%p5385_p4)
}
 0x533   :  { %s5389_s8 = scalar_lea.hbm %s6665_s9, 32 }
 0x534   :  { %p5390_p5 = scmp.ne.s32.totalorder %s6665_s9, %s5389_s8  ;;  %p5393_p6 = scmp.lt.u32.totalorder %s5389_s8, %s6665_s9 }
 0x536   :  { %p5395_p7 = pnand %p5393_p6, %p5390_p5 }
 0x538   :  { %5398 = shalt.err (!%p5395_p7)
}
 0x539   :  { %3586 = dma.vmem_to_hbm [thread:$0]  %s3584_s25, 32, %s6665_s9, [#allocation3]  }
 0x53a   :  { %5399 = dma.done.wait [#allocation3], 32  }
 0x53b   :  { %5400 = vsyncadd [#allocation3], 4294967264 }
 0x53c   :  { %3590 = vsyncpa [#allocation3], 1 }

</bundles_post_ra>
